<compile_context>
chip_gen: v7x
topology: tpu7x:2x2x1
jax: 0.10.0
libtpu: 0.0.40
codegen_flags: <defaults>
</compile_context>

<pallas_src>
import functools

import numpy as np

import jax
import jax.numpy as jnp
from jax import lax
from jax.experimental import pallas as pl
from jax.experimental.pallas import tpu as pltpu


KH = 5  # conv kernel height (= width)


# ----------------------------------------------------------------------------
# Fused conv1 -> pool -> conv2 -> pool kernel
# ----------------------------------------------------------------------------
def _conv_stack_kernel(x_ref, c1w_ref, c1b_ref, c2w_ref, c2b_ref, o_ref, a1_ref, *, bt):
    """One batch tile (bt images) per grid step.

    x_ref  : (bt, 32, 128) bf16  input rows; [0:16] = even rows, [16:32] = odd
                                 rows; lanes = cin*32 + w (96 valid, 128 padded)
    c1w_ref: (5, 128, 256) bf16  conv1 Toeplitz; lanes [0:128]/[128:256] are the
                                 even/odd pooled-column halves (84 valid each)
    c1b_ref: (1, 128)      f32   conv1 bias replicated per pooled column
    c2w_ref: (5, 128, 256) bf16  conv2 Toeplitz (K rows = conv1 output lanes)
    c2b_ref: (1, 128)      f32   conv2 bias replicated per pooled column
    o_ref  : (bt*8, 128)   bf16  conv2 pooled output; per image rows 0..4 and
                                 lanes 0..79 are valid, the rest is inert padding
    a1_ref : (bt, 24, 128) f32   VMEM scratch: conv1 pooled output
                                 (rows 0..13 valid, 14..23 zero)
    """
    f32 = jnp.float32

    # ---------------- conv1 + bias + ReLU + 2x2 maxpool ----------------
    # Full-slot matmuls: all 16 rows of each parity slot are multiplied by the
    # ki-th Toeplitz matrix; the shift selecting which input row feeds which
    # conv-output row is applied afterwards as a static sublane slice, so the
    # batch fold into M stays a contiguous reshape.
    xs = (x_ref[:, 0:16, :].reshape(bt * 16, 128),    # even input rows
          x_ref[:, 16:32, :].reshape(bt * 16, 128))   # odd input rows

    def conv1_rows(rp):
        # conv rows h = 2j + rp for all pooled rows j; returns (bt, 14, 256)
        acc = None
        for d in range(3):                            # shift group d = (rp+ki)>>1
            kis = [ki for ki in range(KH) if (rp + ki) >> 1 == d]
            if not kis:
                continue
            g = None
            for ki in kis:
                m = jnp.dot(xs[(rp + ki) & 1], c1w_ref[ki],
                            preferred_element_type=f32)        # (bt*16, 256)
                g = m if g is None else g + m
            g = g.reshape(bt, 16, 256)[:, d:d + 14, :]
            acc = g if acc is None else acc + g
        return acc

    p1 = jnp.maximum(conv1_rows(0), conv1_rows(1))    # max over row parity
    p1 = jnp.maximum(p1[:, :, :128], p1[:, :, 128:])  # max over column parity
    a1 = jnp.maximum(p1 + c1b_ref[...], 0.0)          # bias + ReLU  (bt, 14, 128)

    # Stash conv1 output (zero-padded rows 14..23) so conv2 can re-read
    # stride-2 row windows without leaving VMEM.
    a1_ref[:, 0:14, :] = a1
    a1_ref[:, 14:24, :] = jnp.zeros((bt, 10, 128), f32)

    # ---------------- conv2 + bias + ReLU + 2x2 maxpool ----------------
    def conv2_rows(rp):
        acc = None
        for ki in range(KH):
            t = rp + ki                               # first conv1 row of the window
            rows = a1_ref[:, pl.ds(t, 8, stride=2), :]   # rows t, t+2, ..., t+14
            rows = rows.reshape(bt * 8, 128).astype(jnp.bfloat16)
            m = jnp.dot(rows, c2w_ref[ki], preferred_element_type=f32)
            acc = m if acc is None else acc + m
        return acc                                    # (bt*8, 256); rows j>=5 inert

    p2 = jnp.maximum(conv2_rows(0), conv2_rows(1))    # max over row parity
    p2 = jnp.maximum(p2[:, :128], p2[:, 128:])        # max over column parity
    a2 = jnp.maximum(p2 + c2b_ref[...], 0.0)          # (bt*8, 128)
    o_ref[...] = a2.astype(o_ref.dtype)


def conv_stack(x_par, c1w, c1b, c2w, c2b, *, bt):
    """x_par: (Np, 32, 128) bf16 -> (Np*8, 128) bf16 pooled conv2 output."""
    npad = x_par.shape[0]
    assert npad % bt == 0
    kernel = functools.partial(_conv_stack_kernel, bt=bt)
    return pl.pallas_call(
        kernel,
        out_shape=jax.ShapeDtypeStruct((npad * 8, 128), jnp.bfloat16),
        grid=(npad // bt,),
        in_specs=[
            pl.BlockSpec((bt, 32, 128), lambda i: (i, 0, 0)),
            pl.BlockSpec(c1w.shape, lambda i: (0, 0, 0)),   # conv weights stay
            pl.BlockSpec(c1b.shape, lambda i: (0, 0)),      # resident in VMEM
            pl.BlockSpec(c2w.shape, lambda i: (0, 0, 0)),
            pl.BlockSpec(c2b.shape, lambda i: (0, 0)),
        ],
        out_specs=pl.BlockSpec((bt * 8, 128), lambda i: (i, 0)),
        scratch_shapes=[pltpu.VMEM((bt, 24, 128), jnp.float32)],
        compiler_params=pltpu.CompilerParams(dimension_semantics=("parallel",)),
    )(x_par, c1w, c1b, c2w, c2b)


# ----------------------------------------------------------------------------
# Fused FC stack kernel: fc1 -> ReLU -> fc2 -> ReLU -> fc3
# ----------------------------------------------------------------------------
def _fc_kernel(x_ref, w1_ref, b1_ref, w2_ref, b2_ref, w3_ref, b3_ref, o_ref):
    h = jnp.dot(x_ref[...], w1_ref[...], preferred_element_type=jnp.float32) + b1_ref[...]
    h = jnp.maximum(h, 0.0).astype(jnp.bfloat16)
    h = jnp.dot(h, w2_ref[...], preferred_element_type=jnp.float32) + b2_ref[...]
    h = jnp.maximum(h, 0.0).astype(jnp.bfloat16)
    o_ref[...] = jnp.dot(h, w3_ref[...], preferred_element_type=jnp.float32) + b3_ref[...]


def fc_stack(x, w1, b1, w2, b2, w3, b3, *, tm_max=256):
    """x: (N, 1024) bf16; weights bf16 (lane-padded); returns (N, OUTP) f32."""
    n, k = x.shape
    tm = min(tm_max, n)                               # n is a multiple of 8
    n_pad = -(-n // tm) * tm
    if n_pad != n:
        x = jnp.pad(x, ((0, n_pad - n), (0, 0)))
    outp = w3.shape[1]
    out = pl.pallas_call(
        _fc_kernel,
        out_shape=jax.ShapeDtypeStruct((n_pad, outp), jnp.float32),
        grid=(n_pad // tm,),
        in_specs=[
            pl.BlockSpec((tm, k), lambda i: (i, 0)),
            pl.BlockSpec(w1.shape, lambda i: (0, 0)),      # all FC weights stay
            pl.BlockSpec(b1.shape, lambda i: (0, 0)),      # resident in VMEM
            pl.BlockSpec(w2.shape, lambda i: (0, 0)),
            pl.BlockSpec(b2.shape, lambda i: (0, 0)),
            pl.BlockSpec(w3.shape, lambda i: (0, 0)),
            pl.BlockSpec(b3.shape, lambda i: (0, 0)),
        ],
        out_specs=pl.BlockSpec((tm, outp), lambda i: (i, 0)),
        compiler_params=pltpu.CompilerParams(dimension_semantics=("parallel",)),
    )(x, w1, b1, w2, b2, w3, b3)
    return out[:n]


# ----------------------------------------------------------------------------
# One-time weight packing (outside the forward path)
# ----------------------------------------------------------------------------
def _pack_conv(w, b, w_in):
    """Merged width-Toeplitz matrix (KH, 128, 256): lanes [0:128]=even pooled
    cols, [128:256]=odd pooled cols; K rows = cin*w_in + col, padded to 128."""
    w = np.asarray(w, np.float32)                 # (Cout, Cin, KH, KW)
    cout, cin, kh, kw = w.shape
    wp = (w_in - kw + 1) // 2                     # pooled output width
    mat = np.zeros((kh, cin, w_in, 2, cout, wp), np.float32)
    for parity in (0, 1):
        for kj in range(kw):
            for j in range(wp):
                col = 2 * j + parity + kj         # input column feeding (j, kj)
                mat[:, :, col, parity, :, j] = w[:, :, :, kj].transpose(2, 1, 0)
    mat = mat.reshape(kh, cin * w_in, 2, cout * wp)
    big = np.zeros((kh, 128, 256), np.float32)
    big[:, :cin * w_in, :cout * wp] = mat[:, :, 0, :]
    big[:, :cin * w_in, 128:128 + cout * wp] = mat[:, :, 1, :]
    bias = np.zeros((1, 128), np.float32)
    bias[0, :cout * wp] = np.repeat(np.asarray(b, np.float32), wp)
    return jnp.asarray(big, jnp.bfloat16), jnp.asarray(bias)


def pack_params(params, out_dim):
    c1w, c1b = _pack_conv(params["conv1_w"], params["conv1_b"], w_in=32)
    c2w, c2b = _pack_conv(params["conv2_w"], params["conv2_b"], w_in=14)

    # fc1: PyTorch flattens (C=16, H=5, W=5) -> c*25 + h*5 + w; the conv kernel
    # emits per image an (8, 128) slab with (row=h, lane=c*5+w) valid for h<5,
    # lane<80, so the flat feature index is h*128 + c*5 + w (K padded to 1024).
    f1 = np.asarray(params["fc1_w"], np.float32)                 # (200, 400)
    f1 = f1.reshape(200, 16, 5, 5).transpose(0, 2, 1, 3).reshape(200, 5, 80)
    w1 = np.zeros((8, 128, 256), np.float32)
    w1[:5, :80, :200] = f1.transpose(1, 2, 0)
    w1 = w1.reshape(1024, 256)
    b1 = np.zeros((1, 256), np.float32); b1[0, :200] = np.asarray(params["fc1_b"])

    w2 = np.zeros((256, 128), np.float32)
    w2[:200, :100] = np.asarray(params["fc2_w"], np.float32).T
    b2 = np.zeros((1, 128), np.float32); b2[0, :100] = np.asarray(params["fc2_b"])

    outp = max(128, -(-out_dim // 128) * 128)
    w3 = np.zeros((128, outp), np.float32)
    w3[:100, :out_dim] = np.asarray(params["fc3_w"], np.float32).T
    b3 = np.zeros((1, outp), np.float32); b3[0, :out_dim] = np.asarray(params["fc3_b"])

    return {
        "c1_w": c1w, "c1_b": c1b, "c2_w": c2w, "c2_b": c2b,
        "fc1_w": jnp.asarray(w1, jnp.bfloat16), "fc1_b": jnp.asarray(b1),
        "fc2_w": jnp.asarray(w2, jnp.bfloat16), "fc2_b": jnp.asarray(b2),
        "fc3_w": jnp.asarray(w3, jnp.bfloat16), "fc3_b": jnp.asarray(b3),
    }


# ----------------------------------------------------------------------------
# CNN forward (mirrors the PyTorch module)
# ----------------------------------------------------------------------------
def _prep_input(x, bt):
    # NCHW -> (N, H, Cin*W) padded to 128 lanes; rows regrouped as [even ; odd].
    n, c, h, w = x.shape
    xh = jnp.transpose(x, (0, 2, 1, 3)).reshape(n, h, c * w)
    xh = jnp.pad(xh, ((0, 0), (0, 0), (0, 128 - c * w)))
    xp = jnp.concatenate([xh[:, 0::2, :], xh[:, 1::2, :]], axis=1)   # (N, 32, 128)
    n_pad = -(-n // bt) * bt
    if n_pad != n:
        xp = jnp.pad(xp, ((0, n_pad - n), (0, 0), (0, 0)))
    return xp.astype(jnp.bfloat16)


def cnn_forward(packed, x, *, out_dim, bt=8):
    n = x.shape[0]
    xp = _prep_input(x, bt)                                         # (Np, 32, 128)
    a2 = conv_stack(xp, packed["c1_w"], packed["c1_b"],
                    packed["c2_w"], packed["c2_b"], bt=bt)          # (Np*8, 128) bf16
    flat = a2.reshape(xp.shape[0], 8 * 128)                         # free reshape
    logits = fc_stack(flat,
                      packed["fc1_w"], packed["fc1_b"],
                      packed["fc2_w"], packed["fc2_b"],
                      packed["fc3_w"], packed["fc3_b"])
    return logits[:n, :out_dim]


# ----------------------------------------------------------------------------
# Parameter init (PyTorch-style uniform) and pure-JAX f32 reference
# ----------------------------------------------------------------------------
def init_params(out, key):
    ks = jax.random.split(key, 10)

    def u(k, shape, fan_in):
        bound = 1.0 / jnp.sqrt(fan_in)
        return jax.random.uniform(k, shape, jnp.float32, -bound, bound)

    return {
        "conv1_w": u(ks[0], (6, 3, 5, 5), 3 * 5 * 5),
        "conv1_b": u(ks[1], (6,), 3 * 5 * 5),
        "conv2_w": u(ks[2], (16, 6, 5, 5), 6 * 5 * 5),
        "conv2_b": u(ks[3], (16,), 6 * 5 * 5),
        "fc1_w": u(ks[4], (200, 400), 400),
        "fc1_b": u(ks[5], (200,), 400),
        "fc2_w": u(ks[6], (100, 200), 200),
        "fc2_b": u(ks[7], (100,), 200),
        "fc3_w": u(ks[8], (out, 100), 100),
        "fc3_b": u(ks[9], (out,), 100),
    }


def _ref_pool(x):
    return lax.reduce_window(x, -jnp.inf, lax.max, (1, 1, 2, 2), (1, 1, 2, 2), "VALID")


def cnn_reference(params, x):
    dn = lax.conv_dimension_numbers(x.shape, params["conv1_w"].shape, ("NCHW", "OIHW", "NCHW"))
    c1 = lax.conv_general_dilated(x, params["conv1_w"], (1, 1), "VALID", dimension_numbers=dn)
    c1 = jnp.maximum(c1 + params["conv1_b"][None, :, None, None], 0.0)
    p1 = _ref_pool(c1)
    dn2 = lax.conv_dimension_numbers(p1.shape, params["conv2_w"].shape, ("NCHW", "OIHW", "NCHW"))
    c2 = lax.conv_general_dilated(p1, params["conv2_w"], (1, 1), "VALID", dimension_numbers=dn2)
    c2 = jnp.maximum(c2 + params["conv2_b"][None, :, None, None], 0.0)
    p2 = _ref_pool(c2)
    h = p2.reshape(p2.shape[0], 400)
    h = jnp.maximum(h @ params["fc1_w"].T + params["fc1_b"], 0.0)
    h = jnp.maximum(h @ params["fc2_w"].T + params["fc2_b"], 0.0)
    return h @ params["fc3_w"].T + params["fc3_b"]


# ----------------------------------------------------------------------------
if __name__ == "__main__":
    OUT = 10
    key = jax.random.PRNGKey(0)
    k_param, k_x = jax.random.split(key)

    params = init_params(OUT, k_param)
    packed = pack_params(params, OUT)                     # one-time weight packing
    x = jax.random.normal(k_x, (2, 3, 32, 32), jnp.float32)

    fwd = jax.jit(functools.partial(cnn_forward, out_dim=OUT))
    y = jax.block_until_ready(fwd(packed, x))

    y_ref = cnn_reference(params, x)
    assert y.shape == (2, OUT)
    err = float(jnp.max(jnp.abs(y - y_ref)))
    # bf16 matmul operands (f32 accumulation) => loose-ish tolerance vs f32 ref
    assert err < 5e-2, f"mismatch vs reference: max abs err {err}"

    print("KERNEL_OK")
</pallas_src>

<mosaic_0001>
module attributes {stable_mosaic.version = 11 : i64} {
  func.func @_fc_kernel(%arg0: i32, %arg1: memref<8x1024xbf16, #tpu.memory_space<vmem>>, %arg2: memref<1024x256xbf16, #tpu.memory_space<vmem>>, %arg3: memref<1x256xf32, #tpu.memory_space<vmem>>, %arg4: memref<256x128xbf16, #tpu.memory_space<vmem>>, %arg5: memref<1x128xf32, #tpu.memory_space<vmem>>, %arg6: memref<128x128xbf16, #tpu.memory_space<vmem>>, %arg7: memref<1x128xf32, #tpu.memory_space<vmem>>, %arg8: memref<8x128xf32, #tpu.memory_space<vmem>>) attributes {dimension_semantics = [#tpu.dimension_semantics<parallel>], iteration_bounds = array<i64: 1>, scalar_prefetch = 0 : i64, scratch_operands = 0 : i64, tpu.core_type = #tpu.core_type<tc>, window_params = [{transform_indices = @transform_0, window_bounds = array<i64: 8, 1024>}, {pipeline_mode = #tpu.pipeline_mode<synchronous>, transform_indices = @transform_1, window_bounds = array<i64: 1024, 256>}, {pipeline_mode = #tpu.pipeline_mode<synchronous>, transform_indices = @transform_2, window_bounds = array<i64: 1, 256>}, {pipeline_mode = #tpu.pipeline_mode<synchronous>, transform_indices = @transform_3, window_bounds = array<i64: 256, 128>}, {pipeline_mode = #tpu.pipeline_mode<synchronous>, transform_indices = @transform_4, window_bounds = array<i64: 1, 128>}, {pipeline_mode = #tpu.pipeline_mode<synchronous>, transform_indices = @transform_5, window_bounds = array<i64: 128, 128>}, {pipeline_mode = #tpu.pipeline_mode<synchronous>, transform_indices = @transform_6, window_bounds = array<i64: 1, 128>}, {transform_indices = @transform_7, window_bounds = array<i64: 8, 128>}]} {
    %c0 = arith.constant 0 : index
    %c0_0 = arith.constant 0 : index
    %0 = vector.load %arg1[%c0, %c0_0] : memref<8x1024xbf16, #tpu.memory_space<vmem>>, vector<8x1024xbf16>
    %c0_1 = arith.constant 0 : index
    %c0_2 = arith.constant 0 : index
    %1 = vector.load %arg2[%c0_1, %c0_2] : memref<1024x256xbf16, #tpu.memory_space<vmem>>, vector<1024x256xbf16>
    %cst = arith.constant dense<0.000000e+00> : vector<8x256xf32>
    %2 = tpu.matmul %0, %1, %cst {dimension_numbers = #tpu.dot_dimension_numbers<[1], [0], [0], [1], [0, 0, 1, 1], [], []>} : vector<8x1024xbf16>, vector<1024x256xbf16>, vector<8x256xf32> -> vector<8x256xf32>
    %c0_3 = arith.constant 0 : index
    %c0_4 = arith.constant 0 : index
    %3 = vector.load %arg3[%c0_3, %c0_4] : memref<1x256xf32, #tpu.memory_space<vmem>>, vector<1x256xf32>
    %4 = vector.broadcast %3 : vector<1x256xf32> to vector<8x256xf32>
    %5 = arith.addf %2, %4 : vector<8x256xf32>
    %cst_5 = arith.constant 0.000000e+00 : f32
    %6 = vector.broadcast %cst_5 : f32 to vector<8x256xf32>
    %7 = arith.maximumf %5, %6 : vector<8x256xf32>
    %8 = arith.truncf %7 : vector<8x256xf32> to vector<8x256xbf16>
    %c0_6 = arith.constant 0 : index
    %c0_7 = arith.constant 0 : index
    %9 = vector.load %arg4[%c0_6, %c0_7] : memref<256x128xbf16, #tpu.memory_space<vmem>>, vector<256x128xbf16>
    %cst_8 = arith.constant dense<0.000000e+00> : vector<8x128xf32>
    %10 = tpu.matmul %8, %9, %cst_8 {dimension_numbers = #tpu.dot_dimension_numbers<[1], [0], [0], [1], [0, 0, 1, 1], [], []>} : vector<8x256xbf16>, vector<256x128xbf16>, vector<8x128xf32> -> vector<8x128xf32>
    %c0_9 = arith.constant 0 : index
    %c0_10 = arith.constant 0 : index
    %11 = vector.load %arg5[%c0_9, %c0_10] : memref<1x128xf32, #tpu.memory_space<vmem>>, vector<1x128xf32>
    %12 = vector.broadcast %11 : vector<1x128xf32> to vector<8x128xf32>
    %13 = arith.addf %10, %12 : vector<8x128xf32>
    %cst_11 = arith.constant 0.000000e+00 : f32
    %14 = vector.broadcast %cst_11 : f32 to vector<8x128xf32>
    %15 = arith.maximumf %13, %14 : vector<8x128xf32>
    %16 = arith.truncf %15 : vector<8x128xf32> to vector<8x128xbf16>
    %c0_12 = arith.constant 0 : index
    %c0_13 = arith.constant 0 : index
    %17 = vector.load %arg6[%c0_12, %c0_13] : memref<128x128xbf16, #tpu.memory_space<vmem>>, vector<128x128xbf16>
    %cst_14 = arith.constant dense<0.000000e+00> : vector<8x128xf32>
    %18 = tpu.matmul %16, %17, %cst_14 {dimension_numbers = #tpu.dot_dimension_numbers<[1], [0], [0], [1], [0, 0, 1, 1], [], []>} : vector<8x128xbf16>, vector<128x128xbf16>, vector<8x128xf32> -> vector<8x128xf32>
    %c0_15 = arith.constant 0 : index
    %c0_16 = arith.constant 0 : index
    %19 = vector.load %arg7[%c0_15, %c0_16] : memref<1x128xf32, #tpu.memory_space<vmem>>, vector<1x128xf32>
    %20 = vector.broadcast %19 : vector<1x128xf32> to vector<8x128xf32>
    %21 = arith.addf %18, %20 : vector<8x128xf32>
    %c0_17 = arith.constant 0 : index
    %c0_18 = arith.constant 0 : index
    %22 = vector.load %arg8[%c0_17, %c0_18] : memref<8x128xf32, #tpu.memory_space<vmem>>, vector<8x128xf32>
    tpu.vector_store %arg8[%c0_17, %c0_18], %21 {strides = array<i32>} : memref<8x128xf32, #tpu.memory_space<vmem>>, vector<8x128xf32>,
    return
  }
  func.func @transform_0(%arg0: i32) -> (i32, i32) {
    %c0_i32 = arith.constant 0 : i32
    %c0_i32_0 = arith.constant 0 : i32
    return %arg0, %c0_i32 : i32, i32
  }
  func.func @transform_1(%arg0: i32) -> (i32, i32) {
    %c0_i32 = arith.constant 0 : i32
    %c0_i32_0 = arith.constant 0 : i32
    %c0_i32_1 = arith.constant 0 : i32
    return %c0_i32, %c0_i32_0 : i32, i32
  }
  func.func @transform_2(%arg0: i32) -> (i32, i32) {
    %c0_i32 = arith.constant 0 : i32
    %c0_i32_0 = arith.constant 0 : i32
    %c0_i32_1 = arith.constant 0 : i32
    return %c0_i32, %c0_i32_0 : i32, i32
  }
  func.func @transform_3(%arg0: i32) -> (i32, i32) {
    %c0_i32 = arith.constant 0 : i32
    %c0_i32_0 = arith.constant 0 : i32
    %c0_i32_1 = arith.constant 0 : i32
    return %c0_i32, %c0_i32_0 : i32, i32
  }
  func.func @transform_4(%arg0: i32) -> (i32, i32) {
    %c0_i32 = arith.constant 0 : i32
    %c0_i32_0 = arith.constant 0 : i32
    %c0_i32_1 = arith.constant 0 : i32
    return %c0_i32, %c0_i32_0 : i32, i32
  }
  func.func @transform_5(%arg0: i32) -> (i32, i32) {
    %c0_i32 = arith.constant 0 : i32
    %c0_i32_0 = arith.constant 0 : i32
    %c0_i32_1 = arith.constant 0 : i32
    return %c0_i32, %c0_i32_0 : i32, i32
  }
  func.func @transform_6(%arg0: i32) -> (i32, i32) {
    %c0_i32 = arith.constant 0 : i32
    %c0_i32_0 = arith.constant 0 : i32
    %c0_i32_1 = arith.constant 0 : i32
    return %c0_i32, %c0_i32_0 : i32, i32
  }
  func.func @transform_7(%arg0: i32) -> (i32, i32) {
    %c0_i32 = arith.constant 0 : i32
    %c0_i32_0 = arith.constant 0 : i32
    return %arg0, %c0_i32 : i32, i32
  }
}

module attributes {stable_mosaic.version = 11 : i64} {
  func.func @_conv_stack_kernel(%arg0: i32, %arg1: memref<8x32x128xbf16, #tpu.memory_space<vmem>>, %arg2: memref<5x128x256xbf16, #tpu.memory_space<vmem>>, %arg3: memref<1x128xf32, #tpu.memory_space<vmem>>, %arg4: memref<5x128x256xbf16, #tpu.memory_space<vmem>>, %arg5: memref<1x128xf32, #tpu.memory_space<vmem>>, %arg6: memref<64x128xbf16, #tpu.memory_space<vmem>>, %arg7: memref<8x24x128xf32, #tpu.memory_space<vmem>>) attributes {dimension_semantics = [#tpu.dimension_semantics<parallel>], iteration_bounds = array<i64: 1>, scalar_prefetch = 0 : i64, scratch_operands = 1 : i64, tpu.core_type = #tpu.core_type<tc>, window_params = [{transform_indices = @transform_0, window_bounds = array<i64: 8, 32, 128>}, {pipeline_mode = #tpu.pipeline_mode<synchronous>, transform_indices = @transform_1, window_bounds = array<i64: 5, 128, 256>}, {pipeline_mode = #tpu.pipeline_mode<synchronous>, transform_indices = @transform_2, window_bounds = array<i64: 1, 128>}, {pipeline_mode = #tpu.pipeline_mode<synchronous>, transform_indices = @transform_3, window_bounds = array<i64: 5, 128, 256>}, {pipeline_mode = #tpu.pipeline_mode<synchronous>, transform_indices = @transform_4, window_bounds = array<i64: 1, 128>}, {transform_indices = @transform_5, window_bounds = array<i64: 64, 128>}]} {
    %c0 = arith.constant 0 : index
    %c0_0 = arith.constant 0 : index
    %c0_1 = arith.constant 0 : index
    %0 = vector.load %arg1[%c0, %c0_0, %c0_1] : memref<8x32x128xbf16, #tpu.memory_space<vmem>>, vector<8x16x128xbf16>
    %1 = vector.shape_cast %0 : vector<8x16x128xbf16> to vector<128x128xbf16>
    %c0_2 = arith.constant 0 : index
    %c16 = arith.constant 16 : index
    %c0_3 = arith.constant 0 : index
    %2 = vector.load %arg1[%c0_2, %c16, %c0_3] : memref<8x32x128xbf16, #tpu.memory_space<vmem>>, vector<8x16x128xbf16>
    %3 = vector.shape_cast %2 : vector<8x16x128xbf16> to vector<128x128xbf16>
    %c0_4 = arith.constant 0 : index
    %c0_5 = arith.constant 0 : index
    %c0_6 = arith.constant 0 : index
    %4 = vector.load %arg2[%c0_4, %c0_5, %c0_6] : memref<5x128x256xbf16, #tpu.memory_space<vmem>>, vector<1x128x256xbf16>
    %5 = vector.shape_cast %4 : vector<1x128x256xbf16> to vector<128x256xbf16>
    %cst = arith.constant dense<0.000000e+00> : vector<128x256xf32>
    %6 = tpu.matmul %1, %5, %cst {dimension_numbers = #tpu.dot_dimension_numbers<[1], [0], [0], [1], [0, 0, 1, 1], [], []>} : vector<128x128xbf16>, vector<128x256xbf16>, vector<128x256xf32> -> vector<128x256xf32>
    %c1 = arith.constant 1 : index
    %c0_7 = arith.constant 0 : index
    %c0_8 = arith.constant 0 : index
    %7 = vector.load %arg2[%c1, %c0_7, %c0_8] : memref<5x128x256xbf16, #tpu.memory_space<vmem>>, vector<1x128x256xbf16>
    %8 = vector.shape_cast %7 : vector<1x128x256xbf16> to vector<128x256xbf16>
    %cst_9 = arith.constant dense<0.000000e+00> : vector<128x256xf32>
    %9 = tpu.matmul %3, %8, %cst_9 {dimension_numbers = #tpu.dot_dimension_numbers<[1], [0], [0], [1], [0, 0, 1, 1], [], []>} : vector<128x128xbf16>, vector<128x256xbf16>, vector<128x256xf32> -> vector<128x256xf32>
    %10 = arith.addf %6, %9 : vector<128x256xf32>
    %11 = vector.shape_cast %10 : vector<128x256xf32> to vector<8x16x256xf32>
    %12 = vector.extract_strided_slice %11 {offsets = [0, 0, 0], sizes = [8, 14, 256], strides = [1, 1, 1]} : vector<8x16x256xf32> to vector<8x14x256xf32>
    %c2 = arith.constant 2 : index
    %c0_10 = arith.constant 0 : index
    %c0_11 = arith.constant 0 : index
    %13 = vector.load %arg2[%c2, %c0_10, %c0_11] : memref<5x128x256xbf16, #tpu.memory_space<vmem>>, vector<1x128x256xbf16>
    %14 = vector.shape_cast %13 : vector<1x128x256xbf16> to vector<128x256xbf16>
    %cst_12 = arith.constant dense<0.000000e+00> : vector<128x256xf32>
    %15 = tpu.matmul %1, %14, %cst_12 {dimension_numbers = #tpu.dot_dimension_numbers<[1], [0], [0], [1], [0, 0, 1, 1], [], []>} : vector<128x128xbf16>, vector<128x256xbf16>, vector<128x256xf32> -> vector<128x256xf32>
    %c3 = arith.constant 3 : index
    %c0_13 = arith.constant 0 : index
    %c0_14 = arith.constant 0 : index
    %16 = vector.load %arg2[%c3, %c0_13, %c0_14] : memref<5x128x256xbf16, #tpu.memory_space<vmem>>, vector<1x128x256xbf16>
    %17 = vector.shape_cast %16 : vector<1x128x256xbf16> to vector<128x256xbf16>
    %cst_15 = arith.constant dense<0.000000e+00> : vector<128x256xf32>
    %18 = tpu.matmul %3, %17, %cst_15 {dimension_numbers = #tpu.dot_dimension_numbers<[1], [0], [0], [1], [0, 0, 1, 1], [], []>} : vector<128x128xbf16>, vector<128x256xbf16>, vector<128x256xf32> -> vector<128x256xf32>
    %19 = arith.addf %15, %18 : vector<128x256xf32>
    %20 = vector.shape_cast %19 : vector<128x256xf32> to vector<8x16x256xf32>
    %21 = vector.extract_strided_slice %20 {offsets = [0, 1, 0], sizes = [8, 14, 256], strides = [1, 1, 1]} : vector<8x16x256xf32> to vector<8x14x256xf32>
    %22 = arith.addf %12, %21 : vector<8x14x256xf32>
    %c4 = arith.constant 4 : index
    %c0_16 = arith.constant 0 : index
    %c0_17 = arith.constant 0 : index
    %23 = vector.load %arg2[%c4, %c0_16, %c0_17] : memref<5x128x256xbf16, #tpu.memory_space<vmem>>, vector<1x128x256xbf16>
    %24 = vector.shape_cast %23 : vector<1x128x256xbf16> to vector<128x256xbf16>
    %cst_18 = arith.constant dense<0.000000e+00> : vector<128x256xf32>
    %25 = tpu.matmul %1, %24, %cst_18 {dimension_numbers = #tpu.dot_dimension_numbers<[1], [0], [0], [1], [0, 0, 1, 1], [], []>} : vector<128x128xbf16>, vector<128x256xbf16>, vector<128x256xf32> -> vector<128x256xf32>
    %26 = vector.shape_cast %25 : vector<128x256xf32> to vector<8x16x256xf32>
    %27 = vector.extract_strided_slice %26 {offsets = [0, 2, 0], sizes = [8, 14, 256], strides = [1, 1, 1]} : vector<8x16x256xf32> to vector<8x14x256xf32>
    %28 = arith.addf %22, %27 : vector<8x14x256xf32>
    %c0_19 = arith.constant 0 : index
    %c0_20 = arith.constant 0 : index
    %c0_21 = arith.constant 0 : index
    %29 = vector.load %arg2[%c0_19, %c0_20, %c0_21] : memref<5x128x256xbf16, #tpu.memory_space<vmem>>, vector<1x128x256xbf16>
    %30 = vector.shape_cast %29 : vector<1x128x256xbf16> to vector<128x256xbf16>
    %cst_22 = arith.constant dense<0.000000e+00> : vector<128x256xf32>
    %31 = tpu.matmul %3, %30, %cst_22 {dimension_numbers = #tpu.dot_dimension_numbers<[1], [0], [0], [1], [0, 0, 1, 1], [], []>} : vector<128x128xbf16>, vector<128x256xbf16>, vector<128x256xf32> -> vector<128x256xf32>
    %32 = vector.shape_cast %31 : vector<128x256xf32> to vector<8x16x256xf32>
    %33 = vector.extract_strided_slice %32 {offsets = [0, 0, 0], sizes = [8, 14, 256], strides = [1, 1, 1]} : vector<8x16x256xf32> to vector<8x14x256xf32>
    %c1_23 = arith.constant 1 : index
    %c0_24 = arith.constant 0 : index
    %c0_25 = arith.constant 0 : index
    %34 = vector.load %arg2[%c1_23, %c0_24, %c0_25] : memref<5x128x256xbf16, #tpu.memory_space<vmem>>, vector<1x128x256xbf16>
    %35 = vector.shape_cast %34 : vector<1x128x256xbf16> to vector<128x256xbf16>
    %cst_26 = arith.constant dense<0.000000e+00> : vector<128x256xf32>
    %36 = tpu.matmul %1, %35, %cst_26 {dimension_numbers = #tpu.dot_dimension_numbers<[1], [0], [0], [1], [0, 0, 1, 1], [], []>} : vector<128x128xbf16>, vector<128x256xbf16>, vector<128x256xf32> -> vector<128x256xf32>
    %c2_27 = arith.constant 2 : index
    %c0_28 = arith.constant 0 : index
    %c0_29 = arith.constant 0 : index
    %37 = vector.load %arg2[%c2_27, %c0_28, %c0_29] : memref<5x128x256xbf16, #tpu.memory_space<vmem>>, vector<1x128x256xbf16>
    %38 = vector.shape_cast %37 : vector<1x128x256xbf16> to vector<128x256xbf16>
    %cst_30 = arith.constant dense<0.000000e+00> : vector<128x256xf32>
    %39 = tpu.matmul %3, %38, %cst_30 {dimension_numbers = #tpu.dot_dimension_numbers<[1], [0], [0], [1], [0, 0, 1, 1], [], []>} : vector<128x128xbf16>, vector<128x256xbf16>, vector<128x256xf32> -> vector<128x256xf32>
    %40 = arith.addf %36, %39 : vector<128x256xf32>
    %41 = vector.shape_cast %40 : vector<128x256xf32> to vector<8x16x256xf32>
    %42 = vector.extract_strided_slice %41 {offsets = [0, 1, 0], sizes = [8, 14, 256], strides = [1, 1, 1]} : vector<8x16x256xf32> to vector<8x14x256xf32>
    %43 = arith.addf %33, %42 : vector<8x14x256xf32>
    %c3_31 = arith.constant 3 : index
    %c0_32 = arith.constant 0 : index
    %c0_33 = arith.constant 0 : index
    %44 = vector.load %arg2[%c3_31, %c0_32, %c0_33] : memref<5x128x256xbf16, #tpu.memory_space<vmem>>, vector<1x128x256xbf16>
    %45 = vector.shape_cast %44 : vector<1x128x256xbf16> to vector<128x256xbf16>
    %cst_34 = arith.constant dense<0.000000e+00> : vector<128x256xf32>
    %46 = tpu.matmul %1, %45, %cst_34 {dimension_numbers = #tpu.dot_dimension_numbers<[1], [0], [0], [1], [0, 0, 1, 1], [], []>} : vector<128x128xbf16>, vector<128x256xbf16>, vector<128x256xf32> -> vector<128x256xf32>
    %c4_35 = arith.constant 4 : index
    %c0_36 = arith.constant 0 : index
    %c0_37 = arith.constant 0 : index
    %47 = vector.load %arg2[%c4_35, %c0_36, %c0_37] : memref<5x128x256xbf16, #tpu.memory_space<vmem>>, vector<1x128x256xbf16>
    %48 = vector.shape_cast %47 : vector<1x128x256xbf16> to vector<128x256xbf16>
    %cst_38 = arith.constant dense<0.000000e+00> : vector<128x256xf32>
    %49 = tpu.matmul %3, %48, %cst_38 {dimension_numbers = #tpu.dot_dimension_numbers<[1], [0], [0], [1], [0, 0, 1, 1], [], []>} : vector<128x128xbf16>, vector<128x256xbf16>, vector<128x256xf32> -> vector<128x256xf32>
    %50 = arith.addf %46, %49 : vector<128x256xf32>
    %51 = vector.shape_cast %50 : vector<128x256xf32> to vector<8x16x256xf32>
    %52 = vector.extract_strided_slice %51 {offsets = [0, 2, 0], sizes = [8, 14, 256], strides = [1, 1, 1]} : vector<8x16x256xf32> to vector<8x14x256xf32>
    %53 = arith.addf %43, %52 : vector<8x14x256xf32>
    %54 = arith.maximumf %28, %53 : vector<8x14x256xf32>
    %55 = vector.extract_strided_slice %54 {offsets = [0, 0, 0], sizes = [8, 14, 128], strides = [1, 1, 1]} : vector<8x14x256xf32> to vector<8x14x128xf32>
    %56 = vector.extract_strided_slice %54 {offsets = [0, 0, 128], sizes = [8, 14, 128], strides = [1, 1, 1]} : vector<8x14x256xf32> to vector<8x14x128xf32>
    %57 = arith.maximumf %55, %56 : vector<8x14x128xf32>
    %c0_39 = arith.constant 0 : index
    %c0_40 = arith.constant 0 : index
    %58 = vector.load %arg3[%c0_39, %c0_40] : memref<1x128xf32, #tpu.memory_space<vmem>>, vector<1x128xf32>
    %59 = vector.shape_cast %58 : vector<1x128xf32> to vector<1x1x128xf32>
    %60 = vector.broadcast %59 : vector<1x1x128xf32> to vector<8x14x128xf32>
    %61 = arith.addf %57, %60 : vector<8x14x128xf32>
    %cst_41 = arith.constant 0.000000e+00 : f32
    %62 = vector.broadcast %cst_41 : f32 to vector<8x14x128xf32>
    %63 = arith.maximumf %61, %62 : vector<8x14x128xf32>
    %c0_42 = arith.constant 0 : index
    %c0_43 = arith.constant 0 : index
    %c0_44 = arith.constant 0 : index
    %64 = vector.load %arg7[%c0_42, %c0_43, %c0_44] : memref<8x24x128xf32, #tpu.memory_space<vmem>>, vector<8x14x128xf32>
    tpu.vector_store %arg7[%c0_42, %c0_43, %c0_44], %63 {strides = array<i32>} : memref<8x24x128xf32, #tpu.memory_space<vmem>>, vector<8x14x128xf32>,
    %cst_45 = arith.constant 0.000000e+00 : f32
    %65 = vector.broadcast %cst_45 : f32 to vector<8x10x128xf32>
    %c0_46 = arith.constant 0 : index
    %c14 = arith.constant 14 : index
    %c0_47 = arith.constant 0 : index
    %66 = vector.load %arg7[%c0_46, %c14, %c0_47] : memref<8x24x128xf32, #tpu.memory_space<vmem>>, vector<8x10x128xf32>
    tpu.vector_store %arg7[%c0_46, %c14, %c0_47], %65 {strides = array<i32>} : memref<8x24x128xf32, #tpu.memory_space<vmem>>, vector<8x10x128xf32>,
    %c0_48 = arith.constant 0 : index
    %c0_49 = arith.constant 0 : index
    %c0_50 = arith.constant 0 : index
    %67 = tpu.strided_load %arg7[%c0_48, %c0_49, %c0_50] {strides = array<i32: 1, 2, 1>} : memref<8x24x128xf32, #tpu.memory_space<vmem>>, vector<8x8x128xf32>
    %68 = vector.shape_cast %67 : vector<8x8x128xf32> to vector<64x128xf32>
    %69 = arith.truncf %68 : vector<64x128xf32> to vector<64x128xbf16>
    %c0_51 = arith.constant 0 : index
    %c0_52 = arith.constant 0 : index
    %c0_53 = arith.constant 0 : index
    %70 = vector.load %arg4[%c0_51, %c0_52, %c0_53] : memref<5x128x256xbf16, #tpu.memory_space<vmem>>, vector<1x128x256xbf16>
    %71 = vector.shape_cast %70 : vector<1x128x256xbf16> to vector<128x256xbf16>
    %cst_54 = arith.constant dense<0.000000e+00> : vector<64x256xf32>
    %72 = tpu.matmul %69, %71, %cst_54 {dimension_numbers = #tpu.dot_dimension_numbers<[1], [0], [0], [1], [0, 0, 1, 1], [], []>} : vector<64x128xbf16>, vector<128x256xbf16>, vector<64x256xf32> -> vector<64x256xf32>
    %c0_55 = arith.constant 0 : index
    %c1_56 = arith.constant 1 : index
    %c0_57 = arith.constant 0 : index
    %73 = tpu.strided_load %arg7[%c0_55, %c1_56, %c0_57] {strides = array<i32: 1, 2, 1>} : memref<8x24x128xf32, #tpu.memory_space<vmem>>, vector<8x8x128xf32>
    %74 = vector.shape_cast %73 : vector<8x8x128xf32> to vector<64x128xf32>
    %75 = arith.truncf %74 : vector<64x128xf32> to vector<64x128xbf16>
    %c1_58 = arith.constant 1 : index
    %c0_59 = arith.constant 0 : index
    %c0_60 = arith.constant 0 : index
    %76 = vector.load %arg4[%c1_58, %c0_59, %c0_60] : memref<5x128x256xbf16, #tpu.memory_space<vmem>>, vector<1x128x256xbf16>
    %77 = vector.shape_cast %76 : vector<1x128x256xbf16> to vector<128x256xbf16>
    %cst_61 = arith.constant dense<0.000000e+00> : vector<64x256xf32>
    %78 = tpu.matmul %75, %77, %cst_61 {dimension_numbers = #tpu.dot_dimension_numbers<[1], [0], [0], [1], [0, 0, 1, 1], [], []>} : vector<64x128xbf16>, vector<128x256xbf16>, vector<64x256xf32> -> vector<64x256xf32>
    %79 = arith.addf %72, %78 : vector<64x256xf32>
    %c0_62 = arith.constant 0 : index
    %c2_63 = arith.constant 2 : index
    %c0_64 = arith.constant 0 : index
    %80 = tpu.strided_load %arg7[%c0_62, %c2_63, %c0_64] {strides = array<i32: 1, 2, 1>} : memref<8x24x128xf32, #tpu.memory_space<vmem>>, vector<8x8x128xf32>
    %81 = vector.shape_cast %80 : vector<8x8x128xf32> to vector<64x128xf32>
    %82 = arith.truncf %81 : vector<64x128xf32> to vector<64x128xbf16>
    %c2_65 = arith.constant 2 : index
    %c0_66 = arith.constant 0 : index
    %c0_67 = arith.constant 0 : index
    %83 = vector.load %arg4[%c2_65, %c0_66, %c0_67] : memref<5x128x256xbf16, #tpu.memory_space<vmem>>, vector<1x128x256xbf16>
    %84 = vector.shape_cast %83 : vector<1x128x256xbf16> to vector<128x256xbf16>
    %cst_68 = arith.constant dense<0.000000e+00> : vector<64x256xf32>
    %85 = tpu.matmul %82, %84, %cst_68 {dimension_numbers = #tpu.dot_dimension_numbers<[1], [0], [0], [1], [0, 0, 1, 1], [], []>} : vector<64x128xbf16>, vector<128x256xbf16>, vector<64x256xf32> -> vector<64x256xf32>
    %86 = arith.addf %79, %85 : vector<64x256xf32>
    %c0_69 = arith.constant 0 : index
    %c3_70 = arith.constant 3 : index
    %c0_71 = arith.constant 0 : index
    %87 = tpu.strided_load %arg7[%c0_69, %c3_70, %c0_71] {strides = array<i32: 1, 2, 1>} : memref<8x24x128xf32, #tpu.memory_space<vmem>>, vector<8x8x128xf32>
    %88 = vector.shape_cast %87 : vector<8x8x128xf32> to vector<64x128xf32>
    %89 = arith.truncf %88 : vector<64x128xf32> to vector<64x128xbf16>
    %c3_72 = arith.constant 3 : index
    %c0_73 = arith.constant 0 : index
    %c0_74 = arith.constant 0 : index
    %90 = vector.load %arg4[%c3_72, %c0_73, %c0_74] : memref<5x128x256xbf16, #tpu.memory_space<vmem>>, vector<1x128x256xbf16>
    %91 = vector.shape_cast %90 : vector<1x128x256xbf16> to vector<128x256xbf16>
    %cst_75 = arith.constant dense<0.000000e+00> : vector<64x256xf32>
    %92 = tpu.matmul %89, %91, %cst_75 {dimension_numbers = #tpu.dot_dimension_numbers<[1], [0], [0], [1], [0, 0, 1, 1], [], []>} : vector<64x128xbf16>, vector<128x256xbf16>, vector<64x256xf32> -> vector<64x256xf32>
    %93 = arith.addf %86, %92 : vector<64x256xf32>
    %c0_76 = arith.constant 0 : index
    %c4_77 = arith.constant 4 : index
    %c0_78 = arith.constant 0 : index
    %94 = tpu.strided_load %arg7[%c0_76, %c4_77, %c0_78] {strides = array<i32: 1, 2, 1>} : memref<8x24x128xf32, #tpu.memory_space<vmem>>, vector<8x8x128xf32>
    %95 = vector.shape_cast %94 : vector<8x8x128xf32> to vector<64x128xf32>
    %96 = arith.truncf %95 : vector<64x128xf32> to vector<64x128xbf16>
    %c4_79 = arith.constant 4 : index
    %c0_80 = arith.constant 0 : index
    %c0_81 = arith.constant 0 : index
    %97 = vector.load %arg4[%c4_79, %c0_80, %c0_81] : memref<5x128x256xbf16, #tpu.memory_space<vmem>>, vector<1x128x256xbf16>
    %98 = vector.shape_cast %97 : vector<1x128x256xbf16> to vector<128x256xbf16>
    %cst_82 = arith.constant dense<0.000000e+00> : vector<64x256xf32>
    %99 = tpu.matmul %96, %98, %cst_82 {dimension_numbers = #tpu.dot_dimension_numbers<[1], [0], [0], [1], [0, 0, 1, 1], [], []>} : vector<64x128xbf16>, vector<128x256xbf16>, vector<64x256xf32> -> vector<64x256xf32>
    %100 = arith.addf %93, %99 : vector<64x256xf32>
    %c0_83 = arith.constant 0 : index
    %c1_84 = arith.constant 1 : index
    %c0_85 = arith.constant 0 : index
    %101 = tpu.strided_load %arg7[%c0_83, %c1_84, %c0_85] {strides = array<i32: 1, 2, 1>} : memref<8x24x128xf32, #tpu.memory_space<vmem>>, vector<8x8x128xf32>
    %102 = vector.shape_cast %101 : vector<8x8x128xf32> to vector<64x128xf32>
    %103 = arith.truncf %102 : vector<64x128xf32> to vector<64x128xbf16>
    %c0_86 = arith.constant 0 : index
    %c0_87 = arith.constant 0 : index
    %c0_88 = arith.constant 0 : index
    %104 = vector.load %arg4[%c0_86, %c0_87, %c0_88] : memref<5x128x256xbf16, #tpu.memory_space<vmem>>, vector<1x128x256xbf16>
    %105 = vector.shape_cast %104 : vector<1x128x256xbf16> to vector<128x256xbf16>
    %cst_89 = arith.constant dense<0.000000e+00> : vector<64x256xf32>
    %106 = tpu.matmul %103, %105, %cst_89 {dimension_numbers = #tpu.dot_dimension_numbers<[1], [0], [0], [1], [0, 0, 1, 1], [], []>} : vector<64x128xbf16>, vector<128x256xbf16>, vector<64x256xf32> -> vector<64x256xf32>
    %c0_90 = arith.constant 0 : index
    %c2_91 = arith.constant 2 : index
    %c0_92 = arith.constant 0 : index
    %107 = tpu.strided_load %arg7[%c0_90, %c2_91, %c0_92] {strides = array<i32: 1, 2, 1>} : memref<8x24x128xf32, #tpu.memory_space<vmem>>, vector<8x8x128xf32>
    %108 = vector.shape_cast %107 : vector<8x8x128xf32> to vector<64x128xf32>
    %109 = arith.truncf %108 : vector<64x128xf32> to vector<64x128xbf16>
    %c1_93 = arith.constant 1 : index
    %c0_94 = arith.constant 0 : index
    %c0_95 = arith.constant 0 : index
    %110 = vector.load %arg4[%c1_93, %c0_94, %c0_95] : memref<5x128x256xbf16, #tpu.memory_space<vmem>>, vector<1x128x256xbf16>
    %111 = vector.shape_cast %110 : vector<1x128x256xbf16> to vector<128x256xbf16>
    %cst_96 = arith.constant dense<0.000000e+00> : vector<64x256xf32>
    %112 = tpu.matmul %109, %111, %cst_96 {dimension_numbers = #tpu.dot_dimension_numbers<[1], [0], [0], [1], [0, 0, 1, 1], [], []>} : vector<64x128xbf16>, vector<128x256xbf16>, vector<64x256xf32> -> vector<64x256xf32>
    %113 = arith.addf %106, %112 : vector<64x256xf32>
    %c0_97 = arith.constant 0 : index
    %c3_98 = arith.constant 3 : index
    %c0_99 = arith.constant 0 : index
    %114 = tpu.strided_load %arg7[%c0_97, %c3_98, %c0_99] {strides = array<i32: 1, 2, 1>} : memref<8x24x128xf32, #tpu.memory_space<vmem>>, vector<8x8x128xf32>
    %115 = vector.shape_cast %114 : vector<8x8x128xf32> to vector<64x128xf32>
    %116 = arith.truncf %115 : vector<64x128xf32> to vector<64x128xbf16>
    %c2_100 = arith.constant 2 : index
    %c0_101 = arith.constant 0 : index
    %c0_102 = arith.constant 0 : index
    %117 = vector.load %arg4[%c2_100, %c0_101, %c0_102] : memref<5x128x256xbf16, #tpu.memory_space<vmem>>, vector<1x128x256xbf16>
    %118 = vector.shape_cast %117 : vector<1x128x256xbf16> to vector<128x256xbf16>
    %cst_103 = arith.constant dense<0.000000e+00> : vector<64x256xf32>
    %119 = tpu.matmul %116, %118, %cst_103 {dimension_numbers = #tpu.dot_dimension_numbers<[1], [0], [0], [1], [0, 0, 1, 1], [], []>} : vector<64x128xbf16>, vector<128x256xbf16>, vector<64x256xf32> -> vector<64x256xf32>
    %120 = arith.addf %113, %119 : vector<64x256xf32>
    %c0_104 = arith.constant 0 : index
    %c4_105 = arith.constant 4 : index
    %c0_106 = arith.constant 0 : index
    %121 = tpu.strided_load %arg7[%c0_104, %c4_105, %c0_106] {strides = array<i32: 1, 2, 1>} : memref<8x24x128xf32, #tpu.memory_space<vmem>>, vector<8x8x128xf32>
    %122 = vector.shape_cast %121 : vector<8x8x128xf32> to vector<64x128xf32>
    %123 = arith.truncf %122 : vector<64x128xf32> to vector<64x128xbf16>
    %c3_107 = arith.constant 3 : index
    %c0_108 = arith.constant 0 : index
    %c0_109 = arith.constant 0 : index
    %124 = vector.load %arg4[%c3_107, %c0_108, %c0_109] : memref<5x128x256xbf16, #tpu.memory_space<vmem>>, vector<1x128x256xbf16>
    %125 = vector.shape_cast %124 : vector<1x128x256xbf16> to vector<128x256xbf16>
    %cst_110 = arith.constant dense<0.000000e+00> : vector<64x256xf32>
    %126 = tpu.matmul %123, %125, %cst_110 {dimension_numbers = #tpu.dot_dimension_numbers<[1], [0], [0], [1], [0, 0, 1, 1], [], []>} : vector<64x128xbf16>, vector<128x256xbf16>, vector<64x256xf32> -> vector<64x256xf32>
    %127 = arith.addf %120, %126 : vector<64x256xf32>
    %c0_111 = arith.constant 0 : index
    %c5 = arith.constant 5 : index
    %c0_112 = arith.constant 0 : index
    %128 = tpu.strided_load %arg7[%c0_111, %c5, %c0_112] {strides = array<i32: 1, 2, 1>} : memref<8x24x128xf32, #tpu.memory_space<vmem>>, vector<8x8x128xf32>
    %129 = vector.shape_cast %128 : vector<8x8x128xf32> to vector<64x128xf32>
    %130 = arith.truncf %129 : vector<64x128xf32> to vector<64x128xbf16>
    %c4_113 = arith.constant 4 : index
    %c0_114 = arith.constant 0 : index
    %c0_115 = arith.constant 0 : index
    %131 = vector.load %arg4[%c4_113, %c0_114, %c0_115] : memref<5x128x256xbf16, #tpu.memory_space<vmem>>, vector<1x128x256xbf16>
    %132 = vector.shape_cast %131 : vector<1x128x256xbf16> to vector<128x256xbf16>
    %cst_116 = arith.constant dense<0.000000e+00> : vector<64x256xf32>
    %133 = tpu.matmul %130, %132, %cst_116 {dimension_numbers = #tpu.dot_dimension_numbers<[1], [0], [0], [1], [0, 0, 1, 1], [], []>} : vector<64x128xbf16>, vector<128x256xbf16>, vector<64x256xf32> -> vector<64x256xf32>
    %134 = arith.addf %127, %133 : vector<64x256xf32>
    %135 = arith.maximumf %100, %134 : vector<64x256xf32>
    %136 = vector.extract_strided_slice %135 {offsets = [0, 0], sizes = [64, 128], strides = [1, 1]} : vector<64x256xf32> to vector<64x128xf32>
    %137 = vector.extract_strided_slice %135 {offsets = [0, 128], sizes = [64, 128], strides = [1, 1]} : vector<64x256xf32> to vector<64x128xf32>
    %138 = arith.maximumf %136, %137 : vector<64x128xf32>
    %c0_117 = arith.constant 0 : index
    %c0_118 = arith.constant 0 : index
    %139 = vector.load %arg5[%c0_117, %c0_118] : memref<1x128xf32, #tpu.memory_space<vmem>>, vector<1x128xf32>
    %140 = vector.broadcast %139 : vector<1x128xf32> to vector<64x128xf32>
    %141 = arith.addf %138, %140 : vector<64x128xf32>
    %cst_119 = arith.constant 0.000000e+00 : f32
    %142 = vector.broadcast %cst_119 : f32 to vector<64x128xf32>
    %143 = arith.maximumf %141, %142 : vector<64x128xf32>
    %144 = arith.truncf %143 : vector<64x128xf32> to vector<64x128xbf16>
    %c0_120 = arith.constant 0 : index
    %c0_121 = arith.constant 0 : index
    %145 = vector.load %arg6[%c0_120, %c0_121] : memref<64x128xbf16, #tpu.memory_space<vmem>>, vector<64x128xbf16>
    tpu.vector_store %arg6[%c0_120, %c0_121], %144 {strides = array<i32>} : memref<64x128xbf16, #tpu.memory_space<vmem>>, vector<64x128xbf16>,
    return
  }
  func.func @transform_0(%arg0: i32) -> (i32, i32, i32) {
    %c0_i32 = arith.constant 0 : i32
    %c0_i32_0 = arith.constant 0 : i32
    %c0_i32_1 = arith.constant 0 : i32
    return %arg0, %c0_i32, %c0_i32_0 : i32, i32, i32
  }
  func.func @transform_1(%arg0: i32) -> (i32, i32, i32) {
    %c0_i32 = arith.constant 0 : i32
    %c0_i32_0 = arith.constant 0 : i32
    %c0_i32_1 = arith.constant 0 : i32
    %c0_i32_2 = arith.constant 0 : i32
    return %c0_i32, %c0_i32_0, %c0_i32_1 : i32, i32, i32
  }
  func.func @transform_2(%arg0: i32) -> (i32, i32) {
    %c0_i32 = arith.constant 0 : i32
    %c0_i32_0 = arith.constant 0 : i32
    %c0_i32_1 = arith.constant 0 : i32
    return %c0_i32, %c0_i32_0 : i32, i32
  }
  func.func @transform_3(%arg0: i32) -> (i32, i32, i32) {
    %c0_i32 = arith.constant 0 : i32
    %c0_i32_0 = arith.constant 0 : i32
    %c0_i32_1 = arith.constant 0 : i32
    %c0_i32_2 = arith.constant 0 : i32
    return %c0_i32, %c0_i32_0, %c0_i32_1 : i32, i32, i32
  }
  func.func @transform_4(%arg0: i32) -> (i32, i32) {
    %c0_i32 = arith.constant 0 : i32
    %c0_i32_0 = arith.constant 0 : i32
    %c0_i32_1 = arith.constant 0 : i32
    return %c0_i32, %c0_i32_0 : i32, i32
  }
  func.func @transform_5(%arg0: i32) -> (i32, i32) {
    %c0_i32 = arith.constant 0 : i32
    %c0_i32_0 = arith.constant 0 : i32
    return %arg0, %c0_i32 : i32, i32
  }
}

</mosaic_0001>

<bundles_post_ra>
// kernel: cnn_forward.3
= control target key start
LH: loop header
LB: loop body
LE: loop exit
PB: predicated region body
PF: predicated region fallthrough
CT: control target
= control target key end

     0   :  { %vm1752_vm0 = vmmov 0   ;;  %s2291_s1 = inlined_call_operand.vmem [shape: bf16[1024,256], index: 1, kind: input, shape index: {}]   ;;  %s2292_s0 = inlined_call_operand.vmem [shape: bf16[8,1024], index: 0, kind: input, shape index: {}]   ;;  %s2293_s3 = inlined_call_operand.vmem [shape: bf16[256,128], index: 3, kind: input, shape index: {}]   ;;  %s2294_s5 = inlined_call_operand.vmem [shape: bf16[128,128], index: 5, kind: input, shape index: {}]   ;;  %s2295_s2 = inlined_call_operand.vmem [shape: f32[1,256], index: 2, kind: input, shape index: {}]   ;;  %s2296_s4 = inlined_call_operand.vmem [shape: f32[1,128], index: 4, kind: input, shape index: {}]   ;;  %s2297_s6 = inlined_call_operand.vmem [shape: f32[1,128], index: 6, kind: input, shape index: {}]   ;;  %s2298_s7 = inlined_call_operand.vmem [shape: f32[8,128], index: 7, kind: output, shape index: {}]  }
   0x1   :  { %v1527_v0 = vld [vmem:[%s2291_s1 + $0x104] ss:$8 sps:$4 sm:$0xff]   ;;  %v1529_v1 = vld [vmem:[%s2291_s1 + $0x100] ss:$8 sps:$4 sm:$0xff]   ;;  %v1530_v2 = vld [vmem:[%s2291_s1 + $0x114] ss:$8 sps:$4 sm:$0xff]  }
   0x2   :  { %880 = vmatprep.subr.bf16.mxu0 %v1527_v0  ;;  %v1532_v3 = vld [vmem:[%s2291_s1 + $0x110] ss:$8 sps:$4 sm:$0xff]   ;;  %v1533_v4 = vld [vmem:[%s2291_s1 + $0x124] ss:$8 sps:$4 sm:$0xff]   ;;  %v1535_v5 = vld [vmem:[%s2291_s1 + $0x120] ss:$8 sps:$4 sm:$0xff]  }
   0x3   :  { %881 = vmatpush1.bf16.msra.mxu0 %v1529_v1  ;;  %v1536_v6 = vld [vmem:[%s2291_s1 + $0x134] ss:$8 sps:$4 sm:$0xff]   ;;  %v1538_v7 = vld [vmem:[%s2291_s1 + $0x130] ss:$8 sps:$4 sm:$0xff]   ;;  %v1539_v8 = vld [vmem:[%s2291_s1 + $0x144] ss:$8 sps:$4 sm:$0xff]  }
   0x4   :  { %882 = vmatprep.subr.bf16.mxu0 %v1530_v2  ;;  %v1541_v9 = vld [vmem:[%s2291_s1 + $0x140] ss:$8 sps:$4 sm:$0xff]   ;;  %v1542_v10 = vld [vmem:[%s2291_s1 + $0x154] ss:$8 sps:$4 sm:$0xff]   ;;  %v1544_v11 = vld [vmem:[%s2291_s1 + $0x150] ss:$8 sps:$4 sm:$0xff]  }
   0x5   :  { %v1545_v12 = vld [vmem:[%s2291_s1 + $0x164] ss:$8 sps:$4 sm:$0xff]   ;;  %v1547_v15 = vld [vmem:[%s2291_s1 + $0x160] ss:$8 sps:$4 sm:$0xff]   ;;  %v1548_v16 = vld [vmem:[%s2291_s1 + $0x174] ss:$8 sps:$4 sm:$0xff]  }
   0x6   :  { %v1835_v13 = vld [vmem:[%s2292_s0 + $0x8] sm:$0xff]  ;;  %v1550_v17 = vld [vmem:[%s2291_s1 + $0x170] ss:$8 sps:$4 sm:$0xff]   ;;  %v1554_v20 = vld [vmem:[%s2291_s1 + $0x194] ss:$8 sps:$4 sm:$0xff]  }
   0x7   :  { %883 = vmatpush1.bf16.msra.mxu0 %v1532_v3  ;;  %v1303_v14 = vcombine.high %v1835_v13, %v1835_v13  ;;  %v1551_v18 = vld [vmem:[%s2291_s1 + $0x184] ss:$8 sps:$4 sm:$0xff]   ;;  %v1553_v19 = vld [vmem:[%s2291_s1 + $0x180] ss:$8 sps:$4 sm:$0xff]   ;;  %v1556_v21 = vld [vmem:[%s2291_s1 + $0x190] ss:$8 sps:$4 sm:$0xff]   ;;  %v1302_v48 = vcombine.low %v1835_v13, %v1835_v13 }
   0x8   :  { %884 = vmatprep.subr.bf16.mxu0 %v1533_v4  ;;  %v1557_v22 = vld [vmem:[%s2291_s1 + $0x1a4] ss:$8 sps:$4 sm:$0xff]   ;;  %v1559_v23 = vld [vmem:[%s2291_s1 + $0x1a0] ss:$8 sps:$4 sm:$0xff]   ;;  %v1560_v24 = vld [vmem:[%s2291_s1 + $0x1b4] ss:$8 sps:$4 sm:$0xff]  }
   0x9   :  { %912 = vmatprep.mubr.bf16.mxu0 %v1303_v14  ;;  %v1622_v25 = vld [vmem:[%s2291_s1 + $0x4] ss:$8 sps:$4 sm:$0xff]   ;;  %v1624_v26 = vld [vmem:[%s2291_s1] ss:$8 sps:$4 sm:$0xff]   ;;  %v1562_v27 = vld [vmem:[%s2291_s1 + $0x1b0] ss:$8 sps:$4 sm:$0xff]  }
   0xa   :  { %v1563_v28 = vld [vmem:[%s2291_s1 + $0x1c4] ss:$8 sps:$4 sm:$0xff]   ;;  %839 = vmatprep.subr.bf16.mxu1 %v1622_v25  ;;  %v1628_v29 = vld [vmem:[%s2291_s1 + $0x14] ss:$8 sps:$4 sm:$0xff]   ;;  %v1630_v30 = vld [vmem:[%s2291_s1 + $0x10] ss:$8 sps:$4 sm:$0xff]  }
   0xb   :  { %885 = vmatpush1.bf16.msra.mxu0 %v1535_v5  ;;  %840 = vmatpush1.bf16.msra.mxu1 %v1624_v26  ;;  %v1565_v31 = vld [vmem:[%s2291_s1 + $0x1c0] ss:$8 sps:$4 sm:$0xff]   ;;  %v1566_v32 = vld [vmem:[%s2291_s1 + $0x1d4] ss:$8 sps:$4 sm:$0xff]   ;;  %v1636_v33 = vld [vmem:[%s2291_s1 + $0x24] ss:$8 sps:$4 sm:$0xff]  }
   0xc   :  { %886 = vmatprep.subr.bf16.mxu0 %v1536_v6  ;;  %841 = vmatprep.subr.bf16.mxu1 %v1628_v29  ;;  %v1638_v34 = vld [vmem:[%s2291_s1 + $0x20] ss:$8 sps:$4 sm:$0xff]   ;;  %v1642_v35 = vld [vmem:[%s2291_s1 + $0x34] ss:$8 sps:$4 sm:$0xff]   ;;  %v1568_v36 = vld [vmem:[%s2291_s1 + $0x1d0] ss:$8 sps:$4 sm:$0xff]  }
   0xd   :  { %v1569_v37 = vld [vmem:[%s2291_s1 + $0x1e4] ss:$8 sps:$4 sm:$0xff]   ;;  %v1644_v38 = vld [vmem:[%s2291_s1 + $0x30] ss:$8 sps:$4 sm:$0xff]   ;;  %v1571_v40 = vld [vmem:[%s2291_s1 + $0x1e0] ss:$8 sps:$4 sm:$0xff]  }
   0xe   :  { %v1648_v39 = vld [vmem:[%s2291_s1 + $0x44] ss:$8 sps:$4 sm:$0xff]   ;;  %v1572_v41 = vld [vmem:[%s2291_s1 + $0x1f4] ss:$8 sps:$4 sm:$0xff]   ;;  %v1650_v42 = vld [vmem:[%s2291_s1 + $0x40] ss:$8 sps:$4 sm:$0xff]  }
   0xf   :  { %887 = vmatpush1.bf16.msra.mxu0 %v1538_v7  ;;  %842 = vmatpush1.bf16.msra.mxu1 %v1630_v30  ;;  %v1654_v43 = vld [vmem:[%s2291_s1 + $0x54] ss:$8 sps:$4 sm:$0xff]   ;;  %v1574_v44 = vld [vmem:[%s2291_s1 + $0x1f0] ss:$8 sps:$4 sm:$0xff]   ;;  %v1579_v45 = vld [vmem:[%s2291_s1 + $0x204] ss:$8 sps:$4 sm:$0xff]  }
  0x10   :  { %888 = vmatprep.subr.bf16.mxu0 %v1539_v8  ;;  %843 = vmatprep.subr.bf16.mxu1 %v1636_v33  ;;  %v1935_v46 = vld [vmem:[%s2292_s0 + $0x10] sm:$0xff]  ;;  %v1660_v49 = vld [vmem:[%s2291_s1 + $0x64] ss:$8 sps:$4 sm:$0xff]   ;;  %v1577_v50 = vld [vmem:[%s2291_s1 + $0x200] ss:$8 sps:$4 sm:$0xff]  }
  0x11   :  { %v1656_v47 = vld [vmem:[%s2291_s1 + $0x50] ss:$8 sps:$4 sm:$0xff]   ;;  %v1305_v51 = vcombine.high %v1935_v46, %v1935_v46  ;;  %v1582_v52 = vld [vmem:[%s2291_s1 + $0x214] ss:$8 sps:$4 sm:$0xff]   ;;  %v1662_v53 = vld [vmem:[%s2291_s1 + $0x60] ss:$8 sps:$4 sm:$0xff]  }
  0x12   :  { %v1666_v54 = vld [vmem:[%s2291_s1 + $0x74] ss:$8 sps:$4 sm:$0xff]   ;;  %v1580_v55 = vld [vmem:[%s2291_s1 + $0x210] ss:$8 sps:$4 sm:$0xff]   ;;  %v1585_v56 = vld [vmem:[%s2291_s1 + $0x224] ss:$8 sps:$4 sm:$0xff]  }
  0x13   :  { %889 = vmatpush1.bf16.msra.mxu0 %v1541_v9  ;;  %844 = vmatpush1.bf16.msra.mxu1 %v1638_v34  ;;  %v1668_v57 = vld [vmem:[%s2291_s1 + $0x70] ss:$8 sps:$4 sm:$0xff]   ;;  %v1672_v58 = vld [vmem:[%s2291_s1 + $0x84] ss:$8 sps:$4 sm:$0xff]   ;;  %v1583_v59 = vld [vmem:[%s2291_s1 + $0x220] ss:$8 sps:$4 sm:$0xff]  }
  0x14   :  { %890 = vmatprep.subr.bf16.mxu0 %v1542_v10  ;;  %845 = vmatprep.subr.bf16.mxu1 %v1642_v35  ;;  %v1588_v60 = vld [vmem:[%s2291_s1 + $0x234] ss:$8 sps:$4 sm:$0xff]   ;;  %v1674_v61 = vld [vmem:[%s2291_s1 + $0x80] ss:$8 sps:$4 sm:$0xff]   ;;  %v1586_v63 = vld [vmem:[%s2291_s1 + $0x230] ss:$8 sps:$4 sm:$0xff]  }
  0x15   :  { %v1678_v62 = vld [vmem:[%s2291_s1 + $0x94] ss:$8 sps:$4 sm:$0xff]   ;;  %v1591_v0 = vld [vmem:[%s2291_s1 + $0x244] ss:$8 sps:$4 sm:$0xff]   ;;  %v1680_v1 = vld [vmem:[%s2291_s1 + $0x90] ss:$8 sps:$4 sm:$0xff]  }
  0x16   :  { %v1684_v2 = vld [vmem:[%s2291_s1 + $0xa4] ss:$8 sps:$4 sm:$0xff]   ;;  %v1589_v3 = vld [vmem:[%s2291_s1 + $0x240] ss:$8 sps:$4 sm:$0xff]   ;;  %v1594_v4 = vld [vmem:[%s2291_s1 + $0x254] ss:$8 sps:$4 sm:$0xff]  }
  0x17   :  { %891 = vmatpush1.bf16.msra.mxu0 %v1544_v11  ;;  %846 = vmatpush1.bf16.msra.mxu1 %v1644_v38  ;;  %v1686_v5 = vld [vmem:[%s2291_s1 + $0xa0] ss:$8 sps:$4 sm:$0xff]   ;;  %v1690_v6 = vld [vmem:[%s2291_s1 + $0xb4] ss:$8 sps:$4 sm:$0xff]   ;;  %v1592_v7 = vld [vmem:[%s2291_s1 + $0x250] ss:$8 sps:$4 sm:$0xff]  }
  0x18   :  { %892 = vmatprep.subr.bf16.mxu0 %v1545_v12  ;;  %847 = vmatprep.subr.bf16.mxu1 %v1648_v39  ;;  %v1597_v8 = vld [vmem:[%s2291_s1 + $0x264] ss:$8 sps:$4 sm:$0xff]   ;;  %v1692_v10 = vld [vmem:[%s2291_s1 + $0xb0] ss:$8 sps:$4 sm:$0xff]   ;;  %v1595_v13 = vld [vmem:[%s2291_s1 + $0x260] ss:$8 sps:$4 sm:$0xff]  }
  0x19   :  { %v27_v9 = vld [vmem:[%s2292_s0] sm:$0xff]  ;;  %v1600_v14 = vld [vmem:[%s2291_s1 + $0x274] ss:$8 sps:$4 sm:$0xff]   ;;  %v1604_v25 = vld [vmem:[%s2291_s1 + $0x290] ss:$8 sps:$4 sm:$0xff]  }
  0x1a   :  { %v1301_v11 = vcombine.high %v27_v9, %v27_v9  ;;  %v1696_v12 = vld [vmem:[%s2291_s1 + $0xc4] ss:$8 sps:$4 sm:$0xff]   ;;  %v1607_v29 = vld [vmem:[%s2291_s1 + $0x2a0] ss:$8 sps:$4 sm:$0xff]   ;;  %v1612_v30 = vld [vmem:[%s2291_s1 + $0x2b4] ss:$8 sps:$4 sm:$0xff]  }
  0x1b   :  { %893 = vmatpush1.bf16.msra.mxu0 %v1547_v15  ;;  %848 = vmatpush1.bf16.msra.mxu1 %v1650_v42  ;;  %v1698_v15 = vld [vmem:[%s2291_s1 + $0xc0] ss:$8 sps:$4 sm:$0xff]   ;;  %v1609_v26 = vld [vmem:[%s2291_s1 + $0x2a4] ss:$8 sps:$4 sm:$0xff]   ;;  %v1610_v34 = vld [vmem:[%s2291_s1 + $0x2b0] ss:$8 sps:$4 sm:$0xff]  }
  0x1c   :  { %894 = vmatprep.subr.bf16.mxu0 %v1548_v16  ;;  %849 = vmatprep.subr.bf16.mxu1 %v1654_v43  ;;  %v1702_v16 = vld [vmem:[%s2291_s1 + $0xd4] ss:$8 sps:$4 sm:$0xff]   ;;  %v1729_v33 = vld [vmem:[%s2293_s3 + $0x48] sm:$0xff]   ;;  %v1616_v42 = vld [vmem:[%s2291_s1 + $0x2d0] ss:$8 sps:$4 sm:$0xff]  }
  0x1d   :  { %871 = vmatprep.mubr.bf16.mxu1 %v1301_v11  ;;  %v1615_v35 = vld [vmem:[%s2291_s1 + $0x2c4] ss:$8 sps:$4 sm:$0xff]   ;;  %v1613_v38 = vld [vmem:[%s2291_s1 + $0x2c0] ss:$8 sps:$4 sm:$0xff]   ;;  %v1618_v39 = vld [vmem:[%s2291_s1 + $0x2d4] ss:$8 sps:$4 sm:$0xff]  }
  0x1e   :  { %v1621_v43 = vld [vmem:[%s2291_s1 + $0x2e4] ss:$8 sps:$4 sm:$0xff]   ;;  %v1701_v11 = vld [vmem:[%s2291_s1 + $0x3b4] ss:$8 sps:$4 sm:$0xff]  }
  0x1f   :  { %895 = vmatpush1.bf16.msra.mxu0 %v1550_v17  ;;  %850 = vmatpush1.bf16.msra.mxu1 %v1656_v47  ;;  %v1598_v17 = vld [vmem:[%s2291_s1 + $0x270] ss:$8 sps:$4 sm:$0xff]   ;;  %v1619_v47 = vld [vmem:[%s2291_s1 + $0x2e0] ss:$8 sps:$4 sm:$0xff]  }
  0x20   :  { %896 = vmatprep.subr.bf16.mxu0 %v1551_v18  ;;  %851 = vmatprep.subr.bf16.mxu1 %v1660_v49  ;;  %v1603_v18 = vld [vmem:[%s2291_s1 + $0x284] ss:$8 sps:$4 sm:$0xff]  }
  0x21   :  { %v1736_v49 = vld [vmem:[%s2293_s3 + $0x20] sm:$0xff]  }
  0x23   :  { %897 = vmatpush1.bf16.msra.mxu0 %v1553_v19  ;;  %852 = vmatpush1.bf16.msra.mxu1 %v1662_v53  ;;  %v1601_v19 = vld [vmem:[%s2291_s1 + $0x280] ss:$8 sps:$4 sm:$0xff]   ;;  %v1304_v53 = vcombine.low %v1935_v46, %v1935_v46  ;;  %v1647_v46 = vld [vmem:[%s2291_s1 + $0x324] ss:$8 sps:$4 sm:$0xff]  }
  0x24   :  { %898 = vmatprep.subr.bf16.mxu0 %v1554_v20  ;;  %853 = vmatprep.subr.bf16.mxu1 %v1666_v54  ;;  %v1704_v20 = vld [vmem:[%s2291_s1 + $0xd0] ss:$8 sps:$4 sm:$0xff]   ;;  %v1633_v54 = vld [vmem:[%s2291_s1 + $0x300] ss:$8 sps:$4 sm:$0xff]  }
  0x27   :  { %899 = vmatpush1.bf16.msra.mxu0 %v1556_v21  ;;  %854 = vmatpush1.bf16.msra.mxu1 %v1668_v57  ;;  %v1708_v21 = vld [vmem:[%s2291_s1 + $0xe4] ss:$8 sps:$4 sm:$0xff]   ;;  %v1639_v57 = vld [vmem:[%s2291_s1 + $0x310] ss:$8 sps:$4 sm:$0xff]  }
  0x28   :  { %900 = vmatprep.subr.bf16.mxu0 %v1557_v22  ;;  %855 = vmatprep.subr.bf16.mxu1 %v1672_v58  ;;  %v1606_v22 = vld [vmem:[%s2291_s1 + $0x294] ss:$8 sps:$4 sm:$0xff]   ;;  %v1645_v58 = vld [vmem:[%s2291_s1 + $0x320] ss:$8 sps:$4 sm:$0xff]  }
  0x2b   :  { %901 = vmatpush1.bf16.msra.mxu0 %v1559_v23  ;;  %856 = vmatpush1.bf16.msra.mxu1 %v1674_v61  ;;  %v1710_v23 = vld [vmem:[%s2291_s1 + $0xe0] ss:$8 sps:$4 sm:$0xff]   ;;  %v1659_v61 = vld [vmem:[%s2291_s1 + $0x344] ss:$8 sps:$4 sm:$0xff]  }
  0x2c   :  { %902 = vmatprep.subr.bf16.mxu0 %v1560_v24  ;;  %857 = vmatprep.subr.bf16.mxu1 %v1678_v62  ;;  %v1714_v24 = vld [vmem:[%s2291_s1 + $0xf4] ss:$8 sps:$4 sm:$0xff]   ;;  %v1657_v62 = vld [vmem:[%s2291_s1 + $0x340] ss:$8 sps:$4 sm:$0xff]  }
  0x2f   :  { %903 = vmatpush1.bf16.msra.mxu0 %v1562_v27  ;;  %858 = vmatpush1.bf16.msra.mxu1 %v1680_v1  ;;  %v1716_v27 = vld [vmem:[%s2291_s1 + $0xf0] ss:$8 sps:$4 sm:$0xff]   ;;  %v1671_v1 = vld [vmem:[%s2291_s1 + $0x364] ss:$8 sps:$4 sm:$0xff]  }
  0x30   :  { %904 = vmatprep.subr.bf16.mxu0 %v1563_v28  ;;  %859 = vmatprep.subr.bf16.mxu1 %v1684_v2  ;;  %v1727_v28 = vld [vmem:[%s2293_s3 + $0x40] sm:$0xff]  }
  0x31   :  { %v1669_v2 = vld [vmem:[%s2291_s1 + $0x360] ss:$8 sps:$4 sm:$0xff]  }
  0x33   :  { %905 = vmatpush1.bf16.msra.mxu0 %v1565_v31  ;;  %860 = vmatpush1.bf16.msra.mxu1 %v1686_v5  ;;  %v1300_v31 = vcombine.low %v27_v9, %v27_v9  ;;  %v1683_v5 = vld [vmem:[%s2291_s1 + $0x384] ss:$8 sps:$4 sm:$0xff]  }
  0x34   :  { %906 = vmatprep.subr.bf16.mxu0 %v1566_v32  ;;  %861 = vmatprep.subr.bf16.mxu1 %v1690_v6  ;;  %v1728_v32 = vld [vmem:[%s2293_s3] sm:$0xff]  }
  0x35   :  { %v1681_v6 = vld [vmem:[%s2291_s1 + $0x380] ss:$8 sps:$4 sm:$0xff]   ;;  %v1695_v9 = vld [vmem:[%s2291_s1 + $0x3a4] ss:$8 sps:$4 sm:$0xff]  }
  0x37   :  { %907 = vmatpush1.bf16.msra.mxu0 %v1568_v36  ;;  %862 = vmatpush1.bf16.msra.mxu1 %v1692_v10  ;;  %v1730_v36 = vld [vmem:[%s2293_s3 + $0x8] sm:$0xff]  }
  0x38   :  { %908 = vmatprep.subr.bf16.mxu0 %v1569_v37  ;;  %863 = vmatprep.subr.bf16.mxu1 %v1696_v12  ;;  %v1731_v37 = vld [vmem:[%s2293_s3 + $0x50] sm:$0xff]   ;;  %v1693_v10 = vld [vmem:[%s2291_s1 + $0x3a0] ss:$8 sps:$4 sm:$0xff]  }
  0x39   :  { %v1699_v12 = vld [vmem:[%s2291_s1 + $0x3b0] ss:$8 sps:$4 sm:$0xff]  }
  0x3b   :  { %909 = vmatpush1.bf16.msra.mxu0 %v1571_v40  ;;  %864 = vmatpush1.bf16.msra.mxu1 %v1698_v15  ;;  %v1732_v40 = vld [vmem:[%s2293_s3 + $0x10] sm:$0xff]  }
  0x3c   :  { %910 = vmatprep.subr.bf16.mxu0 %v1572_v41  ;;  %865 = vmatprep.subr.bf16.mxu1 %v1702_v16  ;;  %v1733_v41 = vld [vmem:[%s2293_s3 + $0x58] sm:$0xff]  }
  0x3d   :  { %v1713_v15 = vld [vmem:[%s2291_s1 + $0x3d4] ss:$8 sps:$4 sm:$0xff]   ;;  %v1711_v16 = vld [vmem:[%s2291_s1 + $0x3d0] ss:$8 sps:$4 sm:$0xff]  }
  0x3f   :  { %911 = vmatpush1.bf16.msra.mxu0 %v1574_v44  ;;  %866 = vmatpush1.bf16.msra.mxu1 %v1704_v20  ;;  %v1734_v44 = vld [vmem:[%s2293_s3 + $0x18] sm:$0xff]  }
  0x40   :  { %921 = vmatprep.subr.bf16.mxu0 %v1579_v45  ;;  %867 = vmatprep.subr.bf16.mxu1 %v1708_v21  ;;  %v1735_v45 = vld [vmem:[%s2293_s3 + $0x60] sm:$0xff]   ;;  %v1722_v20 = vld [vmem:[%s2291_s1 + $0x3f0] ss:$8 sps:$4 sm:$0xff]  }
  0x42   :  { %913 = vmatmul.mubr.bf16.vlgmr.msra.gmra.mrb[0].mxu0 %v1302_v48  ;;  %v1627_v48 = vld [vmem:[%s2291_s1 + $0x2f4] ss:$8 sps:$4 sm:$0xff]  }
  0x43   :  { %922 = vmatpush1.bf16.msra.mxu0 %v1577_v50  ;;  %953 = vmatprep.mubr.bf16.mxu0 %v1305_v51  ;;  %v1625_v50 = vld [vmem:[%s2291_s1 + $0x2f0] ss:$8 sps:$4 sm:$0xff]   ;;  %v1635_v51 = vld [vmem:[%s2291_s1 + $0x304] ss:$8 sps:$4 sm:$0xff]  }
  0x44   :  { %923 = vmatprep.subr.bf16.mxu0 %v1582_v52  ;;  %868 = vmatpush1.bf16.msra.mxu1 %v1710_v23  ;;  %v2136_v52 = vld [vmem:[%s2292_s0 + $0x18] sm:$0xff]  ;;  %v1738_v23 = vld [vmem:[%s2293_s3 + $0x28] sm:$0xff]  }
  0x45   :  { %869 = vmatprep.subr.bf16.mxu1 %v1714_v24  ;;  %v1306_v21 = vcombine.low %v2136_v52, %v2136_v52  ;;  %v1739_v24 = vld [vmem:[%s2293_s3 + $0x70] sm:$0xff]  }
  0x47   :  { %924 = vmatpush1.bf16.msra.mxu0 %v1580_v55  ;;  %v1307_v55 = vcombine.high %v2136_v52, %v2136_v52  ;;  %v1743_v52 = vld [vmem:[%s2294_s5] sm:$0xff]  }
  0x48   :  { %925 = vmatprep.subr.bf16.mxu0 %v1585_v56  ;;  %870 = vmatpush1.bf16.msra.mxu1 %v1716_v27  ;;  %v1641_v56 = vld [vmem:[%s2291_s1 + $0x314] ss:$8 sps:$4 sm:$0xff]  }
  0x49   :  { %1462 = vmatprep.subr.bf16.mxu1 %v1727_v28  ;;  %v1742_v27 = vld [vmem:[%s2293_s3 + $0x38] sm:$0xff]   ;;  %v1751_v28 = vmov 0.0  }
  0x4b   :  { %926 = vmatpush1.bf16.msra.mxu0 %v1583_v59  ;;  %872 = vmatmul.mubr.bf16.vlgmr.msra.gmra.mrb[0].mxu1 %v1300_v31  ;;  %v1653_v59 = vld [vmem:[%s2291_s1 + $0x334] ss:$8 sps:$4 sm:$0xff]  }
  0x4c   :  { %927 = vmatprep.subr.bf16.mxu0 %v1588_v60  ;;  %1463 = vmatpush3.bf16.msra.mxu1 %v1728_v32  ;;  %v1651_v60 = vld [vmem:[%s2291_s1 + $0x330] ss:$8 sps:$4 sm:$0xff]  }
  0x4d   :  { %1464 = vmatprep.subr.bf16.mxu1 %v1729_v33  ;;  %v161_v33 = vlaneseq }
  0x4f   :  { %928 = vmatpush1.bf16.msra.mxu0 %v1586_v63  ;;  %v1665_v63 = vld [vmem:[%s2291_s1 + $0x354] ss:$8 sps:$4 sm:$0xff]  }
  0x50   :  { %929 = vmatprep.subr.bf16.mxu0 %v1591_v0  ;;  %1465 = vmatpush3.bf16.msra.mxu1 %v1730_v36  ;;  %v1663_v0 = vld [vmem:[%s2291_s1 + $0x350] ss:$8 sps:$4 sm:$0xff]   ;;  %v159_v36 = vld [vmem:[%s2295_s2] sm:$0x3] }
  0x51   :  { %1466 = vmatprep.subr.bf16.mxu1 %v1731_v37 }
  0x53   :  { %930 = vmatpush1.bf16.msra.mxu0 %v1589_v3  ;;  %v1677_v3 = vld [vmem:[%s2291_s1 + $0x374] ss:$8 sps:$4 sm:$0xff]  }
  0x54   :  { %931 = vmatprep.subr.bf16.mxu0 %v1594_v4  ;;  %1467 = vmatpush3.bf16.msra.mxu1 %v1732_v40  ;;  %v1675_v4 = vld [vmem:[%s2291_s1 + $0x370] ss:$8 sps:$4 sm:$0xff]  }
  0x55   :  { %1468 = vmatprep.subr.bf16.mxu1 %v1733_v41 }
  0x57   :  { %932 = vmatpush1.bf16.msra.mxu0 %v1592_v7  ;;  %v1689_v7 = vld [vmem:[%s2291_s1 + $0x394] ss:$8 sps:$4 sm:$0xff]  }
  0x58   :  { %933 = vmatprep.subr.bf16.mxu0 %v1597_v8  ;;  %1469 = vmatpush3.bf16.msra.mxu1 %v1734_v44  ;;  %v1687_v8 = vld [vmem:[%s2291_s1 + $0x390] ss:$8 sps:$4 sm:$0xff]  }
  0x59   :  { %1470 = vmatprep.subr.bf16.mxu1 %v1735_v45 }
  0x5b   :  { %934 = vmatpush1.bf16.msra.mxu0 %v1595_v13  ;;  %v1707_v13 = vld [vmem:[%s2291_s1 + $0x3c4] ss:$8 sps:$4 sm:$0xff]  }
  0x5c   :  { %935 = vmatprep.subr.bf16.mxu0 %v1600_v14  ;;  %1471 = vmatpush3.bf16.msra.mxu1 %v1736_v49  ;;  %v1705_v14 = vld [vmem:[%s2291_s1 + $0x3c0] ss:$8 sps:$4 sm:$0xff]  }
  0x5f   :  { %936 = vmatpush1.bf16.msra.mxu0 %v1598_v17  ;;  %v1719_v17 = vld [vmem:[%s2291_s1 + $0x3e4] ss:$8 sps:$4 sm:$0xff]  }
  0x60   :  { %937 = vmatprep.subr.bf16.mxu0 %v1603_v18  ;;  %v1717_v18 = vld [vmem:[%s2291_s1 + $0x3e0] ss:$8 sps:$4 sm:$0xff]  }
  0x63   :  { %938 = vmatpush1.bf16.msra.mxu0 %v1601_v19  ;;  %v1724_v19 = vld [vmem:[%s2291_s1 + $0x3f4] ss:$8 sps:$4 sm:$0xff]  }
  0x64   :  { %939 = vmatprep.subr.bf16.mxu0 %v1606_v22  ;;  %v1737_v22 = vld [vmem:[%s2293_s3 + $0x68] sm:$0xff]  }
  0x65   :  { %1472 = vmatprep.subr.bf16.mxu1 %v1737_v22 }
  0x66   :  { %1473 = vmatpush3.bf16.msra.mxu1 %v1738_v23 }
  0x67   :  { %940 = vmatpush1.bf16.msra.mxu0 %v1604_v25  ;;  %v1740_v25 = vld [vmem:[%s2293_s3 + $0x30] sm:$0xff]   ;;  %1474 = vmatprep.subr.bf16.mxu1 %v1739_v24 }
  0x68   :  { %941 = vmatprep.subr.bf16.mxu0 %v1609_v26  ;;  %v1741_v26 = vld [vmem:[%s2293_s3 + $0x78] sm:$0xff]  }
  0x6a   :  { %1475 = vmatpush3.bf16.msra.mxu1 %v1740_v25 }
  0x6b   :  { %942 = vmatpush1.bf16.msra.mxu0 %v1607_v29  ;;  %1476 = vmatprep.subr.bf16.mxu1 %v1741_v26 }
  0x6c   :  { %943 = vmatprep.subr.bf16.mxu0 %v1612_v30 }
  0x6e   :  { %1477 = vmatpush3.bf16.msra.mxu1 %v1742_v27 }
  0x6f   :  { %944 = vmatpush1.bf16.msra.mxu0 %v1610_v34  ;;  %1493 = vmatprep.subr.bf16.mxu1 %v1751_v28  ;;  %v162_v34 = vshrl.u32 %v161_v33, 7 }
  0x70   :  { %945 = vmatprep.subr.bf16.mxu0 %v1615_v35 }
  0x71   :  { %v163_v35 = vsub.s32 0, %v162_v34  ;;  %v167_v37 = vsub.s32 1, %v162_v34 }
  0x73   :  { %946 = vmatpush1.bf16.msra.mxu0 %v1613_v38  ;;  %v164_v38 = vrot.slane %v159_v36, %v163_v35 }
  0x74   :  { %947 = vmatprep.subr.bf16.mxu0 %v1618_v39  ;;  %v168_v39 = vrot.slane %v159_v36, %v167_v37 }
  0x77   :  { %948 = vmatpush1.bf16.msra.mxu0 %v1616_v42 }
  0x78   :  { %949 = vmatprep.subr.bf16.mxu0 %v1621_v43 }
  0x7b   :  { %950 = vmatpush1.bf16.msra.mxu0 %v1619_v47 }
  0x7c   :  { %951 = vmatprep.subr.bf16.mxu0 %v1627_v48 }
  0x7f   :  { %952 = vmatpush1.bf16.msra.mxu0 %v1625_v50 }
  0x80   :  { %962 = vmatprep.subr.bf16.mxu0 %v1635_v51 }
  0x82   :  { %954 = vmatmul.mubr.bf16.vlgmr.msra.gmra.mrb[0].mxu0 %v1304_v53 }
  0x83   :  { %963 = vmatpush1.bf16.msra.mxu0 %v1633_v54  ;;  %994 = vmatprep.mubr.bf16.mxu0 %v1307_v55  ;;  %v1744_v54 = vld [vmem:[%s2294_s5 + $0x8] sm:$0xff]   ;;  %v1745_v55 = vld [vmem:[%s2294_s5 + $0x10] sm:$0xff]  }
  0x84   :  { %964 = vmatprep.subr.bf16.mxu0 %v1641_v56  ;;  %v1746_v56 = vld [vmem:[%s2294_s5 + $0x18] sm:$0xff]  }
  0x87   :  { %965 = vmatpush1.bf16.msra.mxu0 %v1639_v57  ;;  %v1747_v57 = vld [vmem:[%s2294_s5 + $0x20] sm:$0xff]  }
  0x88   :  { %966 = vmatprep.subr.bf16.mxu0 %v1647_v46  ;;  %v1748_v46 = vld [vmem:[%s2294_s5 + $0x28] sm:$0xff]  }
  0x8b   :  { %967 = vmatpush1.bf16.msra.mxu0 %v1645_v58  ;;  %v1749_v58 = vld [vmem:[%s2294_s5 + $0x30] sm:$0xff]  }
  0x8c   :  { %968 = vmatprep.subr.bf16.mxu0 %v1653_v59  ;;  %v1750_v59 = vld [vmem:[%s2294_s5 + $0x38] sm:$0xff]  }
  0x8f   :  { %969 = vmatpush1.bf16.msra.mxu0 %v1651_v60 }
  0x90   :  { %970 = vmatprep.subr.bf16.mxu0 %v1659_v61  ;;  %v1436_v61 = vld [vmem:[%s2296_s4] ss:$0 sm:$0xff] }
  0x93   :  { %971 = vmatpush1.bf16.msra.mxu0 %v1657_v62 }
  0x94   :  { %972 = vmatprep.subr.bf16.mxu0 %v1665_v63 }
  0x97   :  { %973 = vmatpush1.bf16.msra.mxu0 %v1663_v0 }
  0x98   :  { %974 = vmatprep.subr.bf16.mxu0 %v1671_v1 }
  0x9b   :  { %975 = vmatpush1.bf16.msra.mxu0 %v1669_v2 }
  0x9c   :  { %976 = vmatprep.subr.bf16.mxu0 %v1677_v3 }
  0x9f   :  { %977 = vmatpush1.bf16.msra.mxu0 %v1675_v4 }
  0xa0   :  { %978 = vmatprep.subr.bf16.mxu0 %v1683_v5  ;;  %v1453_v5 = vld [vmem:[%s2297_s6] ss:$0 sm:$0xff] }
  0xa3   :  { %979 = vmatpush1.bf16.msra.mxu0 %v1681_v6 }
  0xa4   :  { %980 = vmatprep.subr.bf16.mxu0 %v1689_v7 }
  0xa7   :  { %981 = vmatpush1.bf16.msra.mxu0 %v1687_v8 }
  0xa8   :  { %982 = vmatprep.subr.bf16.mxu0 %v1695_v9 }
  0xab   :  { %983 = vmatpush1.bf16.msra.mxu0 %v1693_v10 }
  0xac   :  { %984 = vmatprep.subr.bf16.mxu0 %v1701_v11 }
  0xaf   :  { %985 = vmatpush1.bf16.msra.mxu0 %v1699_v12 }
  0xb0   :  { %986 = vmatprep.subr.bf16.mxu0 %v1707_v13 }
  0xb3   :  { %987 = vmatpush1.bf16.msra.mxu0 %v1705_v14 }
  0xb4   :  { %988 = vmatprep.subr.bf16.mxu0 %v1713_v15 }
  0xb7   :  { %989 = vmatpush1.bf16.msra.mxu0 %v1711_v16 }
  0xb8   :  { %990 = vmatprep.subr.bf16.mxu0 %v1719_v17 }
  0xbb   :  { %991 = vmatpush1.bf16.msra.mxu0 %v1717_v18 }
  0xbc   :  { %992 = vmatprep.subr.bf16.mxu0 %v1724_v19 }
  0xbf   :  { %993 = vmatpush1.bf16.msra.mxu0 %v1722_v20 }
  0xc2   :  { %995 = vmatmul.mubr.bf16.vlgmr.msra.gmra.mrb[0].mxu0 %v1306_v21 }
 0x11e   :  { %v873_v29 = vpop.f32.mrb[0].mxu1 }
 0x11f   :  { %v875_v30 = vpop.f32.mrb[1].mxu1  ;;  %v874_v40 = vadd.f32 %v873_v29, %v164_v38 }
 0x120   :  { %v877_v31 = vpop.f32.mrb[2].mxu1  ;;  %v876_v41 = vadd.f32 %v875_v30, %v168_v39 }
 0x121   :  { %v878_v32 = vpop.f32.mrb[3].mxu1 }
 0x195   :  { %v996_v42 = vpop.f32.mrb[0].mxu0 }
 0x196   :  { %v1514_v43 = vadd.f32 %v996_v42, %v874_v40  ;;  %v998_v44 = vpop.f32.mrb[1].mxu0 }
 0x197   :  { %v1516_v45 = vadd.f32 %v998_v44, %v876_v41  ;;  %v1000_v47 = vpop.f32.mrb[2].mxu0 }
 0x198   :  { %v1003_v48 = vmax.f32 %v1514_v43, 0.0  ;;  %v1001_v49 = vpop.f32.mrb[3].mxu0 }
 0x199   :  { %v1004_v50 = vmax.f32 %v1516_v45, 0.0 }
 0x19a   :  { %v1005_v53 = vpack.c.bf16 %v1003_v48, %v1003_v48 }
 0x19b   :  { %v1006_v51 = vpack.c.bf16 %v1004_v50, %v1004_v50 }
 0x19d   :  { %1174 = vmatprep.mubr.bf16.mxu1 %v1006_v51 }
 0x19e   :  { %1175 = vmatmul.mubr.bf16.vlgmr.msra.gmra.mrb[4].mxu1 %v1005_v53 }
 0x19f   :  { %1494 = vmatpush3.bf16.msra.mxu1 %v1743_v52  ;;  %1509 = vmatprep.mubr.msk.bf16.mxu1 %vm1752_vm0, %v1751_v28 }
 0x1a0   :  { %1495 = vmatprep.subr.bf16.mxu1 %v1751_v28 }
 0x1a3   :  { %1496 = vmatpush3.bf16.msra.mxu1 %v1744_v54 }
 0x1a4   :  { %1497 = vmatprep.subr.bf16.mxu1 %v1751_v28 }
 0x1a7   :  { %1498 = vmatpush3.bf16.msra.mxu1 %v1745_v55 }
 0x1a8   :  { %1499 = vmatprep.subr.bf16.mxu1 %v1751_v28 }
 0x1ab   :  { %1500 = vmatpush3.bf16.msra.mxu1 %v1746_v56 }
 0x1ac   :  { %1501 = vmatprep.subr.bf16.mxu1 %v1751_v28 }
 0x1af   :  { %1502 = vmatpush3.bf16.msra.mxu1 %v1747_v57 }
 0x1b0   :  { %1503 = vmatprep.subr.bf16.mxu1 %v1751_v28 }
 0x1b3   :  { %1504 = vmatpush3.bf16.msra.mxu1 %v1748_v46 }
 0x1b4   :  { %1505 = vmatprep.subr.bf16.mxu1 %v1751_v28 }
 0x1b7   :  { %1506 = vmatpush3.bf16.msra.mxu1 %v1749_v58 }
 0x1b8   :  { %1507 = vmatprep.subr.bf16.mxu1 %v1751_v28 }
 0x1bb   :  { %1508 = vmatpush3.bf16.msra.mxu1 %v1750_v59 }
 0x271   :  { %v1478_v60 = vpop.f32.mrb[4].mxu1 }
 0x272   :  { %v1479_v62 = vpop.f32.mrb[5].mxu1 }
 0x273   :  { %v1480_v63 = vadd.f32 %v1479_v62, %v1478_v60  ;;  %v1481_v0 = vpop.f32.mrb[6].mxu1 }
 0x274   :  { %v1482_v1 = vpop.f32.mrb[7].mxu1 }
 0x275   :  { %v1177_v2 = vadd.f32 %v1480_v63, %v1436_v61 }
 0x277   :  { %v1182_v3 = vmax.f32 %v1177_v2, 0.0 }
 0x279   :  { %v1183_v4 = vpack.c.bf16 %v1182_v3, %v1182_v3 }
 0x27b   :  { %1510 = vmatmul.mubr.bf16.vlgmr.msra.gmra.mrb[8].mxu1 %v1183_v4 }
 0x34e   :  { %v1289_v6 = vpop.f32.mrb[8].mxu1 }
 0x34f   :  { %v1290_v7 = vadd.f32 %v1453_v5, %v1289_v6  ;;  %v1511_v8 = vpop.f32.mrb[9].mxu1 }
 0x350   :  { %v1292_v9 = vpop.f32.mrb[10].mxu1 }
 0x351   :  { %1295 = vst [vmem:[%s2298_s7] sm:$0xff] %v1290_v7  ;;  %v1512_v10 = vpop.f32.mrb[11].mxu1 }

// kernel: cnn_forward.2
= control target key start
LH: loop header
LB: loop body
LE: loop exit
PB: predicated region body
PF: predicated region fallthrough
CT: control target
= control target key end

     0   :  { %10 = vsyncpa [#allocation4], 0  ;;  %s4817_s18 = smov [#allocation3]   ;;  %s6162_s0 = inlined_call_operand.vmem [shape: bf16[8,32,128], index: 0, kind: input, shape index: {}]   ;;  %s6163_s1 = inlined_call_operand.vmem [shape: bf16[5,128,256], index: 1, kind: input, shape index: {}]   ;;  %s6164_s2 = inlined_call_operand.vmem [shape: f32[1,128], index: 2, kind: input, shape index: {}]   ;;  %s6165_s3 = inlined_call_operand.hbm [shape: bf16[5,128,256], index: 3, kind: input, shape index: {}]   ;;  %s6166_s4 = inlined_call_operand.vmem [shape: f32[1,128], index: 4, kind: input, shape index: {}]   ;;  %s6167_s5 = inlined_call_operand.vmem [shape: bf16[64,128], index: 5, kind: output, shape index: {}]  }
   0x1   :  { %s22_s19 = sshll.u32 %s4817_s18, 4  ;;  %s4793_s22 = scalar_lea.hbm %s6165_s3, 10240  ;;  %s23_s19 = int_to_ptr.vmem [resolvable:$true] %s22_s19 }
   0x2   :  { %p4794_p0 = scmp.ne.s32.totalorder %s6165_s3, %s4793_s22  ;;  %p4797_p1 = scmp.lt.u32.totalorder %s4793_s22, %s6165_s3 }
   0x4   :  { %p4799_p2 = pnand %p4797_p1, %p4794_p0 }
   0x6   :  { %4802 = shalt.err (!%p4799_p2)
}
   0x7   :  { %s4803_s27 = scalar_lea.vmem %s23_s19, 10240  ;;  %p4808_p4 = scmp.lt.s32.totalorder %s23_s19, %s23_s19 }
   0x8   :  { %p4804_p3 = scmp.ne.s32.totalorder %s23_s19, %s4803_s27  ;;  %p4809_p5 = scmp.lt.s32.totalorder %s4803_s27, %s4803_s27 }
   0xa   :  { %p4810_p6 = por %p4809_p5, %p4808_p4 }
   0xc   :  { %p4811_p7 = pnand %p4810_p6, %p4804_p3 }
   0xe   :  { %4814 = shalt.err (!%p4811_p7)
}
   0xf   :  { %s4818_s28 = smov 128   ;;  %s4819_s29 = smov 8  }
  0x10   :  { %28 = dma.hbm_to_vmem [thread:$0]  %s6165_s3, 10240, %s23_s19, [#allocation4], %s4818_s28, %s4818_s28, %s4819_s29  }
  0x11   :  { %4815 = dma.done.wait [#allocation4], 10240  }
  0x12   :  { %4816 = vsyncadd [#allocation4], 4294957056  ;;  %v6168_v0 = vmov 0   ;;  %v4869_v1 = vld [vmem:[%s6163_s1 + $0x84] ss:$8 sps:$4 sm:$0xff]   ;;  %v5126_v44 = vld [vmem:[%s6162_s0 + $0x18] sm:$0xff]  }
  0x13   :  { %260 = vmatprep.mubr.bf16.mxu0 %v6168_v0  ;;  %728 = vmatprep.mubr.bf16.mxu1 %v6168_v0  ;;  %v4874_v2 = vld [vmem:[%s6163_s1 + $0x184] ss:$8 sps:$4 sm:$0xff]   ;;  %v4880_v3 = vld [vmem:[%s6163_s1 + $0x80] ss:$8 sps:$4 sm:$0xff]   ;;  %v4891_v5 = vld [vmem:[%s6163_s1 + $0x94] ss:$8 sps:$4 sm:$0xff]  }
  0x14   :  { %228 = vmatprep.subr.bf16.mxu0 %v4869_v1  ;;  %v4885_v4 = vld [vmem:[%s6163_s1 + $0x180] ss:$8 sps:$4 sm:$0xff]   ;;  %696 = vmatprep.subr.bf16.mxu1 %v4874_v2  ;;  %v4898_v6 = vld [vmem:[%s6163_s1 + $0x194] ss:$8 sps:$4 sm:$0xff]   ;;  %v4903_v7 = vld [vmem:[%s6163_s1 + $0x90] ss:$8 sps:$4 sm:$0xff]  }
  0x15   :  { %229 = vmatpush1.bf16.msra.mxu0 %v4880_v3  ;;  %697 = vmatpush1.bf16.msra.mxu1 %v4885_v4  ;;  %v4909_v8 = vld [vmem:[%s6163_s1 + $0x190] ss:$8 sps:$4 sm:$0xff]   ;;  %v4915_v9 = vld [vmem:[%s6163_s1 + $0xa4] ss:$8 sps:$4 sm:$0xff]   ;;  %v4925_v11 = vld [vmem:[%s6163_s1 + $0xa0] ss:$8 sps:$4 sm:$0xff]  }
  0x16   :  { %230 = vmatprep.subr.bf16.mxu0 %v4891_v5  ;;  %698 = vmatprep.subr.bf16.mxu1 %v4898_v6  ;;  %v4920_v10 = vld [vmem:[%s6163_s1 + $0x1a4] ss:$8 sps:$4 sm:$0xff]   ;;  %v4930_v12 = vld [vmem:[%s6163_s1 + $0x1a0] ss:$8 sps:$4 sm:$0xff]   ;;  %v4937_v13 = vld [vmem:[%s6163_s1 + $0xb4] ss:$8 sps:$4 sm:$0xff]  }
  0x17   :  { %v4944_v14 = vld [vmem:[%s6163_s1 + $0x1b4] ss:$8 sps:$4 sm:$0xff]   ;;  %v4949_v15 = vld [vmem:[%s6163_s1 + $0xb0] ss:$8 sps:$4 sm:$0xff]   ;;  %v4961_v17 = vld [vmem:[%s6163_s1 + $0xc4] ss:$8 sps:$4 sm:$0xff]  }
  0x18   :  { %v4956_v16 = vld [vmem:[%s6163_s1 + $0x1b0] ss:$8 sps:$4 sm:$0xff]   ;;  %6189 = vst [vmem:[#allocation7_spill] sm:$0xff] %v4961_v17  ;;  %v4968_v18 = vld [vmem:[%s6163_s1 + $0x1c4] ss:$8 sps:$4 sm:$0xff]   ;;  %vm1034_vm0 = vcmask 1046528  }
  0x19   :  { %231 = vmatpush1.bf16.msra.mxu0 %v4903_v7  ;;  %699 = vmatpush1.bf16.msra.mxu1 %v4909_v8  ;;  %6188 = vst [vmem:[#allocation6_spill] sm:$0xff] %v4956_v16  ;;  %6190 = vst [vmem:[#allocation8_spill] sm:$0xff] %v4968_v18  ;;  %v4973_v19 = vld [vmem:[%s6163_s1 + $0xc0] ss:$8 sps:$4 sm:$0xff]   ;;  %v4985_v21 = vld [vmem:[%s6163_s1 + $0xd4] ss:$8 sps:$4 sm:$0xff]  }
  0x1a   :  { %232 = vmatprep.subr.bf16.mxu0 %v4915_v9  ;;  %700 = vmatprep.subr.bf16.mxu1 %v4920_v10  ;;  %6191 = vst [vmem:[#allocation9_spill] sm:$0xff] %v4973_v19  ;;  %v4978_v20 = vld [vmem:[%s6163_s1 + $0x1c0] ss:$8 sps:$4 sm:$0xff]   ;;  %6193 = vst [vmem:[#allocation11_spill] sm:$0xff] %v4985_v21  ;;  %v4992_v22 = vld [vmem:[%s6163_s1 + $0x1d4] ss:$8 sps:$4 sm:$0xff]  }
  0x1b   :  { %6192 = vst [vmem:[#allocation10_spill] sm:$0xff] %v4978_v20  ;;  %6194 = vst [vmem:[#allocation12_spill] sm:$0xff] %v4992_v22  ;;  %v4997_v23 = vld [vmem:[%s6163_s1 + $0xd0] ss:$8 sps:$4 sm:$0xff]   ;;  %v5009_v25 = vld [vmem:[%s6163_s1 + $0xe4] ss:$8 sps:$4 sm:$0xff]  }
  0x1c   :  { %6195 = vst [vmem:[#allocation13_spill] sm:$0xff] %v4997_v23  ;;  %v5004_v24 = vld [vmem:[%s6163_s1 + $0x1d0] ss:$8 sps:$4 sm:$0xff]   ;;  %6197 = vst [vmem:[#allocation15_spill] sm:$0xff] %v5009_v25  ;;  %v5016_v26 = vld [vmem:[%s6163_s1 + $0x1e4] ss:$8 sps:$4 sm:$0xff]  }
  0x1d   :  { %233 = vmatpush1.bf16.msra.mxu0 %v4925_v11  ;;  %701 = vmatpush1.bf16.msra.mxu1 %v4930_v12  ;;  %6196 = vst [vmem:[#allocation14_spill] sm:$0xff] %v5004_v24  ;;  %6198 = vst [vmem:[#allocation16_spill] sm:$0xff] %v5016_v26  ;;  %v5021_v27 = vld [vmem:[%s6163_s1 + $0xe0] ss:$8 sps:$4 sm:$0xff]   ;;  %v5033_v29 = vld [vmem:[%s6163_s1 + $0xf4] ss:$8 sps:$4 sm:$0xff]  }
  0x1e   :  { %234 = vmatprep.subr.bf16.mxu0 %v4937_v13  ;;  %702 = vmatprep.subr.bf16.mxu1 %v4944_v14  ;;  %6199 = vst [vmem:[#allocation17_spill] sm:$0xff] %v5021_v27  ;;  %v5028_v28 = vld [vmem:[%s6163_s1 + $0x1e0] ss:$8 sps:$4 sm:$0xff]   ;;  %6201 = vst [vmem:[#allocation19_spill] sm:$0xff] %v5033_v29  ;;  %v5040_v30 = vld [vmem:[%s6163_s1 + $0x1f4] ss:$8 sps:$4 sm:$0xff]  }
  0x1f   :  { %6200 = vst [vmem:[#allocation18_spill] sm:$0xff] %v5028_v28  ;;  %6202 = vst [vmem:[#allocation20_spill] sm:$0xff] %v5040_v30  ;;  %v5045_v31 = vld [vmem:[%s6163_s1 + $0xf0] ss:$8 sps:$4 sm:$0xff]   ;;  %v5057_v33 = vld [vmem:[%s6163_s1 + $0x4] ss:$8 sps:$4 sm:$0xff]  }
  0x20   :  { %6203 = vst [vmem:[#allocation21_spill] sm:$0xff] %v5045_v31  ;;  %v5052_v32 = vld [vmem:[%s6163_s1 + $0x1f0] ss:$8 sps:$4 sm:$0xff]   ;;  %v5064_v34 = vld [vmem:[%s6163_s1 + $0x104] ss:$8 sps:$4 sm:$0xff]   ;;  %vm1389_vm1 = vcmask 1045504  }
  0x21   :  { %235 = vmatpush1.bf16.msra.mxu0 %v4949_v15  ;;  %703 = vmatpush1.bf16.msra.mxu1 %v4956_v16  ;;  %6204 = vst [vmem:[#allocation22_spill] sm:$0xff] %v5052_v32  ;;  %v5069_v35 = vld [vmem:[%s6162_s0 + $0x8] sm:$0xff]   ;;  %v5088_v38 = vld [vmem:[%s6163_s1 + $0x14] ss:$8 sps:$4 sm:$0xff]   ;;  %v5100_v40 = vld [vmem:[%s6163_s1 + $0x10] ss:$8 sps:$4 sm:$0xff]  }
  0x22   :  { %236 = vmatprep.subr.bf16.mxu0 %v4961_v17  ;;  %704 = vmatprep.subr.bf16.mxu1 %v4968_v18  ;;  %v5074_v36 = vld [vmem:[%s6163_s1] ss:$8 sps:$4 sm:$0xff]   ;;  %v5093_v39 = vld [vmem:[%s6163_s1 + $0x114] ss:$8 sps:$4 sm:$0xff]   ;;  %v5105_v41 = vld [vmem:[%s6163_s1 + $0x110] ss:$8 sps:$4 sm:$0xff]  }
  0x23   :  { %v5081_v37 = vld [vmem:[%s6163_s1 + $0x100] ss:$8 sps:$4 sm:$0xff]   ;;  %v5112_v42 = vld [vmem:[%s6163_s1 + $0x24] ss:$8 sps:$4 sm:$0xff]   ;;  %v5145_v47 = vld [vmem:[%s6163_s1 + $0x34] ss:$8 sps:$4 sm:$0xff]  }
  0x24   :  { %v5119_v43 = vld [vmem:[%s6163_s1 + $0x124] ss:$8 sps:$4 sm:$0xff]   ;;  %v5133_v45 = vld [vmem:[%s6163_s1 + $0x20] ss:$8 sps:$4 sm:$0xff]   ;;  %v5150_v48 = vld [vmem:[%s6163_s1 + $0x134] ss:$8 sps:$4 sm:$0xff]  }
  0x25   :  { %237 = vmatpush1.bf16.msra.mxu0 %v4973_v19  ;;  %705 = vmatpush1.bf16.msra.mxu1 %v4978_v20  ;;  %v5139_v46 = vld [vmem:[%s6163_s1 + $0x120] ss:$8 sps:$4 sm:$0xff]   ;;  %v5161_v49 = vld [vmem:[%s6163_s1 + $0x30] ss:$8 sps:$4 sm:$0xff]   ;;  %v5173_v51 = vld [vmem:[%s6163_s1 + $0x44] ss:$8 sps:$4 sm:$0xff]  }
  0x26   :  { %238 = vmatprep.subr.bf16.mxu0 %v4985_v21  ;;  %706 = vmatprep.subr.bf16.mxu1 %v4992_v22  ;;  %v5166_v50 = vld [vmem:[%s6163_s1 + $0x130] ss:$8 sps:$4 sm:$0xff]   ;;  %v5178_v52 = vld [vmem:[%s6163_s1 + $0x144] ss:$8 sps:$4 sm:$0xff]   ;;  %v5188_v54 = vld [vmem:[%s6163_s1 + $0x40] ss:$8 sps:$4 sm:$0xff]  }
  0x27   :  { %v5183_v53 = vld [vmem:[%s6162_s0 + $0x28] sm:$0xff]   ;;  %v5202_v56 = vld [vmem:[%s6163_s1 + $0x54] ss:$8 sps:$4 sm:$0xff]   ;;  %v5216_v58 = vld [vmem:[%s6163_s1 + $0x50] ss:$8 sps:$4 sm:$0xff]  }
  0x28   :  { %v5195_v55 = vld [vmem:[%s6163_s1 + $0x140] ss:$8 sps:$4 sm:$0xff]   ;;  %v5207_v57 = vld [vmem:[%s6163_s1 + $0x154] ss:$8 sps:$4 sm:$0xff]   ;;  %v5221_v59 = vld [vmem:[%s6163_s1 + $0x150] ss:$8 sps:$4 sm:$0xff]  }
  0x29   :  { %239 = vmatpush1.bf16.msra.mxu0 %v4997_v23  ;;  %707 = vmatpush1.bf16.msra.mxu1 %v5004_v24  ;;  %v5228_v60 = vld [vmem:[%s6163_s1 + $0x64] ss:$8 sps:$4 sm:$0xff]   ;;  %v5240_v62 = vld [vmem:[%s6162_s0 + $0x38] sm:$0xff]   ;;  %v5245_v63 = vld [vmem:[%s6163_s1 + $0x60] ss:$8 sps:$4 sm:$0xff]  }
  0x2a   :  { %240 = vmatprep.subr.bf16.mxu0 %v5009_v25  ;;  %708 = vmatprep.subr.bf16.mxu1 %v5016_v26  ;;  %v5235_v61 = vld [vmem:[%s6163_s1 + $0x164] ss:$8 sps:$4 sm:$0xff]   ;;  %v5305_v25 = vld [vmem:[%s6162_s0 + $0x58] sm:$0xff]   ;;  %v5337_v22 = vld [vmem:[%s6163_s1 + $0x200] ss:$8 sps:$4 sm:$0xff]  }
  0x2b   :  { %v5292_v26 = vld [vmem:[%s6162_s0 + $0x48] sm:$0xff]   ;;  %v5323_v24 = vld [vmem:[%s6162_s0 + $0x78] sm:$0xff]   ;;  %v5332_v23 = vld [vmem:[%s6162_s0] sm:$0xff]  }
  0x2c   :  { %v5342_v21 = vld [vmem:[%s6163_s1 + $0x214] ss:$8 sps:$4 sm:$0xff]   ;;  %v5351_v20 = vld [vmem:[%s6163_s1 + $0x210] ss:$8 sps:$4 sm:$0xff]   ;;  %v5358_v19 = vld [vmem:[%s6163_s1 + $0x224] ss:$8 sps:$4 sm:$0xff]  }
  0x2d   :  { %241 = vmatpush1.bf16.msra.mxu0 %v5021_v27  ;;  %709 = vmatpush1.bf16.msra.mxu1 %v5028_v28  ;;  %v5280_v28 = vld [vmem:[%s6163_s1 + $0x170] ss:$8 sps:$4 sm:$0xff]   ;;  %v5287_v27 = vld [vmem:[%s6163_s1 + $0x204] ss:$8 sps:$4 sm:$0xff]   ;;  %v5372_v18 = vld [vmem:[%s6163_s1 + $0x220] ss:$8 sps:$4 sm:$0xff]  }
  0x2e   :  { %242 = vmatprep.subr.bf16.mxu0 %v5033_v29  ;;  %710 = vmatprep.subr.bf16.mxu1 %v5040_v30  ;;  %v6205_v30 = vmov 0   ;;  %v5273_v29 = vld [vmem:[%s6163_s1 + $0x70] ss:$8 sps:$4 sm:$0xff]   ;;  %v5402_v17 = vld [vmem:[%s6162_s0 + $0x20] sm:$0xff]  }
  0x2f   :  { %v5439_v16 = vld [vmem:[%s6162_s0 + $0x30] sm:$0xff]  }
  0x31   :  { %243 = vmatpush1.bf16.msra.mxu0 %v5045_v31  ;;  %711 = vmatpush1.bf16.msra.mxu1 %v5052_v32  ;;  %v5257_v32 = vld [vmem:[%s6163_s1 + $0x74] ss:$8 sps:$4 sm:$0xff]  }
  0x32   :  { %469 = vmatprep.subr.bf16.mxu0 %v5057_v33  ;;  %889 = vmatprep.subr.bf16.mxu1 %v5064_v34  ;;  %v5264_v31 = vld [vmem:[%s6163_s1 + $0x174] ss:$8 sps:$4 sm:$0xff]  }
  0x34   :  { %261 = vmatmul.mubr.bf16.vlgmr.msra.gmra.mrb[0].mxu0 %v5069_v35  ;;  %729 = vmatmul.mubr.bf16.vlgmr.msra.gmra.mrb[0].mxu1 %v5069_v35 }
  0x35   :  { %470 = vmatpush1.bf16.msra.mxu0 %v5074_v36  ;;  %890 = vmatpush1.bf16.msra.mxu1 %v5081_v37 }
  0x36   :  { %270 = vmatprep.mubr.bf16.mxu0 %v6168_v0  ;;  %738 = vmatprep.mubr.bf16.mxu1 %v6168_v0 }
  0x37   :  { %471 = vmatprep.subr.bf16.mxu0 %v5088_v38  ;;  %891 = vmatprep.subr.bf16.mxu1 %v5093_v39 }
  0x39   :  { %472 = vmatpush1.bf16.msra.mxu0 %v5100_v40  ;;  %892 = vmatpush1.bf16.msra.mxu1 %v5105_v41 }
  0x3a   :  { %473 = vmatprep.subr.bf16.mxu0 %v5112_v42  ;;  %893 = vmatprep.subr.bf16.mxu1 %v5119_v43 }
  0x3c   :  { %271 = vmatmul.mubr.bf16.gmra.mrb[4].mxu0 %v5126_v44  ;;  %739 = vmatmul.mubr.bf16.gmra.mrb[4].mxu1 %v5126_v44 }
  0x3d   :  { %280 = vmatprep.mubr.bf16.mxu0 %v6168_v0  ;;  %748 = vmatprep.mubr.bf16.mxu1 %v6168_v0 }
  0x3e   :  { %474 = vmatpush1.bf16.msra.mxu0 %v5133_v45  ;;  %894 = vmatpush1.bf16.msra.mxu1 %v5139_v46 }
  0x3f   :  { %475 = vmatprep.subr.bf16.mxu0 %v5145_v47  ;;  %895 = vmatprep.subr.bf16.mxu1 %v5150_v48 }
  0x42   :  { %476 = vmatpush1.bf16.msra.mxu0 %v5161_v49  ;;  %896 = vmatpush1.bf16.msra.mxu1 %v5166_v50 }
  0x43   :  { %477 = vmatprep.subr.bf16.mxu0 %v5173_v51  ;;  %897 = vmatprep.subr.bf16.mxu1 %v5178_v52 }
  0x44   :  { %281 = vmatmul.mubr.bf16.gmra.mrb[8].mxu0 %v5183_v53  ;;  %749 = vmatmul.mubr.bf16.gmra.mrb[8].mxu1 %v5183_v53 }
  0x45   :  { %290 = vmatprep.mubr.bf16.mxu0 %v6168_v0  ;;  %758 = vmatprep.mubr.bf16.mxu1 %v6168_v0  ;;  %v5252_v0 = vld [vmem:[%s6163_s1 + $0x160] ss:$8 sps:$4 sm:$0xff]  }
  0x46   :  { %478 = vmatpush1.bf16.msra.mxu0 %v5188_v54  ;;  %898 = vmatpush1.bf16.msra.mxu1 %v5195_v55 }
  0x47   :  { %479 = vmatprep.subr.bf16.mxu0 %v5202_v56  ;;  %899 = vmatprep.subr.bf16.mxu1 %v5207_v57 }
  0x4a   :  { %480 = vmatpush1.bf16.msra.mxu0 %v5216_v58  ;;  %900 = vmatpush1.bf16.msra.mxu1 %v5221_v59 }
  0x4b   :  { %481 = vmatprep.subr.bf16.mxu0 %v5228_v60  ;;  %901 = vmatprep.subr.bf16.mxu1 %v5235_v61 }
  0x4c   :  { %291 = vmatmul.mubr.bf16.gmra.mrb[12].mxu0 %v5240_v62  ;;  %759 = vmatmul.mubr.bf16.gmra.mrb[12].mxu1 %v5240_v62 }
  0x4d   :  { %300 = vmatprep.mubr.bf16.mxu0 %v6205_v30  ;;  %768 = vmatprep.mubr.bf16.mxu1 %v6205_v30 }
  0x4e   :  { %482 = vmatpush1.bf16.msra.mxu0 %v5245_v63  ;;  %902 = vmatpush1.bf16.msra.mxu1 %v5252_v0 }
  0x4f   :  { %483 = vmatprep.subr.bf16.mxu0 %v5257_v32  ;;  %903 = vmatprep.subr.bf16.mxu1 %v5264_v31 }
  0x52   :  { %484 = vmatpush1.bf16.msra.mxu0 %v5273_v29  ;;  %904 = vmatpush1.bf16.msra.mxu1 %v5280_v28 }
  0x53   :  { %1244 = vmatprep.subr.bf16.mxu0 %v5287_v27  ;;  %1502 = vmatprep.subr.bf16.mxu1 %v5057_v33  ;;  %v5314_v33 = vld [vmem:[%s6162_s0 + $0x68] sm:$0xff]  }
  0x54   :  { %301 = vmatmul.mubr.bf16.gmra.mrb[16].mxu0 %v5292_v26  ;;  %769 = vmatmul.mubr.bf16.gmra.mrb[16].mxu1 %v5292_v26 }
  0x55   :  { %310 = vmatprep.mubr.bf16.mxu0 %v6205_v30  ;;  %778 = vmatprep.mubr.bf16.mxu1 %v6205_v30 }
  0x5c   :  { %311 = vmatmul.mubr.bf16.gmra.mrb[20].mxu0 %v5305_v25  ;;  %779 = vmatmul.mubr.bf16.gmra.mrb[20].mxu1 %v5305_v25 }
  0x5d   :  { %320 = vmatprep.mubr.bf16.mxu0 %v6205_v30  ;;  %788 = vmatprep.mubr.bf16.mxu1 %v6205_v30 }
  0x64   :  { %321 = vmatmul.mubr.bf16.gmra.mrb[24].mxu0 %v5314_v33  ;;  %789 = vmatmul.mubr.bf16.gmra.mrb[24].mxu1 %v5314_v33 }
  0x65   :  { %330 = vmatprep.mubr.bf16.mxu0 %v6205_v30  ;;  %798 = vmatprep.mubr.bf16.mxu1 %v6205_v30 }
  0x6c   :  { %331 = vmatmul.mubr.bf16.gmra.mrb[28].mxu0 %v5323_v24  ;;  %799 = vmatmul.mubr.bf16.gmra.mrb[28].mxu1 %v5323_v24 }
  0x6d   :  { %501 = vmatprep.mubr.bf16.mxu0 %v6205_v30  ;;  %921 = vmatprep.mubr.bf16.mxu1 %v6205_v30 }
  0x74   :  { %502 = vmatmul.mubr.bf16.vlgmr.msra.gmra.mrb[0].mxu0 %v5332_v23  ;;  %922 = vmatmul.mubr.bf16.vlgmr.msra.gmra.mrb[0].mxu1 %v5332_v23 }
  0x75   :  { %1245 = vmatpush1.bf16.msra.mxu0 %v5337_v22  ;;  %1503 = vmatpush1.bf16.msra.mxu1 %v5074_v36  ;;  %v5365_v36 = vld [vmem:[%s6162_s0 + $0x10] sm:$0xff]  }
  0x76   :  { %511 = vmatprep.mubr.bf16.mxu0 %v6205_v30  ;;  %931 = vmatprep.mubr.bf16.mxu1 %v6205_v30 }
  0x77   :  { %1246 = vmatprep.subr.bf16.mxu0 %v5342_v21  ;;  %1504 = vmatprep.subr.bf16.mxu1 %v5088_v38  ;;  %v5379_v38 = vld [vmem:[%s6163_s1 + $0x234] ss:$8 sps:$4 sm:$0xff]  }
  0x79   :  { %1247 = vmatpush1.bf16.msra.mxu0 %v5351_v20  ;;  %1505 = vmatpush1.bf16.msra.mxu1 %v5100_v40  ;;  %v5390_v40 = vld [vmem:[%s6163_s1 + $0x230] ss:$8 sps:$4 sm:$0xff]  }
  0x7a   :  { %1248 = vmatprep.subr.bf16.mxu0 %v5358_v19  ;;  %1506 = vmatprep.subr.bf16.mxu1 %v5112_v42  ;;  %v5397_v42 = vld [vmem:[%s6163_s1 + $0x244] ss:$8 sps:$4 sm:$0xff]  }
  0x7c   :  { %512 = vmatmul.mubr.bf16.gmra.mrb[4].mxu0 %v5365_v36  ;;  %932 = vmatmul.mubr.bf16.gmra.mrb[4].mxu1 %v5365_v36 }
  0x7d   :  { %521 = vmatprep.mubr.bf16.mxu0 %v6205_v30  ;;  %941 = vmatprep.mubr.bf16.mxu1 %v6205_v30 }
  0x7e   :  { %1249 = vmatpush1.bf16.msra.mxu0 %v5372_v18  ;;  %1507 = vmatpush1.bf16.msra.mxu1 %v5133_v45  ;;  %v5409_v45 = vld [vmem:[%s6163_s1 + $0x240] ss:$8 sps:$4 sm:$0xff]  }
  0x7f   :  { %1250 = vmatprep.subr.bf16.mxu0 %v5379_v38  ;;  %1508 = vmatprep.subr.bf16.mxu1 %v5145_v47  ;;  %v5416_v47 = vld [vmem:[%s6163_s1 + $0x254] ss:$8 sps:$4 sm:$0xff]  }
  0x82   :  { %1251 = vmatpush1.bf16.msra.mxu0 %v5390_v40  ;;  %1509 = vmatpush1.bf16.msra.mxu1 %v5161_v49  ;;  %v5427_v49 = vld [vmem:[%s6163_s1 + $0x250] ss:$8 sps:$4 sm:$0xff]  }
  0x83   :  { %1252 = vmatprep.subr.bf16.mxu0 %v5397_v42  ;;  %1510 = vmatprep.subr.bf16.mxu1 %v5173_v51  ;;  %v5434_v51 = vld [vmem:[%s6163_s1 + $0x264] ss:$8 sps:$4 sm:$0xff]  }
  0x84   :  { %522 = vmatmul.mubr.bf16.gmra.mrb[8].mxu0 %v5402_v17  ;;  %942 = vmatmul.mubr.bf16.gmra.mrb[8].mxu1 %v5402_v17 }
  0x85   :  { %531 = vmatprep.mubr.bf16.mxu0 %v6205_v30  ;;  %951 = vmatprep.mubr.bf16.mxu1 %v6205_v30 }
  0x86   :  { %1253 = vmatpush1.bf16.msra.mxu0 %v5409_v45  ;;  %1511 = vmatpush1.bf16.msra.mxu1 %v5188_v54  ;;  %v5446_v54 = vld [vmem:[%s6163_s1 + $0x260] ss:$8 sps:$4 sm:$0xff]  }
  0x87   :  { %1254 = vmatprep.subr.bf16.mxu0 %v5416_v47  ;;  %1512 = vmatprep.subr.bf16.mxu1 %v5202_v56  ;;  %v5453_v56 = vld [vmem:[%s6163_s1 + $0x274] ss:$8 sps:$4 sm:$0xff]  }
  0x8a   :  { %1255 = vmatpush1.bf16.msra.mxu0 %v5427_v49  ;;  %1513 = vmatpush1.bf16.msra.mxu1 %v5216_v58  ;;  %v5464_v58 = vld [vmem:[%s6163_s1 + $0x270] ss:$8 sps:$4 sm:$0xff]  }
  0x8b   :  { %1256 = vmatprep.subr.bf16.mxu0 %v5434_v51  ;;  %1514 = vmatprep.subr.bf16.mxu1 %v5228_v60  ;;  %v5471_v60 = vld [vmem:[%s6162_s0 + $0x40] sm:$0xff]  }
  0x8c   :  { %532 = vmatmul.mubr.bf16.gmra.mrb[12].mxu0 %v5439_v16  ;;  %952 = vmatmul.mubr.bf16.gmra.mrb[12].mxu1 %v5439_v16 }
  0x8d   :  { %541 = vmatprep.mubr.bf16.mxu0 %v6205_v30  ;;  %961 = vmatprep.mubr.bf16.mxu1 %v6205_v30 }
  0x8e   :  { %1257 = vmatpush1.bf16.msra.mxu0 %v5446_v54  ;;  %1515 = vmatpush1.bf16.msra.mxu1 %v5245_v63 }
  0x8f   :  { %1258 = vmatprep.subr.bf16.mxu0 %v5453_v56  ;;  %1516 = vmatprep.subr.bf16.mxu1 %v5257_v32  ;;  %v5484_v32 = vld [vmem:[%s6162_s0 + $0x50] sm:$0xff]  }
  0x92   :  { %1259 = vmatpush1.bf16.msra.mxu0 %v5464_v58  ;;  %1517 = vmatpush1.bf16.msra.mxu1 %v5273_v29  ;;  %v5502_v29 = vld [vmem:[%s6162_s0 + $0x70] sm:$0xff]  }
  0x93   :  { %1615 = vmatprep.subr.bf16.mxu0 %v5064_v34  ;;  %1985 = vmatprep.subr.bf16.mxu1 %v5287_v27  ;;  %v5493_v27 = vld [vmem:[%s6162_s0 + $0x60] sm:$0xff]  }
  0x94   :  { %542 = vmatmul.mubr.bf16.gmra.mrb[16].mxu0 %v5471_v60  ;;  %962 = vmatmul.mubr.bf16.gmra.mrb[16].mxu1 %v5471_v60 }
  0x95   :  { %551 = vmatprep.mubr.bf16.mxu0 %v6205_v30  ;;  %971 = vmatprep.mubr.bf16.mxu1 %v6205_v30 }
  0x9c   :  { %552 = vmatmul.mubr.bf16.gmra.mrb[20].mxu0 %v5484_v32  ;;  %972 = vmatmul.mubr.bf16.gmra.mrb[20].mxu1 %v5484_v32 }
  0x9d   :  { %561 = vmatprep.mubr.bf16.mxu0 %v6205_v30  ;;  %981 = vmatprep.mubr.bf16.mxu1 %v6205_v30 }
  0xa4   :  { %562 = vmatmul.mubr.bf16.gmra.mrb[24].mxu0 %v5493_v27  ;;  %982 = vmatmul.mubr.bf16.gmra.mrb[24].mxu1 %v5493_v27 }
  0xa5   :  { %571 = vmatprep.mubr.bf16.mxu0 %v6205_v30  ;;  %991 = vmatprep.mubr.bf16.mxu1 %v6205_v30 }
  0xac   :  { %572 = vmatmul.mubr.bf16.gmra.mrb[28].mxu0 %v5502_v29  ;;  %992 = vmatmul.mubr.bf16.gmra.mrb[28].mxu1 %v5502_v29 }
  0xad   :  { %1276 = vmatprep.mubr.bf16.mxu0 %v6205_v30  ;;  %1534 = vmatprep.mubr.bf16.mxu1 %v6205_v30 }
  0xb4   :  { %1277 = vmatmul.mubr.bf16.vlgmr.msra.gmra.mrb[32].mxu0 %v5332_v23  ;;  %1535 = vmatmul.mubr.bf16.vlgmr.msra.gmra.mrb[32].mxu1 %v5069_v35 }
  0xb5   :  { %1616 = vmatpush1.bf16.msra.mxu0 %v5081_v37  ;;  %1986 = vmatpush1.bf16.msra.mxu1 %v5337_v22 }
  0xb6   :  { %1286 = vmatprep.mubr.bf16.mxu0 %v6205_v30  ;;  %1544 = vmatprep.mubr.bf16.mxu1 %v6205_v30 }
  0xb7   :  { %1617 = vmatprep.subr.bf16.mxu0 %v5093_v39  ;;  %1987 = vmatprep.subr.bf16.mxu1 %v5342_v21 }
  0xb9   :  { %1618 = vmatpush1.bf16.msra.mxu0 %v5105_v41  ;;  %1988 = vmatpush1.bf16.msra.mxu1 %v5351_v20  ;;  %v4675_v20 = vld [vmem:[#allocation3 + $0x84] ss:$8 sps:$4 sm:$0xff]  }
  0xba   :  { %1619 = vmatprep.subr.bf16.mxu0 %v5119_v43  ;;  %1989 = vmatprep.subr.bf16.mxu1 %v5358_v19  ;;  %v4673_v19 = vld [vmem:[#allocation3 + $0x80] ss:$8 sps:$4 sm:$0xff]  }
  0xbc   :  { %1287 = vmatmul.mubr.bf16.gmra.mrb[36].mxu0 %v5365_v36  ;;  %1545 = vmatmul.mubr.bf16.gmra.mrb[36].mxu1 %v5126_v44 }
  0xbd   :  { %1296 = vmatprep.mubr.bf16.mxu0 %v6205_v30  ;;  %1554 = vmatprep.mubr.bf16.mxu1 %v6205_v30 }
  0xbe   :  { %1620 = vmatpush1.bf16.msra.mxu0 %v5139_v46  ;;  %1990 = vmatpush1.bf16.msra.mxu1 %v5372_v18  ;;  %v6222_v18 = vld [vmem:[#allocation22_spill] sm:$0xff] }
  0xbf   :  { %1621 = vmatprep.subr.bf16.mxu0 %v5150_v48  ;;  %1991 = vmatprep.subr.bf16.mxu1 %v5379_v38 }
  0xc2   :  { %1622 = vmatpush1.bf16.msra.mxu0 %v5166_v50  ;;  %1992 = vmatpush1.bf16.msra.mxu1 %v5390_v40 }
  0xc3   :  { %1623 = vmatprep.subr.bf16.mxu0 %v5178_v52  ;;  %1993 = vmatprep.subr.bf16.mxu1 %v5397_v42 }
  0xc4   :  { %1297 = vmatmul.mubr.bf16.gmra.mrb[40].mxu0 %v5402_v17  ;;  %1555 = vmatmul.mubr.bf16.gmra.mrb[40].mxu1 %v5183_v53 }
  0xc5   :  { %1306 = vmatprep.mubr.bf16.mxu0 %v6205_v30  ;;  %1564 = vmatprep.mubr.bf16.mxu1 %v6205_v30 }
  0xc6   :  { %1624 = vmatpush1.bf16.msra.mxu0 %v5195_v55  ;;  %1994 = vmatpush1.bf16.msra.mxu1 %v5409_v45 }
  0xc7   :  { %1625 = vmatprep.subr.bf16.mxu0 %v5207_v57  ;;  %1995 = vmatprep.subr.bf16.mxu1 %v5416_v47 }
  0xca   :  { %1626 = vmatpush1.bf16.msra.mxu0 %v5221_v59  ;;  %1996 = vmatpush1.bf16.msra.mxu1 %v5427_v49 }
  0xcb   :  { %1627 = vmatprep.subr.bf16.mxu0 %v5235_v61  ;;  %1997 = vmatprep.subr.bf16.mxu1 %v5434_v51 }
  0xcc   :  { %1307 = vmatmul.mubr.bf16.gmra.mrb[44].mxu0 %v5439_v16  ;;  %1565 = vmatmul.mubr.bf16.gmra.mrb[44].mxu1 %v5240_v62 }
  0xcd   :  { %1316 = vmatprep.mubr.bf16.mxu0 %v6205_v30  ;;  %1574 = vmatprep.mubr.bf16.mxu1 %v6205_v30 }
  0xce   :  { %1628 = vmatpush1.bf16.msra.mxu0 %v5252_v0  ;;  %1998 = vmatpush1.bf16.msra.mxu1 %v5446_v54  ;;  %v6206_v0 = vld [vmem:[#allocation6_spill] sm:$0xff] }
  0xcf   :  { %1629 = vmatprep.subr.bf16.mxu0 %v5264_v31  ;;  %1999 = vmatprep.subr.bf16.mxu1 %v5453_v56 }
  0xd2   :  { %1630 = vmatpush1.bf16.msra.mxu0 %v5280_v28  ;;  %2000 = vmatpush1.bf16.msra.mxu1 %v5464_v58 }
  0xd3   :  { %1728 = vmatprep.subr.bf16.mxu0 %v4869_v1  ;;  %2098 = vmatprep.subr.bf16.mxu1 %v4874_v2  ;;  %v6207_v1 = vld [vmem:[#allocation7_spill] sm:$0xff]  ;;  %v6208_v2 = vld [vmem:[#allocation8_spill] sm:$0xff] }
  0xd4   :  { %1317 = vmatmul.mubr.bf16.gmra.mrb[48].mxu0 %v5471_v60  ;;  %1575 = vmatmul.mubr.bf16.gmra.mrb[48].mxu1 %v5292_v26 }
  0xd5   :  { %1326 = vmatprep.mubr.bf16.mxu0 %v6205_v30  ;;  %1584 = vmatprep.mubr.bf16.mxu1 %v6205_v30 }
  0xdc   :  { %1327 = vmatmul.mubr.bf16.gmra.mrb[52].mxu0 %v5484_v32  ;;  %1585 = vmatmul.mubr.bf16.gmra.mrb[52].mxu1 %v5305_v25 }
  0xdd   :  { %1336 = vmatprep.mubr.bf16.mxu0 %v6205_v30  ;;  %1594 = vmatprep.mubr.bf16.mxu1 %v6205_v30 }
  0xe4   :  { %1337 = vmatmul.mubr.bf16.gmra.mrb[56].mxu0 %v5493_v27  ;;  %1595 = vmatmul.mubr.bf16.gmra.mrb[56].mxu1 %v5314_v33 }
  0xe5   :  { %1346 = vmatprep.mubr.bf16.mxu0 %v6205_v30  ;;  %1604 = vmatprep.mubr.bf16.mxu1 %v6205_v30 }
  0xec   :  { %1347 = vmatmul.mubr.bf16.gmra.mrb[60].mxu0 %v5502_v29  ;;  %1605 = vmatmul.mubr.bf16.gmra.mrb[60].mxu1 %v5323_v24 }
  0xed   :  { %1647 = vmatprep.mubr.bf16.mxu0 %v6205_v30  ;;  %2017 = vmatprep.mubr.bf16.mxu1 %v6205_v30 }
  0xf4   :  { %1648 = vmatmul.mubr.bf16.vlgmr.msra.gmra.mrb[64].mxu0 %v5069_v35  ;;  %2018 = vmatmul.mubr.bf16.vlgmr.msra.gmra.mrb[64].mxu1 %v5069_v35 }
  0xf5   :  { %1729 = vmatpush1.bf16.msra.mxu0 %v4880_v3  ;;  %2099 = vmatpush1.bf16.msra.mxu1 %v4885_v4  ;;  %v6209_v3 = vld [vmem:[#allocation9_spill] sm:$0xff]  ;;  %v6210_v4 = vld [vmem:[#allocation10_spill] sm:$0xff] }
  0xf6   :  { %1657 = vmatprep.mubr.bf16.mxu0 %v6205_v30  ;;  %2027 = vmatprep.mubr.bf16.mxu1 %v6205_v30 }
  0xf7   :  { %1730 = vmatprep.subr.bf16.mxu0 %v4891_v5  ;;  %2100 = vmatprep.subr.bf16.mxu1 %v4898_v6  ;;  %v6211_v5 = vld [vmem:[#allocation11_spill] sm:$0xff]  ;;  %v6212_v6 = vld [vmem:[#allocation12_spill] sm:$0xff] }
  0xf9   :  { %1731 = vmatpush1.bf16.msra.mxu0 %v4903_v7  ;;  %2101 = vmatpush1.bf16.msra.mxu1 %v4909_v8  ;;  %v6213_v7 = vld [vmem:[#allocation13_spill] sm:$0xff]  ;;  %v6214_v8 = vld [vmem:[#allocation14_spill] sm:$0xff] }
  0xfa   :  { %1732 = vmatprep.subr.bf16.mxu0 %v4915_v9  ;;  %2102 = vmatprep.subr.bf16.mxu1 %v4920_v10  ;;  %v6215_v9 = vld [vmem:[#allocation15_spill] sm:$0xff]  ;;  %v6216_v10 = vld [vmem:[#allocation16_spill] sm:$0xff] }
  0xfc   :  { %1658 = vmatmul.mubr.bf16.gmra.mrb[68].mxu0 %v5126_v44  ;;  %2028 = vmatmul.mubr.bf16.gmra.mrb[68].mxu1 %v5126_v44 }
  0xfd   :  { %1667 = vmatprep.mubr.bf16.mxu0 %v6205_v30  ;;  %2037 = vmatprep.mubr.bf16.mxu1 %v6205_v30 }
  0xfe   :  { %1733 = vmatpush1.bf16.msra.mxu0 %v4925_v11  ;;  %2103 = vmatpush1.bf16.msra.mxu1 %v4930_v12  ;;  %v6217_v11 = vld [vmem:[#allocation17_spill] sm:$0xff]  ;;  %v6218_v12 = vld [vmem:[#allocation18_spill] sm:$0xff] }
  0xff   :  { %1734 = vmatprep.subr.bf16.mxu0 %v4937_v13  ;;  %2104 = vmatprep.subr.bf16.mxu1 %v4944_v14  ;;  %v6219_v13 = vld [vmem:[#allocation19_spill] sm:$0xff]  ;;  %v6220_v14 = vld [vmem:[#allocation20_spill] sm:$0xff] }
 0x102   :  { %1735 = vmatpush1.bf16.msra.mxu0 %v4949_v15  ;;  %2105 = vmatpush1.bf16.msra.mxu1 %v6206_v0  ;;  %v6221_v15 = vld [vmem:[#allocation21_spill] sm:$0xff] }
 0x103   :  { %1736 = vmatprep.subr.bf16.mxu0 %v6207_v1  ;;  %2106 = vmatprep.subr.bf16.mxu1 %v6208_v2 }
 0x104   :  { %1668 = vmatmul.mubr.bf16.gmra.mrb[72].mxu0 %v5183_v53  ;;  %2038 = vmatmul.mubr.bf16.gmra.mrb[72].mxu1 %v5183_v53 }
 0x105   :  { %1677 = vmatprep.mubr.bf16.mxu0 %v6205_v30  ;;  %2047 = vmatprep.mubr.bf16.mxu1 %v6205_v30 }
 0x106   :  { %1737 = vmatpush1.bf16.msra.mxu0 %v6209_v3  ;;  %2107 = vmatpush1.bf16.msra.mxu1 %v6210_v4 }
 0x107   :  { %1738 = vmatprep.subr.bf16.mxu0 %v6211_v5  ;;  %2108 = vmatprep.subr.bf16.mxu1 %v6212_v6 }
 0x10a   :  { %1739 = vmatpush1.bf16.msra.mxu0 %v6213_v7  ;;  %2109 = vmatpush1.bf16.msra.mxu1 %v6214_v8 }
 0x10b   :  { %1740 = vmatprep.subr.bf16.mxu0 %v6215_v9  ;;  %2110 = vmatprep.subr.bf16.mxu1 %v6216_v10 }
 0x10c   :  { %1678 = vmatmul.mubr.bf16.gmra.mrb[76].mxu0 %v5240_v62  ;;  %2048 = vmatmul.mubr.bf16.gmra.mrb[76].mxu1 %v5240_v62 }
 0x10d   :  { %1687 = vmatprep.mubr.bf16.mxu0 %v6205_v30  ;;  %2057 = vmatprep.mubr.bf16.mxu1 %v6205_v30 }
 0x10e   :  { %1741 = vmatpush1.bf16.msra.mxu0 %v6217_v11  ;;  %2111 = vmatpush1.bf16.msra.mxu1 %v6218_v12 }
 0x10f   :  { %1742 = vmatprep.subr.bf16.mxu0 %v6219_v13  ;;  %2112 = vmatprep.subr.bf16.mxu1 %v6220_v14 }
 0x112   :  { %1743 = vmatpush1.bf16.msra.mxu0 %v6221_v15  ;;  %2113 = vmatpush1.bf16.msra.mxu1 %v6222_v18 }
 0x113   :  { %2626 = vmatprep.subr.bf16.mxu0 %v4675_v20  ;;  %3470 = vmatprep.subr.bf16.mxu1 %v4675_v20 }
 0x114   :  { %1688 = vmatmul.mubr.bf16.gmra.mrb[80].mxu0 %v5292_v26  ;;  %2058 = vmatmul.mubr.bf16.gmra.mrb[80].mxu1 %v5292_v26 }
 0x115   :  { %1697 = vmatprep.mubr.bf16.mxu0 %v6205_v30  ;;  %2067 = vmatprep.mubr.bf16.mxu1 %v6205_v30 }
 0x11c   :  { %1698 = vmatmul.mubr.bf16.gmra.mrb[84].mxu0 %v5305_v25  ;;  %2068 = vmatmul.mubr.bf16.gmra.mrb[84].mxu1 %v5305_v25 }
 0x11d   :  { %1707 = vmatprep.mubr.bf16.mxu0 %v6205_v30  ;;  %2077 = vmatprep.mubr.bf16.mxu1 %v6205_v30 }
 0x124   :  { %1708 = vmatmul.mubr.bf16.gmra.mrb[88].mxu0 %v5314_v33  ;;  %2078 = vmatmul.mubr.bf16.gmra.mrb[88].mxu1 %v5314_v33 }
 0x125   :  { %1717 = vmatprep.mubr.bf16.mxu0 %v6205_v30  ;;  %2087 = vmatprep.mubr.bf16.mxu1 %v6205_v30 }
 0x12c   :  { %1718 = vmatmul.mubr.bf16.gmra.mrb[92].mxu0 %v5323_v24  ;;  %2088 = vmatmul.mubr.bf16.gmra.mrb[92].mxu1 %v5323_v24 }
 0x12d   :  { %1760 = vmatprep.mubr.bf16.mxu0 %v6205_v30  ;;  %2130 = vmatprep.mubr.bf16.mxu1 %v6205_v30 }
 0x134   :  { %1761 = vmatmul.mubr.bf16.vlgmr.msra.gmra.mrb[64].mxu0 %v5332_v23  ;;  %2131 = vmatmul.mubr.bf16.vlgmr.msra.gmra.mrb[64].mxu1 %v5332_v23 }
 0x135   :  { %1770 = vmatprep.mubr.bf16.mxu0 %v6205_v30  ;;  %2140 = vmatprep.mubr.bf16.mxu1 %v6205_v30 }
 0x136   :  { %2627 = vmatpush1.bf16.msra.mxu0 %v4673_v19  ;;  %3471 = vmatpush1.bf16.msra.mxu1 %v4673_v19 }
 0x13c   :  { %1771 = vmatmul.mubr.bf16.gmra.mrb[68].mxu0 %v5365_v36  ;;  %2141 = vmatmul.mubr.bf16.gmra.mrb[68].mxu1 %v5365_v36 }
 0x13d   :  { %1780 = vmatprep.mubr.bf16.mxu0 %v6205_v30  ;;  %2150 = vmatprep.mubr.bf16.mxu1 %v6205_v30 }
 0x144   :  { %1781 = vmatmul.mubr.bf16.gmra.mrb[72].mxu0 %v5402_v17  ;;  %2151 = vmatmul.mubr.bf16.gmra.mrb[72].mxu1 %v5402_v17 }
 0x145   :  { %1790 = vmatprep.mubr.bf16.mxu0 %v6205_v30  ;;  %2160 = vmatprep.mubr.bf16.mxu1 %v6205_v30 }
 0x147   :  { %v503_v21 = vpop.f32.mrb[0].mxu0  ;;  %v923_v22 = vpop.f32.mrb[0].mxu1 }
 0x148   :  { %v505_v23 = vpop.f32.mrb[1].mxu0  ;;  %v925_v24 = vpop.f32.mrb[1].mxu1  ;;  %v1035_v28 = vrot.slane %v923_v22, 1 }
 0x149   :  { %v507_v25 = vpop.f32.mrb[2].mxu0  ;;  %v927_v26 = vpop.f32.mrb[2].mxu1  ;;  %v1038_v35 = vrot.slane %v925_v24, 1 }
 0x14a   :  { %v1036_v31 = vrot.slane %v927_v26, 1  ;;  %v509_v17 = vpop.f32.mrb[3].mxu0  ;;  %v929_v34 = vpop.f32.mrb[3].mxu1 }
 0x14b   :  { %v1039_v37 = vrot.slane %v929_v34, 1 }
 0x14c   :  { %v1037_v39 = vsel %vm1034_vm0, %v1035_v28, %v1036_v31  ;;  %v5647_v41 = vadd.f32 %v1036_v31, %v507_v25  ;;  %1791 = vmatmul.mubr.bf16.gmra.mrb[76].mxu0 %v5439_v16  ;;  %2161 = vmatmul.mubr.bf16.gmra.mrb[76].mxu1 %v5439_v16 }
 0x14d   :  { %v5651_v43 = vadd.f32 %v1037_v39, %v503_v21  ;;  %v1040_v44 = vsel %vm1034_vm0, %v1038_v35, %v1039_v37  ;;  %v5654_v46 = vadd.f32 %v1039_v37, %v509_v17  ;;  %1800 = vmatprep.mubr.bf16.mxu0 %v6205_v30  ;;  %2170 = vmatprep.mubr.bf16.mxu1 %v6205_v30 }
 0x14e   :  { %v5658_v48 = vadd.f32 %v1040_v44, %v505_v23 }
 0x14f   :  { %v513_v50 = vpop.f32.mrb[4].mxu0  ;;  %v933_v52 = vpop.f32.mrb[4].mxu1 }
 0x150   :  { %v515_v53 = vpop.f32.mrb[5].mxu0  ;;  %v935_v55 = vpop.f32.mrb[5].mxu1  ;;  %v1041_v61 = vrot.slane %v933_v52, 1 }
 0x151   :  { %v517_v57 = vpop.f32.mrb[6].mxu0  ;;  %v937_v59 = vpop.f32.mrb[6].mxu1  ;;  %v1044_v33 = vrot.slane %v935_v55, 1 }
 0x152   :  { %v1042_v16 = vrot.slane %v937_v59, 1  ;;  %v519_v62 = vpop.f32.mrb[7].mxu0  ;;  %v939_v63 = vpop.f32.mrb[7].mxu1 }
 0x153   :  { %v1045_v36 = vrot.slane %v939_v63, 1 }
 0x154   :  { %v1043_v38 = vsel %vm1034_vm0, %v1041_v61, %v1042_v16  ;;  %v5661_v40 = vadd.f32 %v1042_v16, %v517_v57  ;;  %1801 = vmatmul.mubr.bf16.gmra.mrb[80].mxu0 %v5471_v60  ;;  %2171 = vmatmul.mubr.bf16.gmra.mrb[80].mxu1 %v5471_v60 }
 0x155   :  { %v5665_v42 = vadd.f32 %v1043_v38, %v513_v50  ;;  %v1046_v45 = vsel %vm1034_vm0, %v1044_v33, %v1045_v36  ;;  %v5668_v47 = vadd.f32 %v1045_v36, %v519_v62  ;;  %1810 = vmatprep.mubr.bf16.mxu0 %v6205_v30  ;;  %2180 = vmatprep.mubr.bf16.mxu1 %v6205_v30 }
 0x156   :  { %v5672_v49 = vadd.f32 %v1046_v45, %v515_v53 }
 0x157   :  { %v523_v51 = vpop.f32.mrb[8].mxu0  ;;  %v943_v54 = vpop.f32.mrb[8].mxu1 }
 0x158   :  { %v525_v56 = vpop.f32.mrb[9].mxu0  ;;  %v945_v58 = vpop.f32.mrb[9].mxu1  ;;  %v1047_v2 = vrot.slane %v943_v54, 1 }
 0x159   :  { %v527_v0 = vpop.f32.mrb[10].mxu0  ;;  %v947_v1 = vpop.f32.mrb[10].mxu1  ;;  %v1050_v5 = vrot.slane %v945_v58, 1 }
 0x15a   :  { %v1048_v60 = vrot.slane %v947_v1, 1  ;;  %v529_v3 = vpop.f32.mrb[11].mxu0  ;;  %v949_v4 = vpop.f32.mrb[11].mxu1 }
 0x15b   :  { %v1051_v6 = vrot.slane %v949_v4, 1 }
 0x15c   :  { %v1049_v7 = vsel %vm1034_vm0, %v1047_v2, %v1048_v60  ;;  %v5675_v8 = vadd.f32 %v1048_v60, %v527_v0  ;;  %1811 = vmatmul.mubr.bf16.gmra.mrb[84].mxu0 %v5484_v32  ;;  %2181 = vmatmul.mubr.bf16.gmra.mrb[84].mxu1 %v5484_v32 }
 0x15d   :  { %v5679_v9 = vadd.f32 %v1049_v7, %v523_v51  ;;  %v1052_v10 = vsel %vm1034_vm0, %v1050_v5, %v1051_v6  ;;  %v5682_v11 = vadd.f32 %v1051_v6, %v529_v3  ;;  %1820 = vmatprep.mubr.bf16.mxu0 %v6205_v30  ;;  %2190 = vmatprep.mubr.bf16.mxu1 %v6205_v30 }
 0x15e   :  { %v5686_v12 = vadd.f32 %v1052_v10, %v525_v56 }
 0x15f   :  { %v533_v13 = vpop.f32.mrb[12].mxu0  ;;  %v953_v14 = vpop.f32.mrb[12].mxu1 }
 0x160   :  { %v535_v15 = vpop.f32.mrb[13].mxu0  ;;  %v955_v18 = vpop.f32.mrb[13].mxu1  ;;  %v1053_v21 = vrot.slane %v953_v14, 1 }
 0x161   :  { %v537_v19 = vpop.f32.mrb[14].mxu0  ;;  %v957_v20 = vpop.f32.mrb[14].mxu1  ;;  %v1056_v24 = vrot.slane %v955_v18, 1 }
 0x162   :  { %v1054_v32 = vrot.slane %v957_v20, 1  ;;  %v539_v22 = vpop.f32.mrb[15].mxu0  ;;  %v959_v23 = vpop.f32.mrb[15].mxu1 }
 0x163   :  { %v1057_v25 = vrot.slane %v959_v23, 1 }
 0x164   :  { %v1055_v26 = vsel %vm1034_vm0, %v1053_v21, %v1054_v32  ;;  %v5689_v28 = vadd.f32 %v1054_v32, %v537_v19  ;;  %1821 = vmatmul.mubr.bf16.gmra.mrb[88].mxu0 %v5493_v27  ;;  %2191 = vmatmul.mubr.bf16.gmra.mrb[88].mxu1 %v5493_v27 }
 0x165   :  { %v5693_v31 = vadd.f32 %v1055_v26, %v533_v13  ;;  %v1058_v17 = vsel %vm1034_vm0, %v1056_v24, %v1057_v25  ;;  %v5696_v34 = vadd.f32 %v1057_v25, %v539_v22  ;;  %1830 = vmatprep.mubr.bf16.mxu0 %v6205_v30  ;;  %2200 = vmatprep.mubr.bf16.mxu1 %v6205_v30 }
 0x166   :  { %v5700_v35 = vadd.f32 %v1058_v17, %v535_v15 }
 0x167   :  { %v543_v37 = vpop.f32.mrb[16].mxu0  ;;  %v963_v39 = vpop.f32.mrb[16].mxu1 }
 0x168   :  { %v545_v44 = vpop.f32.mrb[17].mxu0  ;;  %v965_v50 = vpop.f32.mrb[17].mxu1  ;;  %v1059_v55 = vrot.slane %v963_v39, 1 }
 0x169   :  { %v547_v52 = vpop.f32.mrb[18].mxu0  ;;  %v967_v53 = vpop.f32.mrb[18].mxu1  ;;  %v1062_v61 = vrot.slane %v965_v50, 1 }
 0x16a   :  { %v1060_v27 = vrot.slane %v967_v53, 1  ;;  %v549_v57 = vpop.f32.mrb[19].mxu0  ;;  %v969_v59 = vpop.f32.mrb[19].mxu1 }
 0x16b   :  { %v1063_v16 = vrot.slane %v969_v59, 1 }
 0x16c   :  { %v1061_v62 = vsel %vm1034_vm0, %v1059_v55, %v1060_v27  ;;  %v5703_v63 = vadd.f32 %v1060_v27, %v547_v52  ;;  %1831 = vmatmul.mubr.bf16.gmra.mrb[92].mxu0 %v5502_v29  ;;  %2201 = vmatmul.mubr.bf16.gmra.mrb[92].mxu1 %v5502_v29 }
 0x16d   :  { %v5707_v33 = vadd.f32 %v1061_v62, %v543_v37  ;;  %v1064_v36 = vsel %vm1034_vm0, %v1062_v61, %v1063_v16  ;;  %v5710_v38 = vadd.f32 %v1063_v16, %v549_v57  ;;  %2658 = vmatprep.mubr.bf16.mxu0 %v6205_v30  ;;  %3502 = vmatprep.mubr.bf16.mxu1 %v6205_v30 }
 0x16e   :  { %v5714_v45 = vadd.f32 %v1064_v36, %v545_v44 }
 0x16f   :  { %v553_v51 = vpop.f32.mrb[20].mxu0  ;;  %v973_v54 = vpop.f32.mrb[20].mxu1 }
 0x170   :  { %v555_v56 = vpop.f32.mrb[21].mxu0  ;;  %v975_v58 = vpop.f32.mrb[21].mxu1  ;;  %v1065_v2 = vrot.slane %v973_v54, 1 }
 0x171   :  { %v557_v0 = vpop.f32.mrb[22].mxu0  ;;  %v977_v1 = vpop.f32.mrb[22].mxu1  ;;  %v1068_v4 = vrot.slane %v975_v58, 1 }
 0x172   :  { %v1066_v29 = vrot.slane %v977_v1, 1  ;;  %v559_v60 = vpop.f32.mrb[23].mxu0  ;;  %v979_v3 = vpop.f32.mrb[23].mxu1 }
 0x173   :  { %v1069_v5 = vrot.slane %v979_v3, 1 }
 0x174   :  { %v1067_v6 = vsel %vm1034_vm0, %v1065_v2, %v1066_v29  ;;  %v5717_v7 = vadd.f32 %v1066_v29, %v557_v0 }
 0x175   :  { %v5719_v10 = vadd.f32 %v1067_v6, %v553_v51  ;;  %v1070_v13 = vsel %vm1034_vm0, %v1068_v4, %v1069_v5  ;;  %v5722_v14 = vadd.f32 %v1069_v5, %v559_v60 }
 0x176   :  { %v5724_v15 = vadd.f32 %v1070_v13, %v555_v56 }
 0x177   :  { %v563_v18 = vpop.f32.mrb[24].mxu0  ;;  %v983_v19 = vpop.f32.mrb[24].mxu1 }
 0x178   :  { %v565_v20 = vpop.f32.mrb[25].mxu0  ;;  %v985_v21 = vpop.f32.mrb[25].mxu1  ;;  %v1071_v23 = vrot.slane %v983_v19, 1 }
 0x179   :  { %v567_v32 = vpop.f32.mrb[26].mxu0  ;;  %v987_v22 = vpop.f32.mrb[26].mxu1  ;;  %v1074_v17 = vrot.slane %v985_v21, 1 }
 0x17a   :  { %v1072_v24 = vrot.slane %v987_v22, 1  ;;  %v569_v25 = vpop.f32.mrb[27].mxu0  ;;  %v989_v26 = vpop.f32.mrb[27].mxu1 }
 0x17b   :  { %v1075_v37 = vrot.slane %v989_v26, 1 }
 0x17c   :  { %v1073_v39 = vsel %vm1034_vm0, %v1071_v23, %v1072_v24  ;;  %v5727_v44 = vadd.f32 %v1072_v24, %v567_v32 }
 0x17d   :  { %v5729_v50 = vadd.f32 %v1073_v39, %v563_v18  ;;  %v1076_v52 = vsel %vm1034_vm0, %v1074_v17, %v1075_v37  ;;  %v5732_v53 = vadd.f32 %v1075_v37, %v569_v25 }
 0x17e   :  { %v5734_v55 = vadd.f32 %v1076_v52, %v565_v20 }
 0x17f   :  { %v573_v27 = vpop.f32.mrb[28].mxu0  ;;  %v993_v57 = vpop.f32.mrb[28].mxu1 }
 0x180   :  { %v575_v59 = vpop.f32.mrb[29].mxu0  ;;  %v995_v61 = vpop.f32.mrb[29].mxu1  ;;  %v1077_v36 = vrot.slane %v993_v57, 1  ;;  %v4678_v57 = vld [vmem:[#allocation3 + $0x94] ss:$8 sps:$4 sm:$0xff]  }
 0x181   :  { %v577_v16 = vpop.f32.mrb[30].mxu0  ;;  %v997_v62 = vpop.f32.mrb[30].mxu1  ;;  %v1080_v58 = vrot.slane %v995_v61, 1  ;;  %2628 = vmatprep.subr.bf16.mxu0 %v4678_v57  ;;  %3472 = vmatprep.subr.bf16.mxu1 %v4678_v57 }
 0x182   :  { %v1078_v51 = vrot.slane %v997_v62, 1  ;;  %v579_v54 = vpop.f32.mrb[31].mxu0  ;;  %v999_v56 = vpop.f32.mrb[31].mxu1 }
 0x183   :  { %v1081_v0 = vrot.slane %v999_v56, 1 }
 0x184   :  { %v1079_v1 = vsel %vm1034_vm0, %v1077_v36, %v1078_v51  ;;  %v5737_v2 = vadd.f32 %v1078_v51, %v577_v16  ;;  %v4676_v16 = vld [vmem:[#allocation3 + $0x90] ss:$8 sps:$4 sm:$0xff]  }
 0x185   :  { %v5739_v29 = vadd.f32 %v1079_v1, %v573_v27  ;;  %v1082_v60 = vsel %vm1034_vm0, %v1080_v58, %v1081_v0  ;;  %v5742_v3 = vadd.f32 %v1081_v0, %v579_v54  ;;  %2629 = vmatpush1.bf16.msra.mxu0 %v4676_v16  ;;  %3473 = vmatpush1.bf16.msra.mxu1 %v4676_v16  ;;  %v4681_v0 = vld [vmem:[#allocation3 + $0xa4] ss:$8 sps:$4 sm:$0xff]  }
 0x186   :  { %v5744_v4 = vadd.f32 %v1082_v60, %v575_v59  ;;  %2630 = vmatprep.subr.bf16.mxu0 %v4681_v0  ;;  %3474 = vmatprep.subr.bf16.mxu1 %v4681_v0 }
 0x187   :  { %v1278_v5 = vpop.f32.mrb[32].mxu0  ;;  %v5746_v6 = vpop.f32.mrb[32].mxu1 }
 0x188   :  { %v1280_v13 = vpop.f32.mrb[33].mxu0  ;;  %v5748_v18 = vpop.f32.mrb[33].mxu1  ;;  %v1390_v21 = vrot.slane %v1278_v5, 2  ;;  %v4679_v5 = vld [vmem:[#allocation3 + $0xa0] ss:$8 sps:$4 sm:$0xff]  }
 0x189   :  { %v1282_v19 = vpop.f32.mrb[34].mxu0  ;;  %v5750_v20 = vpop.f32.mrb[34].mxu1  ;;  %v1393_v24 = vrot.slane %v1280_v13, 2  ;;  %2631 = vmatpush1.bf16.msra.mxu0 %v4679_v5  ;;  %3475 = vmatpush1.bf16.msra.mxu1 %v4679_v5 }
 0x18a   :  { %v1391_v32 = vrot.slane %v1282_v19, 2  ;;  %v1284_v22 = vpop.f32.mrb[35].mxu0  ;;  %v5752_v23 = vpop.f32.mrb[35].mxu1 }
 0x18b   :  { %v1394_v25 = vrot.slane %v1284_v22, 2 }
 0x18c   :  { %v1392_v26 = vsel %vm1389_vm1, %v1390_v21, %v1391_v32  ;;  %v5756_v17 = vadd.f32 %v1391_v32, %v5647_v41 }
 0x18d   :  { %v5759_v37 = vadd.f32 %v1392_v26, %v5651_v43  ;;  %v1395_v39 = vsel %vm1389_vm1, %v1393_v24, %v1394_v25  ;;  %v5763_v52 = vadd.f32 %v1394_v25, %v5654_v46 }
 0x18e   :  { %v5766_v27 = vadd.f32 %v1395_v39, %v5658_v48 }
 0x18f   :  { %v1288_v59 = vpop.f32.mrb[36].mxu0  ;;  %v5768_v61 = vpop.f32.mrb[36].mxu1 }
 0x190   :  { %v1290_v62 = vpop.f32.mrb[37].mxu0  ;;  %v5770_v36 = vpop.f32.mrb[37].mxu1  ;;  %v1396_v46 = vrot.slane %v1288_v59, 2 }
 0x191   :  { %v1292_v41 = vpop.f32.mrb[38].mxu0  ;;  %v5772_v43 = vpop.f32.mrb[38].mxu1  ;;  %v1399_v56 = vrot.slane %v1290_v62, 2 }
 0x192   :  { %v1397_v51 = vrot.slane %v1292_v41, 2  ;;  %v1294_v54 = vpop.f32.mrb[39].mxu0  ;;  %v5774_v48 = vpop.f32.mrb[39].mxu1 }
 0x193   :  { %v1400_v58 = vrot.slane %v1294_v54, 2 }
 0x194   :  { %v1398_v1 = vsel %vm1389_vm1, %v1396_v46, %v1397_v51  ;;  %v5778_v60 = vadd.f32 %v1397_v51, %v5661_v40  ;;  %v4684_v40 = vld [vmem:[#allocation3 + $0xb4] ss:$8 sps:$4 sm:$0xff]   ;;  %v4687_v46 = vld [vmem:[#allocation3 + $0xc4] ss:$8 sps:$4 sm:$0xff]   ;;  %v4821_v51 = vmov 0.0  }
 0x195   :  { %v5781_v13 = vadd.f32 %v1398_v1, %v5665_v42  ;;  %v1401_v19 = vsel %vm1389_vm1, %v1399_v56, %v1400_v58  ;;  %v5785_v21 = vadd.f32 %v1400_v58, %v5668_v47  ;;  %v4682_v42 = vld [vmem:[#allocation3 + $0xb0] ss:$8 sps:$4 sm:$0xff]   ;;  %2632 = vmatprep.subr.bf16.mxu0 %v4684_v40  ;;  %3476 = vmatprep.subr.bf16.mxu1 %v4684_v40  ;;  %v4685_v58 = vld [vmem:[#allocation3 + $0xc0] ss:$8 sps:$4 sm:$0xff]  }
 0x196   :  { %v5788_v32 = vadd.f32 %v1401_v19, %v5672_v49  ;;  %2633 = vmatpush1.bf16.msra.mxu0 %v4682_v42  ;;  %3477 = vmatpush1.bf16.msra.mxu1 %v4682_v42  ;;  %2458 = vst [vmem:[#allocation2 + $0xe] sm:$0xff] %v4821_v51  ;;  %2460 = vst [vmem:[#allocation2 + $0x26] sm:$0xff] %v4821_v51 }
 0x197   :  { %v1298_v22 = vpop.f32.mrb[40].mxu0  ;;  %v5790_v24 = vpop.f32.mrb[40].mxu1  ;;  %2462 = vst [vmem:[#allocation2 + $0x3e] sm:$0xff] %v4821_v51  ;;  %2464 = vst [vmem:[#allocation2 + $0x56] sm:$0xff] %v4821_v51  ;;  %2634 = vmatprep.subr.bf16.mxu0 %v4687_v46  ;;  %3478 = vmatprep.subr.bf16.mxu1 %v4687_v46  ;;  %v4693_v46 = vld [vmem:[#allocation3 + $0xe4] ss:$8 sps:$4 sm:$0xff]  }
 0x198   :  { %v1300_v25 = vpop.f32.mrb[41].mxu0  ;;  %v5792_v26 = vpop.f32.mrb[41].mxu1  ;;  %v1402_v47 = vrot.slane %v1298_v22, 2  ;;  %2466 = vst [vmem:[#allocation2 + $0x6e] sm:$0xff] %v4821_v51  ;;  %2468 = vst [vmem:[#allocation2 + $0x86] sm:$0xff] %v4821_v51 }
 0x199   :  { %v1302_v39 = vpop.f32.mrb[42].mxu0  ;;  %v5794_v57 = vpop.f32.mrb[42].mxu1  ;;  %v1405_v62 = vrot.slane %v1300_v25, 2  ;;  %2470 = vst [vmem:[#allocation2 + $0x9e] sm:$0xff] %v4821_v51  ;;  %2472 = vst [vmem:[#allocation2 + $0xb6] sm:$0xff] %v4821_v51 }
 0x19a   :  { %v1403_v59 = vrot.slane %v1302_v39, 2  ;;  %v1304_v16 = vpop.f32.mrb[43].mxu0  ;;  %v5796_v49 = vpop.f32.mrb[43].mxu1  ;;  %2635 = vmatpush1.bf16.msra.mxu0 %v4685_v58  ;;  %3479 = vmatpush1.bf16.msra.mxu1 %v4685_v58  ;;  %v4691_v58 = vld [vmem:[#allocation3 + $0xe0] ss:$8 sps:$4 sm:$0xff]  }
 0x19b   :  { %v1406_v41 = vrot.slane %v1304_v16, 2 }
 0x19c   :  { %v1404_v54 = vsel %vm1389_vm1, %v1402_v47, %v1403_v59  ;;  %v5800_v56 = vadd.f32 %v1403_v59, %v5675_v8  ;;  %v4690_v8 = vld [vmem:[#allocation3 + $0xd4] ss:$8 sps:$4 sm:$0xff]  }
 0x19d   :  { %v5803_v0 = vadd.f32 %v1404_v54, %v5679_v9  ;;  %v1407_v1 = vsel %vm1389_vm1, %v1405_v62, %v1406_v41  ;;  %v5807_v5 = vadd.f32 %v1406_v41, %v5682_v11  ;;  %v4688_v9 = vld [vmem:[#allocation3 + $0xd0] ss:$8 sps:$4 sm:$0xff]   ;;  %2636 = vmatprep.subr.bf16.mxu0 %v4690_v8  ;;  %3480 = vmatprep.subr.bf16.mxu1 %v4690_v8 }
 0x19e   :  { %v5810_v19 = vadd.f32 %v1407_v1, %v5686_v12  ;;  %2637 = vmatpush1.bf16.msra.mxu0 %v4688_v9  ;;  %3481 = vmatpush1.bf16.msra.mxu1 %v4688_v9 }
 0x19f   :  { %v1308_v22 = vpop.f32.mrb[44].mxu0  ;;  %v5812_v40 = vpop.f32.mrb[44].mxu1  ;;  %2638 = vmatprep.subr.bf16.mxu0 %v4693_v46  ;;  %3482 = vmatprep.subr.bf16.mxu1 %v4693_v46 }
 0x1a0   :  { %v1310_v25 = vpop.f32.mrb[45].mxu0  ;;  %v5814_v42 = vpop.f32.mrb[45].mxu1  ;;  %v1408_v11 = vrot.slane %v1308_v22, 2 }
 0x1a1   :  { %v1312_v39 = vpop.f32.mrb[46].mxu0  ;;  %v5816_v47 = vpop.f32.mrb[46].mxu1  ;;  %v1411_v62 = vrot.slane %v1310_v25, 2 }
 0x1a2   :  { %v1409_v59 = vrot.slane %v1312_v39, 2  ;;  %v1314_v16 = vpop.f32.mrb[47].mxu0  ;;  %v5818_v12 = vpop.f32.mrb[47].mxu1  ;;  %2639 = vmatpush1.bf16.msra.mxu0 %v4691_v58  ;;  %3483 = vmatpush1.bf16.msra.mxu1 %v4691_v58 }
 0x1a3   :  { %v1412_v41 = vrot.slane %v1314_v16, 2 }
 0x1a4   :  { %v1410_v51 = vsel %vm1389_vm1, %v1408_v11, %v1409_v59  ;;  %v5822_v54 = vadd.f32 %v1409_v59, %v5689_v28  ;;  %v4696_v28 = vld [vmem:[#allocation3 + $0xf4] ss:$8 sps:$4 sm:$0xff]  }
 0x1a5   :  { %v5825_v1 = vadd.f32 %v1410_v51, %v5693_v31  ;;  %v1413_v22 = vsel %vm1389_vm1, %v1411_v62, %v1412_v41  ;;  %v5829_v8 = vadd.f32 %v1412_v41, %v5696_v34  ;;  %v4694_v31 = vld [vmem:[#allocation3 + $0xf0] ss:$8 sps:$4 sm:$0xff]   ;;  %2640 = vmatprep.subr.bf16.mxu0 %v4696_v28  ;;  %3484 = vmatprep.subr.bf16.mxu1 %v4696_v28 }
 0x1a6   :  { %v5832_v25 = vadd.f32 %v1413_v22, %v5700_v35  ;;  %2641 = vmatpush1.bf16.msra.mxu0 %v4694_v31  ;;  %3485 = vmatpush1.bf16.msra.mxu1 %v4694_v31 }
 0x1a7   :  { %v1318_v9 = vpop.f32.mrb[48].mxu0  ;;  %v5834_v39 = vpop.f32.mrb[48].mxu1 }
 0x1a8   :  { %6223 = vst [vmem:[#allocation6_spill] sm:$0xff] %v5834_v39  ;;  %v1320_v11 = vpop.f32.mrb[49].mxu0  ;;  %v5836_v59 = vpop.f32.mrb[49].mxu1  ;;  %v1414_v34 = vrot.slane %v1318_v9, 2 }
 0x1a9   :  { %6224 = vst [vmem:[#allocation7_spill] sm:$0xff] %v5836_v59  ;;  %v1322_v16 = vpop.f32.mrb[50].mxu0  ;;  %v5838_v62 = vpop.f32.mrb[50].mxu1  ;;  %v1417_v51 = vrot.slane %v1320_v11, 2 }
 0x1aa   :  { %v1415_v41 = vrot.slane %v1322_v16, 2  ;;  %v1324_v46 = vpop.f32.mrb[51].mxu0  ;;  %v5840_v35 = vpop.f32.mrb[51].mxu1 }
 0x1ab   :  { %v1418_v58 = vrot.slane %v1324_v46, 2 }
 0x1ac   :  { %v1416_v22 = vsel %vm1389_vm1, %v1414_v34, %v1415_v41  ;;  %v5844_v30 = vadd.f32 %v1415_v41, %v5703_v63 }
 0x1ad   :  { %v5847_v59 = vadd.f32 %v1416_v22, %v5707_v33  ;;  %v1419_v39 = vsel %vm1389_vm1, %v1417_v51, %v1418_v58  ;;  %v5851_v9 = vadd.f32 %v1418_v58, %v5710_v38 }
 0x1ae   :  { %v5854_v28 = vadd.f32 %v1419_v39, %v5714_v45 }
 0x1af   :  { %6225 = vst [vmem:[#allocation8_spill] sm:$0xff] %v5847_v59  ;;  %v1328_v16 = vpop.f32.mrb[52].mxu0  ;;  %v5856_v31 = vpop.f32.mrb[52].mxu1 }
 0x1b0   :  { %6226 = vst [vmem:[#allocation9_spill] sm:$0xff] %v5856_v31  ;;  %v1330_v11 = vpop.f32.mrb[53].mxu0  ;;  %v5858_v46 = vpop.f32.mrb[53].mxu1  ;;  %v1420_v41 = vrot.slane %v1328_v16, 2 }
 0x1b1   :  { %6227 = vst [vmem:[#allocation10_spill] sm:$0xff] %v5858_v46  ;;  %v1332_v34 = vpop.f32.mrb[54].mxu0  ;;  %v5860_v63 = vpop.f32.mrb[54].mxu1  ;;  %v1423_v51 = vrot.slane %v1330_v11, 2 }
 0x1b2   :  { %v1421_v33 = vrot.slane %v1332_v34, 2  ;;  %v1334_v22 = vpop.f32.mrb[55].mxu0  ;;  %v5862_v59 = vpop.f32.mrb[55].mxu1 }
 0x1b3   :  { %6228 = vst [vmem:[#allocation11_spill] sm:$0xff] %v5862_v59  ;;  %v1424_v38 = vrot.slane %v1334_v22, 2 }
 0x1b4   :  { %v1422_v58 = vsel %vm1389_vm1, %v1420_v41, %v1421_v33  ;;  %v5866_v45 = vadd.f32 %v1421_v33, %v5717_v7 }
 0x1b5   :  { %v5869_v39 = vadd.f32 %v1422_v58, %v5719_v10  ;;  %v1425_v46 = vsel %vm1389_vm1, %v1423_v51, %v1424_v38  ;;  %v5873_v31 = vadd.f32 %v1424_v38, %v5722_v14 }
 0x1b6   :  { %v5876_v16 = vadd.f32 %v1425_v46, %v5724_v15 }
 0x1b7   :  { %6229 = vst [vmem:[#allocation12_spill] sm:$0xff] %v5869_v39  ;;  %v1338_v34 = vpop.f32.mrb[56].mxu0  ;;  %v5878_v59 = vpop.f32.mrb[56].mxu1 }
 0x1b8   :  { %6230 = vst [vmem:[#allocation13_spill] sm:$0xff] %v5878_v59  ;;  %v1340_v11 = vpop.f32.mrb[57].mxu0  ;;  %v5880_v22 = vpop.f32.mrb[57].mxu1  ;;  %v1426_v33 = vrot.slane %v1338_v34, 2 }
 0x1b9   :  { %6231 = vst [vmem:[#allocation14_spill] sm:$0xff] %v5880_v22  ;;  %v1342_v41 = vpop.f32.mrb[58].mxu0  ;;  %v5882_v7 = vpop.f32.mrb[58].mxu1  ;;  %v1429_v51 = vrot.slane %v1340_v11, 2 }
 0x1ba   :  { %v1427_v10 = vrot.slane %v1342_v41, 2  ;;  %v1344_v58 = vpop.f32.mrb[59].mxu0  ;;  %v5884_v39 = vpop.f32.mrb[59].mxu1 }
 0x1bb   :  { %6232 = vst [vmem:[#allocation15_spill] sm:$0xff] %v5884_v39  ;;  %v1430_v14 = vrot.slane %v1344_v58, 2 }
 0x1bc   :  { %v1428_v38 = vsel %vm1389_vm1, %v1426_v33, %v1427_v10  ;;  %v5888_v15 = vadd.f32 %v1427_v10, %v5727_v44 }
 0x1bd   :  { %v5891_v46 = vadd.f32 %v1428_v38, %v5729_v50  ;;  %v1431_v22 = vsel %vm1389_vm1, %v1429_v51, %v1430_v14  ;;  %v5895_v59 = vadd.f32 %v1430_v14, %v5732_v53 }
 0x1be   :  { %v5898_v34 = vadd.f32 %v1431_v22, %v5734_v55 }
 0x1bf   :  { %6233 = vst [vmem:[#allocation16_spill] sm:$0xff] %v5891_v46  ;;  %6234 = vst [vmem:[#allocation17_spill] sm:$0xff] %v5895_v59  ;;  %v1348_v41 = vpop.f32.mrb[60].mxu0  ;;  %v5900_v39 = vpop.f32.mrb[60].mxu1 }
 0x1c0   :  { %6235 = vst [vmem:[#allocation18_spill] sm:$0xff] %v5898_v34  ;;  %6236 = vst [vmem:[#allocation19_spill] sm:$0xff] %v5900_v39  ;;  %v1350_v11 = vpop.f32.mrb[61].mxu0  ;;  %v5902_v58 = vpop.f32.mrb[61].mxu1  ;;  %v1432_v10 = vrot.slane %v1348_v41, 2 }
 0x1c1   :  { %6237 = vst [vmem:[#allocation20_spill] sm:$0xff] %v5902_v58  ;;  %v1352_v33 = vpop.f32.mrb[62].mxu0  ;;  %v5904_v44 = vpop.f32.mrb[62].mxu1  ;;  %v1435_v51 = vrot.slane %v1350_v11, 2 }
 0x1c2   :  { %6238 = vst [vmem:[#allocation21_spill] sm:$0xff] %v5904_v44  ;;  %v1433_v50 = vrot.slane %v1352_v33, 2  ;;  %v1354_v38 = vpop.f32.mrb[63].mxu0  ;;  %v5906_v46 = vpop.f32.mrb[63].mxu1  ;;  %v4699_v33 = vld [vmem:[#allocation3 + $0x4] ss:$8 sps:$4 sm:$0xff]  }
 0x1c3   :  { %6239 = vst [vmem:[#allocation22_spill] sm:$0xff] %v5906_v46  ;;  %v1436_v53 = vrot.slane %v1354_v38, 2  ;;  %2779 = vmatprep.subr.bf16.mxu0 %v4699_v33  ;;  %3543 = vmatprep.subr.bf16.mxu1 %v4699_v33 }
 0x1c4   :  { %v1434_v14 = vsel %vm1389_vm1, %v1432_v10, %v1433_v50  ;;  %v5910_v55 = vadd.f32 %v1433_v50, %v5737_v2 }
 0x1c5   :  { %v5913_v22 = vadd.f32 %v1434_v14, %v5739_v29  ;;  %v1437_v58 = vsel %vm1389_vm1, %v1435_v51, %v1436_v53  ;;  %v5917_v39 = vadd.f32 %v1436_v53, %v5742_v3 }
 0x1c6   :  { %6240 = vst [vmem:[#allocation23_spill] sm:$0xff] %v5910_v55  ;;  %v5920_v41 = vadd.f32 %v1437_v58, %v5744_v4 }
 0x1c7   :  { %6241 = vst [vmem:[#allocation24_spill] sm:$0xff] %v5913_v22  ;;  %6242 = vst [vmem:[#allocation25_spill] sm:$0xff] %v5917_v39 }
 0x1c8   :  { %6243 = vst [vmem:[#allocation26_spill] sm:$0xff] %v5920_v41 }
 0x207   :  { %v1762_v11 = vpop.f32.mrb[64].mxu0  ;;  %v2132_v38 = vpop.f32.mrb[64].mxu1 }
 0x208   :  { %v1764_v10 = vpop.f32.mrb[65].mxu0  ;;  %v2134_v46 = vpop.f32.mrb[65].mxu1  ;;  %v1873_v55 = vrot.slane %v1762_v11, 1  ;;  %v2243_v29 = vrot.slane %v2132_v38, 2 }
 0x209   :  { %v1766_v2 = vpop.f32.mrb[66].mxu0  ;;  %v2136_v50 = vpop.f32.mrb[66].mxu1  ;;  %v1876_v3 = vrot.slane %v1764_v10, 1  ;;  %v2246_v53 = vrot.slane %v2134_v46, 2 }
 0x20a   :  { %v1874_v14 = vrot.slane %v1766_v2, 1  ;;  %v2244_v22 = vrot.slane %v2136_v50, 2  ;;  %v1768_v51 = vpop.f32.mrb[67].mxu0  ;;  %v2138_v44 = vpop.f32.mrb[67].mxu1 }
 0x20b   :  { %v1877_v39 = vrot.slane %v1768_v51, 1  ;;  %v2247_v4 = vrot.slane %v2138_v44, 2 }
 0x20c   :  { %v1875_v58 = vsel %vm1034_vm0, %v1873_v55, %v1874_v14  ;;  %v1955_v33 = vadd.f32 %v1874_v14, %v5750_v20  ;;  %v2245_v41 = vsel %vm1389_vm1, %v2243_v29, %v2244_v22 }
 0x20d   :  { %v1953_v34 = vadd.f32 %v1875_v58, %v5746_v6  ;;  %v1878_v59 = vsel %vm1034_vm0, %v1876_v3, %v1877_v39  ;;  %v1956_v11 = vadd.f32 %v1877_v39, %v5752_v23  ;;  %v2248_v38 = vsel %vm1389_vm1, %v2246_v53, %v2247_v4  ;;  %v5936_v23 = vld [vmem:[%s6164_s2] ss:$0 sm:$0xff] }
 0x20e   :  { %v2325_v2 = vadd.f32 %v2244_v22, %v1955_v33  ;;  %v1954_v10 = vadd.f32 %v1878_v59, %v5748_v18 }
 0x20f   :  { %v2323_v46 = vadd.f32 %v2245_v41, %v1953_v34  ;;  %v2326_v50 = vadd.f32 %v2247_v4, %v1956_v11  ;;  %v1772_v44 = vpop.f32.mrb[68].mxu0  ;;  %v2142_v51 = vpop.f32.mrb[68].mxu1 }
 0x210   :  { %v2357_v55 = vmax.f32 %v5756_v17, %v2325_v2  ;;  %v2324_v20 = vadd.f32 %v2248_v38, %v1954_v10  ;;  %v1774_v14 = vpop.f32.mrb[69].mxu0  ;;  %v2144_v29 = vpop.f32.mrb[69].mxu1  ;;  %v1879_v39 = vrot.slane %v1772_v44, 1  ;;  %v2249_v18 = vrot.slane %v2142_v51, 2 }
 0x211   :  { %v2355_v6 = vmax.f32 %v5759_v37, %v2323_v46  ;;  %v2358_v3 = vmax.f32 %v5763_v52, %v2326_v50  ;;  %v1776_v59 = vpop.f32.mrb[70].mxu0  ;;  %v2146_v34 = vpop.f32.mrb[70].mxu1  ;;  %v1882_v41 = vrot.slane %v1774_v14, 1  ;;  %v2252_v37 = vrot.slane %v2144_v29, 2 }
 0x212   :  { %v2356_v22 = vmax.f32 %v5766_v27, %v2324_v20  ;;  %v1880_v17 = vrot.slane %v1776_v59, 1  ;;  %v2250_v53 = vrot.slane %v2146_v34, 2  ;;  %v1778_v4 = vpop.f32.mrb[71].mxu0  ;;  %v2148_v58 = vpop.f32.mrb[71].mxu1 }
 0x213   :  { %v2388_v33 = vmax.f32 %v2357_v55, %v2358_v3  ;;  %v1883_v11 = vrot.slane %v1778_v4, 1  ;;  %v2253_v52 = vrot.slane %v2148_v58, 2 }
 0x214   :  { %v2387_v38 = vmax.f32 %v2355_v6, %v2356_v22  ;;  %v1881_v2 = vsel %vm1034_vm0, %v1879_v39, %v1880_v17  ;;  %v1959_v10 = vadd.f32 %v1880_v17, %v5772_v43  ;;  %v2251_v46 = vsel %vm1389_vm1, %v2249_v18, %v2250_v53 }
 0x215   :  { %v2411_v50 = vadd.f32 %v5936_v23, %v2388_v33  ;;  %v1957_v27 = vadd.f32 %v1881_v2, %v5768_v61  ;;  %v1884_v44 = vsel %vm1034_vm0, %v1882_v41, %v1883_v11  ;;  %v1960_v51 = vadd.f32 %v1883_v11, %v5774_v48 }
 0x216   :  { %v2410_v55 = vadd.f32 %v5936_v23, %v2387_v38  ;;  %v2329_v20 = vadd.f32 %v2250_v53, %v1959_v10  ;;  %v1958_v14 = vadd.f32 %v1884_v44, %v5770_v36  ;;  %v2254_v29 = vsel %vm1389_vm1, %v2252_v37, %v2253_v52 }
 0x217   :  { %v2427_v6 = vmax.f32 %v2411_v50, 0.0  ;;  %v2327_v3 = vadd.f32 %v2251_v46, %v1957_v27  ;;  %v2330_v43 = vadd.f32 %v2253_v52, %v1960_v51  ;;  %v1782_v39 = vpop.f32.mrb[72].mxu0  ;;  %v2152_v18 = vpop.f32.mrb[72].mxu1 }
 0x218   :  { %v2426_v59 = vmax.f32 %v2410_v55, 0.0  ;;  %v2361_v34 = vmax.f32 %v5778_v60, %v2329_v20  ;;  %v2328_v61 = vadd.f32 %v2254_v29, %v1958_v14  ;;  %v1784_v22 = vpop.f32.mrb[73].mxu0  ;;  %v2154_v41 = vpop.f32.mrb[73].mxu1  ;;  %v1885_v53 = vrot.slane %v1782_v39, 1 }
 0x219   :  { %2443 = vst [vmem:[#allocation2 + $0x8] sm:$0x3f] %v2427_v6  ;;  %v2359_v48 = vmax.f32 %v5781_v13, %v2327_v3  ;;  %v2362_v17 = vmax.f32 %v5785_v21, %v2330_v43  ;;  %v2255_v36 = vrot.slane %v2152_v18, 2  ;;  %v1786_v4 = vpop.f32.mrb[74].mxu0  ;;  %v2156_v58 = vpop.f32.mrb[74].mxu1  ;;  %v1888_v37 = vrot.slane %v1784_v22, 1 }
 0x21a   :  { %2442 = vst [vmem:[#allocation2] sm:$0xff] %v2426_v59  ;;  %v2360_v33 = vmax.f32 %v5788_v32, %v2328_v61  ;;  %v1886_v11 = vrot.slane %v1786_v4, 1  ;;  %v2256_v52 = vrot.slane %v2156_v58, 2  ;;  %v1788_v38 = vpop.f32.mrb[75].mxu0  ;;  %v2158_v60 = vpop.f32.mrb[75].mxu1  ;;  %v2258_v10 = vrot.slane %v2154_v41, 2 }
 0x21b   :  { %v2390_v2 = vmax.f32 %v2361_v34, %v2362_v17  ;;  %v1889_v46 = vrot.slane %v1788_v38, 1  ;;  %v2259_v50 = vrot.slane %v2158_v60, 2 }
 0x21c   :  { %v2389_v27 = vmax.f32 %v2359_v48, %v2360_v33  ;;  %v1887_v13 = vsel %vm1034_vm0, %v1885_v53, %v1886_v11  ;;  %v1963_v21 = vadd.f32 %v1886_v11, %v5794_v57  ;;  %v2257_v44 = vsel %vm1389_vm1, %v2255_v36, %v2256_v52 }
 0x21d   :  { %v2413_v51 = vadd.f32 %v5936_v23, %v2390_v2  ;;  %v1961_v32 = vadd.f32 %v1887_v13, %v5790_v24  ;;  %v1890_v55 = vsel %vm1034_vm0, %v1888_v37, %v1889_v46  ;;  %v1964_v20 = vadd.f32 %v1889_v46, %v5796_v49 }
 0x21e   :  { %v2412_v14 = vadd.f32 %v5936_v23, %v2389_v27  ;;  %v2333_v29 = vadd.f32 %v2256_v52, %v1963_v21  ;;  %v1962_v6 = vadd.f32 %v1890_v55, %v5792_v26  ;;  %v2260_v3 = vsel %vm1389_vm1, %v2258_v10, %v2259_v50 }
 0x21f   :  { %v2429_v43 = vmax.f32 %v2413_v51, 0.0  ;;  %v2331_v39 = vadd.f32 %v2257_v44, %v1961_v32  ;;  %v2334_v57 = vadd.f32 %v2259_v50, %v1964_v20  ;;  %v1792_v18 = vpop.f32.mrb[76].mxu0  ;;  %v2162_v59 = vpop.f32.mrb[76].mxu1 }
 0x220   :  { %v2428_v34 = vmax.f32 %v2412_v14, 0.0  ;;  %v2365_v61 = vmax.f32 %v5800_v56, %v2333_v29  ;;  %v2332_v24 = vadd.f32 %v2260_v3, %v1962_v6  ;;  %v1794_v22 = vpop.f32.mrb[77].mxu0  ;;  %v2164_v41 = vpop.f32.mrb[77].mxu1  ;;  %v1891_v17 = vrot.slane %v1792_v18, 1 }
 0x221   :  { %2445 = vst [vmem:[#allocation2 + $0x20] sm:$0x3f] %v2429_v43  ;;  %v2363_v49 = vmax.f32 %v5803_v0, %v2331_v39  ;;  %v2366_v48 = vmax.f32 %v5807_v5, %v2334_v57  ;;  %v2261_v26 = vrot.slane %v2162_v59, 2  ;;  %v1796_v53 = vpop.f32.mrb[78].mxu0  ;;  %v2166_v36 = vpop.f32.mrb[78].mxu1  ;;  %v1894_v58 = vrot.slane %v1794_v22, 1 }
 0x222   :  { %2444 = vst [vmem:[#allocation2 + $0x18] sm:$0xff] %v2428_v34  ;;  %v2364_v4 = vmax.f32 %v5810_v19, %v2332_v24  ;;  %v1892_v33 = vrot.slane %v1796_v53, 1  ;;  %v2262_v37 = vrot.slane %v2166_v36, 2  ;;  %v1798_v11 = vpop.f32.mrb[79].mxu0  ;;  %v2168_v56 = vpop.f32.mrb[79].mxu1  ;;  %v2264_v38 = vrot.slane %v2164_v41, 2 }
 0x223   :  { %v2392_v52 = vmax.f32 %v2365_v61, %v2366_v48  ;;  %v1895_v60 = vrot.slane %v1798_v11, 1  ;;  %v2265_v2 = vrot.slane %v2168_v56, 2 }
 0x224   :  { %v2391_v10 = vmax.f32 %v2363_v49, %v2364_v4  ;;  %v1893_v0 = vsel %vm1034_vm0, %v1891_v17, %v1892_v33  ;;  %v1967_v5 = vadd.f32 %v1892_v33, %v5816_v47  ;;  %v2263_v46 = vsel %vm1389_vm1, %v2261_v26, %v2262_v37 }
 0x225   :  { %v2415_v50 = vadd.f32 %v5936_v23, %v2392_v52  ;;  %v1965_v19 = vadd.f32 %v1893_v0, %v5812_v40  ;;  %v1896_v27 = vsel %vm1034_vm0, %v1894_v58, %v1895_v60  ;;  %v1968_v13 = vadd.f32 %v1895_v60, %v5818_v12  ;;  %v2510_v12 = vld [vmem:[#allocation2 + $0x1] ss:$2 sm:$0xff] }
 0x226   :  { %v2414_v21 = vadd.f32 %v5936_v23, %v2391_v10  ;;  %v2337_v44 = vadd.f32 %v2262_v37, %v1967_v5  ;;  %v1966_v51 = vadd.f32 %v1896_v27, %v5814_v42  ;;  %v2266_v32 = vsel %vm1389_vm1, %v2264_v38, %v2265_v2  ;;  %v6244_v38 = vld [vmem:[#allocation6_spill] sm:$0xff] }
 0x227   :  { %v2431_v55 = vmax.f32 %v2415_v50, 0.0  ;;  %v2335_v20 = vadd.f32 %v2263_v46, %v1965_v19  ;;  %v2338_v47 = vadd.f32 %v2265_v2, %v1968_v13  ;;  %v1802_v14 = vpop.f32.mrb[80].mxu0  ;;  %v2172_v29 = vpop.f32.mrb[80].mxu1  ;;  %v6245_v46 = vld [vmem:[#allocation7_spill] sm:$0xff]  ;;  %v6246_v27 = vmov 0  }
 0x228   :  { %v2430_v6 = vmax.f32 %v2414_v21, 0.0  ;;  %v2369_v3 = vmax.f32 %v5822_v54, %v2337_v44  ;;  %v2336_v40 = vadd.f32 %v2266_v32, %v1966_v51  ;;  %v1897_v43 = vrot.slane %v1802_v14, 1  ;;  %v1804_v39 = vpop.f32.mrb[81].mxu0  ;;  %v2174_v57 = vpop.f32.mrb[81].mxu1  ;;  %v2853_v19 = vld [vmem:[#allocation2 + $0x2] ss:$2 sm:$0xff] }
 0x229   :  { %2447 = vst [vmem:[#allocation2 + $0x38] sm:$0x3f] %v2431_v55  ;;  %v2367_v18 = vmax.f32 %v5825_v1, %v2335_v20  ;;  %v2370_v42 = vmax.f32 %v5829_v8, %v2338_v47  ;;  %v2267_v59 = vrot.slane %v2172_v29, 2  ;;  %v1900_v34 = vrot.slane %v1804_v39, 1  ;;  %v1806_v61 = vpop.f32.mrb[82].mxu0  ;;  %v2176_v24 = vpop.f32.mrb[82].mxu1 }
 0x22a   :  { %v2512_v22 = vld [vmem:[#allocation2 + $0x19] ss:$2 sm:$0xff]  ;;  %2446 = vst [vmem:[#allocation2 + $0x30] sm:$0xff] %v2430_v6  ;;  %v2368_v41 = vmax.f32 %v5832_v25, %v2336_v40  ;;  %v2270_v49 = vrot.slane %v2174_v57, 2  ;;  %v1898_v54 = vrot.slane %v1806_v61, 1  ;;  %v2268_v48 = vrot.slane %v2176_v24, 2 }
 0x22b   :  { %v1808_v17 = vpop.f32.mrb[83].mxu0  ;;  %v2178_v26 = vpop.f32.mrb[83].mxu1  ;;  %v2394_v53 = vmax.f32 %v2369_v3, %v2370_v42  ;;  %v5981_v58 = vpack.c.bf16 %v2512_v22, %v2510_v12  ;;  %v4697_v1 = vld [vmem:[#allocation3] ss:$8 sps:$4 sm:$0xff]   ;;  %v4702_v25 = vld [vmem:[#allocation3 + $0x14] ss:$8 sps:$4 sm:$0xff]  }
 0x22c   :  { %v1901_v36 = vrot.slane %v1808_v17, 1  ;;  %v2271_v4 = vrot.slane %v2178_v26, 2  ;;  %v2393_v8 = vmax.f32 %v2367_v18, %v2368_v41  ;;  %v1899_v33 = vsel %vm1034_vm0, %v1897_v43, %v1898_v54  ;;  %v2855_v56 = vld [vmem:[#allocation2 + $0x1a] ss:$2 sm:$0xff]  ;;  %v6247_v40 = vld [vmem:[#allocation8_spill] sm:$0xff] }
 0x22d   :  { %v1971_v37 = vadd.f32 %v1898_v54, %v5838_v62  ;;  %v2269_v11 = vsel %vm1389_vm1, %v2267_v59, %v2268_v48  ;;  %v2417_v52 = vadd.f32 %v5936_v23, %v2394_v53  ;;  %v1969_v60 = vadd.f32 %v1899_v33, %v6244_v38  ;;  %2659 = vmatmul.mubr.bf16.vlgmr.msra.gmra.mrb[96].mxu0 %v5981_v58  ;;  %v4705_v3 = vld [vmem:[#allocation3 + $0x24] ss:$8 sps:$4 sm:$0xff]  }
 0x22e   :  { %v1902_v2 = vsel %vm1034_vm0, %v1900_v34, %v1901_v36  ;;  %v1972_v10 = vadd.f32 %v1901_v36, %v5840_v35  ;;  %v2416_v0 = vadd.f32 %v5936_v23, %v2393_v8  ;;  %v2272_v62 = vsel %vm1389_vm1, %v2270_v49, %v2271_v4  ;;  %2668 = vmatprep.mubr.bf16.mxu0 %v6246_v27  ;;  %v4700_v35 = vld [vmem:[#allocation3 + $0x10] ss:$8 sps:$4 sm:$0xff]   ;;  %v4708_v36 = vld [vmem:[#allocation3 + $0x34] ss:$8 sps:$4 sm:$0xff]  }
 0x22f   :  { %v2341_v5 = vadd.f32 %v2268_v48, %v1971_v37  ;;  %v1970_v50 = vadd.f32 %v1902_v2, %v6245_v46  ;;  %v2433_v13 = vmax.f32 %v2417_v52, 0.0  ;;  %v2339_v21 = vadd.f32 %v2269_v11, %v1969_v60  ;;  %v1812_v32 = vpop.f32.mrb[84].mxu0  ;;  %v2182_v55 = vpop.f32.mrb[84].mxu1  ;;  %2780 = vmatpush1.bf16.msra.mxu0 %v4697_v1  ;;  %v4703_v48 = vld [vmem:[#allocation3 + $0x20] ss:$8 sps:$4 sm:$0xff]   ;;  %v6248_v8 = vld [vmem:[#allocation9_spill] sm:$0xff] }
 0x230   :  { %v2342_v44 = vadd.f32 %v2271_v4, %v1972_v10  ;;  %v5995_v51 = vpack.c.bf16 %v2855_v56, %v2853_v19  ;;  %v2432_v20 = vmax.f32 %v2416_v0, 0.0  ;;  %v1814_v29 = vpop.f32.mrb[85].mxu0  ;;  %v2184_v6 = vpop.f32.mrb[85].mxu1  ;;  %2781 = vmatprep.subr.bf16.mxu0 %v4702_v25  ;;  %v1903_v57 = vrot.slane %v1812_v32, 1  ;;  %v6249_v37 = vld [vmem:[#allocation11_spill] sm:$0xff]  ;;  %v6250_v52 = vld [vmem:[#allocation10_spill] sm:$0xff] }
 0x231   :  { %v2373_v47 = vmax.f32 %v5844_v30, %v2341_v5  ;;  %v2340_v14 = vadd.f32 %v2272_v62, %v1970_v50  ;;  %2449 = vst [vmem:[#allocation2 + $0x50] sm:$0x3f] %v2433_v13  ;;  %v2371_v43 = vmax.f32 %v6247_v40, %v2339_v21  ;;  %v2273_v12 = vrot.slane %v2182_v55, 2  ;;  %v1816_v18 = vpop.f32.mrb[86].mxu0  ;;  %v2186_v42 = vpop.f32.mrb[86].mxu1 }
 0x232   :  { %v2374_v39 = vmax.f32 %v5851_v9, %v2342_v44  ;;  %3503 = vmatmul.mubr.bf16.vlgmr.msra.gmra.mrb[96].mxu1 %v5995_v51  ;;  %2448 = vst [vmem:[#allocation2 + $0x48] sm:$0xff] %v2432_v20  ;;  %v1906_v30 = vrot.slane %v1814_v29, 1  ;;  %v1904_v34 = vrot.slane %v1816_v18, 1  ;;  %v2274_v61 = vrot.slane %v2186_v42, 2  ;;  %v1818_v24 = vpop.f32.mrb[87].mxu0  ;;  %v2188_v22 = vpop.f32.mrb[87].mxu1 }
 0x233   :  { %v2372_v59 = vmax.f32 %v5854_v28, %v2340_v14  ;;  %3512 = vmatprep.mubr.bf16.mxu1 %v6246_v27  ;;  %3544 = vmatpush1.bf16.msra.mxu1 %v4697_v1  ;;  %v2276_v49 = vrot.slane %v2184_v6, 2  ;;  %v1907_v9 = vrot.slane %v1818_v24, 1  ;;  %v2277_v54 = vrot.slane %v2188_v22, 2  ;;  %v6015_v50 = vld [vmem:[#allocation3 + $0x44] ss:$8 sps:$4 sm:$0xff]  }
 0x234   :  { %v2396_v41 = vmax.f32 %v2373_v47, %v2374_v39  ;;  %3545 = vmatprep.subr.bf16.mxu1 %v4702_v25  ;;  %2782 = vmatpush1.bf16.msra.mxu0 %v4700_v35  ;;  %v1905_v26 = vsel %vm1034_vm0, %v1903_v57, %v1904_v34  ;;  %v1975_v28 = vadd.f32 %v1904_v34, %v5860_v63  ;;  %v6013_v63 = vld [vmem:[#allocation3 + $0x30] ss:$8 sps:$4 sm:$0xff]  }
 0x235   :  { %v2395_v17 = vmax.f32 %v2371_v43, %v2372_v59  ;;  %v2275_v53 = vsel %vm1389_vm1, %v2273_v12, %v2274_v61  ;;  %2783 = vmatprep.subr.bf16.mxu0 %v4705_v3  ;;  %v1973_v1 = vadd.f32 %v1905_v26, %v6248_v8  ;;  %v1908_v33 = vsel %vm1034_vm0, %v1906_v30, %v1907_v9  ;;  %v2514_v55 = vld [vmem:[#allocation2 + $0x31] ss:$2 sm:$0xff]  ;;  %v6253_v26 = vld [vmem:[#allocation15_spill] sm:$0xff] }
 0x236   :  { %v2419_v4 = vadd.f32 %v5936_v23, %v2396_v41  ;;  %v1976_v11 = vadd.f32 %v1907_v9, %v6249_v37  ;;  %v2345_v25 = vadd.f32 %v2274_v61, %v1975_v28  ;;  %v1974_v38 = vadd.f32 %v1908_v33, %v6250_v52 }
 0x237   :  { %v2418_v56 = vadd.f32 %v5936_v23, %v2395_v17  ;;  %v2278_v60 = vsel %vm1389_vm1, %v2276_v49, %v2277_v54  ;;  %3546 = vmatpush1.bf16.msra.mxu1 %v4700_v35  ;;  %v2343_v10 = vadd.f32 %v2275_v53, %v1973_v1  ;;  %v1822_v5 = vpop.f32.mrb[88].mxu0  ;;  %v2192_v46 = vpop.f32.mrb[88].mxu1  ;;  %v6251_v35 = vld [vmem:[#allocation12_spill] sm:$0xff] }
 0x238   :  { %v2435_v2 = vmax.f32 %v2419_v4, 0.0  ;;  %v2346_v0 = vadd.f32 %v2277_v54, %v1976_v11  ;;  %3547 = vmatprep.subr.bf16.mxu1 %v4705_v3  ;;  %2784 = vmatpush1.bf16.msra.mxu0 %v4703_v48  ;;  %v2377_v19 = vmax.f32 %v5866_v45, %v2345_v25  ;;  %v2344_v13 = vadd.f32 %v2278_v60, %v1974_v38  ;;  %v1824_v44 = vpop.f32.mrb[89].mxu0  ;;  %v2194_v32 = vpop.f32.mrb[89].mxu1  ;;  %v4714_v49 = vld [vmem:[#allocation3 + $0x54] ss:$8 sps:$4 sm:$0xff]  }
 0x239   :  { %v2434_v62 = vmax.f32 %v2418_v56, 0.0  ;;  %v1909_v21 = vrot.slane %v1822_v5, 1  ;;  %2785 = vmatprep.subr.bf16.mxu0 %v4708_v36  ;;  %v2375_v20 = vmax.f32 %v6251_v35, %v2343_v10  ;;  %v2279_v14 = vrot.slane %v2192_v46, 2  ;;  %v1826_v6 = vpop.f32.mrb[90].mxu0  ;;  %v2196_v3 = vpop.f32.mrb[90].mxu1  ;;  %v6252_v54 = vld [vmem:[#allocation13_spill] sm:$0xff] }
 0x23a   :  { %2451 = vst [vmem:[#allocation2 + $0x68] sm:$0x3f] %v2435_v2  ;;  %v2378_v47 = vmax.f32 %v5873_v31, %v2346_v0  ;;  %v1912_v29 = vrot.slane %v1824_v44, 1  ;;  %v2516_v40 = vld [vmem:[#allocation2 + $0x49] ss:$2 sm:$0xff]  ;;  %v2376_v43 = vmax.f32 %v5876_v16, %v2344_v13  ;;  %v2282_v45 = vrot.slane %v2194_v32, 2 }
 0x23b   :  { %2450 = vst [vmem:[#allocation2 + $0x60] sm:$0xff] %v2434_v62  ;;  %v1910_v39 = vrot.slane %v1826_v6, 1  ;;  %v2280_v57 = vrot.slane %v2196_v3, 2  ;;  %v1828_v12 = vpop.f32.mrb[91].mxu0  ;;  %v2198_v18 = vpop.f32.mrb[91].mxu1  ;;  %3548 = vmatpush1.bf16.msra.mxu1 %v4703_v48  ;;  %v6021_v34 = vpack.c.bf16 %v2516_v40, %v2514_v55  ;;  %v6255_v46 = vld [vmem:[#allocation16_spill] sm:$0xff] }
 0x23c   :  { %v2398_v42 = vmax.f32 %v2377_v19, %v2378_v47  ;;  %v1913_v59 = vrot.slane %v1828_v12, 1  ;;  %v2283_v30 = vrot.slane %v2198_v18, 2  ;;  %3549 = vmatprep.subr.bf16.mxu1 %v4708_v36  ;;  %2786 = vmatpush1.bf16.msra.mxu0 %v6013_v63  ;;  %v4709_v31 = vld [vmem:[#allocation3 + $0x40] ss:$8 sps:$4 sm:$0xff]   ;;  %v2397_v61 = vmax.f32 %v2375_v20, %v2376_v43  ;;  %v4712_v38 = vld [vmem:[#allocation3 + $0x50] ss:$8 sps:$4 sm:$0xff]  }
 0x23d   :  { %v1911_v24 = vsel %vm1034_vm0, %v1909_v21, %v1910_v39  ;;  %v1979_v16 = vadd.f32 %v1910_v39, %v5882_v7  ;;  %v2281_v22 = vsel %vm1389_vm1, %v2279_v14, %v2280_v57  ;;  %v2859_v41 = vld [vmem:[#allocation2 + $0x4a] ss:$2 sm:$0xff]  ;;  %2787 = vmatprep.subr.bf16.mxu0 %v6015_v50  ;;  %2669 = vmatmul.mubr.bf16.gmra.mrb[100].mxu0 %v6021_v34  ;;  %v6254_v7 = vld [vmem:[#allocation14_spill] sm:$0xff] }
 0x23e   :  { %v2421_v9 = vadd.f32 %v5936_v23, %v2398_v42  ;;  %v1977_v48 = vadd.f32 %v1911_v24, %v6252_v54  ;;  %v1914_v17 = vsel %vm1034_vm0, %v1912_v29, %v1913_v59  ;;  %v1980_v28 = vadd.f32 %v1913_v59, %v6253_v26  ;;  %v2857_v1 = vld [vmem:[#allocation2 + $0x32] ss:$2 sm:$0xff]  ;;  %2678 = vmatprep.mubr.bf16.mxu0 %v6246_v27  ;;  %v4717_v55 = vld [vmem:[#allocation3 + $0x64] ss:$8 sps:$4 sm:$0xff]  }
 0x23f   :  { %v2420_v53 = vadd.f32 %v5936_v23, %v2397_v61  ;;  %v2349_v36 = vadd.f32 %v2280_v57, %v1979_v16  ;;  %v1978_v4 = vadd.f32 %v1914_v17, %v6254_v7  ;;  %v2284_v8 = vsel %vm1389_vm1, %v2282_v45, %v2283_v30  ;;  %v1832_v25 = vpop.f32.mrb[92].mxu0  ;;  %v2202_v52 = vpop.f32.mrb[92].mxu1  ;;  %3550 = vmatpush1.bf16.msra.mxu1 %v6013_v63  ;;  %v6256_v19 = vld [vmem:[#allocation17_spill] sm:$0xff]  ;;  %v4715_v45 = vld [vmem:[#allocation3 + $0x60] ss:$8 sps:$4 sm:$0xff]   ;;  %v6261_v54 = vld [vmem:[#allocation20_spill] sm:$0xff] }
 0x240   :  { %v2437_v33 = vmax.f32 %v2421_v9, 0.0  ;;  %v2347_v37 = vadd.f32 %v2281_v22, %v1977_v48  ;;  %v2350_v11 = vadd.f32 %v2283_v30, %v1980_v28  ;;  %v6037_v56 = vpack.c.bf16 %v2859_v41, %v2857_v1  ;;  %2788 = vmatpush1.bf16.msra.mxu0 %v4709_v31  ;;  %v1834_v0 = vpop.f32.mrb[93].mxu0  ;;  %v2204_v5 = vpop.f32.mrb[93].mxu1  ;;  %3551 = vmatprep.subr.bf16.mxu1 %v6015_v50  ;;  %v6258_v12 = vld [vmem:[#allocation21_spill] sm:$0xff]  ;;  %v6259_v61 = vld [vmem:[#allocation19_spill] sm:$0xff]  ;;  %v6260_v22 = vld [vmem:[#allocation22_spill] sm:$0xff] }
 0x241   :  { %v2436_v60 = vmax.f32 %v2420_v53, 0.0  ;;  %v2381_v2 = vmax.f32 %v5888_v15, %v2349_v36  ;;  %v2348_v10 = vadd.f32 %v2284_v8, %v1978_v4  ;;  %2789 = vmatprep.subr.bf16.mxu0 %v4714_v49  ;;  %v1915_v21 = vrot.slane %v1832_v25, 1  ;;  %v1836_v44 = vpop.f32.mrb[94].mxu0  ;;  %v2206_v32 = vpop.f32.mrb[94].mxu1  ;;  %v6257_v15 = vld [vmem:[#allocation18_spill] sm:$0xff]  ;;  %v6262_v7 = vld [vmem:[#allocation23_spill] sm:$0xff] }
 0x242   :  { %2453 = vst [vmem:[#allocation2 + $0x80] sm:$0x3f] %v2437_v33  ;;  %v2379_v62 = vmax.f32 %v6255_v46, %v2347_v37  ;;  %v2382_v13 = vmax.f32 %v6256_v19, %v2350_v11  ;;  %3513 = vmatmul.mubr.bf16.gmra.mrb[100].mxu1 %v6037_v56  ;;  %v2285_v63 = vrot.slane %v2202_v52, 2  ;;  %v1918_v20 = vrot.slane %v1834_v0, 1  ;;  %v1838_v50 = vpop.f32.mrb[95].mxu0  ;;  %v2208_v29 = vpop.f32.mrb[95].mxu1 }
 0x243   :  { %2452 = vst [vmem:[#allocation2 + $0x78] sm:$0xff] %v2436_v60  ;;  %v2380_v35 = vmax.f32 %v6257_v15, %v2348_v10  ;;  %v1916_v47 = vrot.slane %v1836_v44, 1  ;;  %v2286_v14 = vrot.slane %v2206_v32, 2  ;;  %3522 = vmatprep.mubr.bf16.mxu1 %v6246_v27  ;;  %v2288_v3 = vrot.slane %v2204_v5, 2  ;;  %3552 = vmatpush1.bf16.msra.mxu1 %v4709_v31  ;;  %v4720_v59 = vld [vmem:[#allocation3 + $0x74] ss:$8 sps:$4 sm:$0xff]  }
 0x244   :  { %v2400_v6 = vmax.f32 %v2381_v2, %v2382_v13  ;;  %v1919_v40 = vrot.slane %v1838_v50, 1  ;;  %v2289_v43 = vrot.slane %v2208_v29, 2  ;;  %2790 = vmatpush1.bf16.msra.mxu0 %v4712_v38  ;;  %3553 = vmatprep.subr.bf16.mxu1 %v4714_v49  ;;  %v4718_v53 = vld [vmem:[#allocation3 + $0x70] ss:$8 sps:$4 sm:$0xff]   ;;  %v2518_v1 = vld [vmem:[#allocation2 + $0x61] ss:$2 sm:$0xff] }
 0x245   :  { %v2399_v39 = vmax.f32 %v2379_v62, %v2380_v35  ;;  %v1917_v57 = vsel %vm1034_vm0, %v1915_v21, %v1916_v47  ;;  %v1983_v18 = vadd.f32 %v1916_v47, %v6258_v12  ;;  %v2287_v42 = vsel %vm1389_vm1, %v2285_v63, %v2286_v14  ;;  %2791 = vmatprep.subr.bf16.mxu0 %v4717_v55  ;;  %v6263_v33 = vld [vmem:[#allocation24_spill] sm:$0xff]  ;;  %v6264_v11 = vld [vmem:[#allocation25_spill] sm:$0xff]  ;;  %v6265_v10 = vld [vmem:[#allocation26_spill] sm:$0xff] }
 0x246   :  { %v2423_v30 = vadd.f32 %v5936_v23, %v2400_v6  ;;  %v1981_v24 = vadd.f32 %v1917_v57, %v6259_v61  ;;  %v1920_v16 = vsel %vm1034_vm0, %v1918_v20, %v1919_v40  ;;  %v1984_v41 = vadd.f32 %v1919_v40, %v6260_v22  ;;  %v2861_v60 = vld [vmem:[#allocation2 + $0x62] ss:$2 sm:$0xff]  ;;  %v4726_v6 = vld [vmem:[#allocation3 + $0x114] ss:$8 sps:$4 sm:$0xff]  }
 0x247   :  { %v2422_v31 = vadd.f32 %v5936_v23, %v2399_v39  ;;  %v2353_v9 = vadd.f32 %v2286_v14, %v1983_v18  ;;  %v1982_v48 = vadd.f32 %v1920_v16, %v6261_v54  ;;  %v2290_v17 = vsel %vm1389_vm1, %v2288_v3, %v2289_v43  ;;  %3554 = vmatpush1.bf16.msra.mxu1 %v4712_v38  ;;  %v4723_v46 = vld [vmem:[#allocation3 + $0x104] ss:$8 sps:$4 sm:$0xff]   ;;  %v4721_v50 = vld [vmem:[#allocation3 + $0x100] ss:$8 sps:$4 sm:$0xff]   ;;  %v4724_v3 = vld [vmem:[#allocation3 + $0x110] ss:$8 sps:$4 sm:$0xff]  }
 0x248   :  { %v2439_v26 = vmax.f32 %v2423_v30, 0.0  ;;  %v2351_v28 = vadd.f32 %v2287_v42, %v1981_v24  ;;  %v2354_v49 = vadd.f32 %v2289_v43, %v1984_v41  ;;  %2792 = vmatpush1.bf16.msra.mxu0 %v4715_v45  ;;  %3555 = vmatprep.subr.bf16.mxu1 %v4717_v55  ;;  %v2474_v14 = vld [vmem:[#allocation2] ss:$2 sm:$0xff]  ;;  %v4732_v12 = vld [vmem:[#allocation3 + $0x134] ss:$8 sps:$4 sm:$0xff]  }
 0x249   :  { %v2438_v36 = vmax.f32 %v2422_v31, 0.0  ;;  %v2385_v4 = vmax.f32 %v6262_v7, %v2353_v9  ;;  %v2352_v8 = vadd.f32 %v2290_v17, %v1982_v48  ;;  %2793 = vmatprep.subr.bf16.mxu0 %v4720_v59  ;;  %v4729_v40 = vld [vmem:[#allocation3 + $0x124] ss:$8 sps:$4 sm:$0xff]   ;;  %v4727_v39 = vld [vmem:[#allocation3 + $0x120] ss:$8 sps:$4 sm:$0xff]  }
 0x24a   :  { %2455 = vst [vmem:[#allocation2 + $0x98] sm:$0x3f] %v2439_v26  ;;  %v2383_v37 = vmax.f32 %v6263_v33, %v2351_v28  ;;  %v2386_v25 = vmax.f32 %v6264_v11, %v2354_v49  ;;  %v2520_v52 = vld [vmem:[#allocation2 + $0x79] ss:$2 sm:$0xff]  ;;  %v2863_v2 = vld [vmem:[#allocation2 + $0x7a] ss:$2 sm:$0xff] }
 0x24b   :  { %2454 = vst [vmem:[#allocation2 + $0x90] sm:$0xff] %v2438_v36  ;;  %v2384_v38 = vmax.f32 %v6265_v10, %v2352_v8  ;;  %v6061_v0 = vpack.c.bf16 %v2520_v52, %v2518_v1  ;;  %v6063_v5 = vpack.c.bf16 %v2863_v2, %v2861_v60  ;;  %3556 = vmatpush1.bf16.msra.mxu1 %v4715_v45  ;;  %v2480_v43 = vld [vmem:[#allocation2 + $0x48] ss:$2 sm:$0xff]  ;;  %v2484_v42 = vld [vmem:[#allocation2 + $0x78] ss:$2 sm:$0xff] }
 0x24c   :  { %v2402_v62 = vmax.f32 %v2385_v4, %v2386_v25  ;;  %2794 = vmatpush1.bf16.msra.mxu0 %v4718_v53  ;;  %3557 = vmatprep.subr.bf16.mxu1 %v4720_v59  ;;  %v2478_v45 = vld [vmem:[#allocation2 + $0x30] ss:$2 sm:$0xff]  ;;  %v4735_v18 = vld [vmem:[#allocation3 + $0x144] ss:$8 sps:$4 sm:$0xff]   ;;  %v4733_v30 = vld [vmem:[#allocation3 + $0x140] ss:$8 sps:$4 sm:$0xff]  }
 0x24d   :  { %v2401_v19 = vmax.f32 %v2383_v37, %v2384_v38  ;;  %2679 = vmatmul.mubr.bf16.gmra.mrb[104].mxu0 %v6061_v0  ;;  %3523 = vmatmul.mubr.bf16.gmra.mrb[104].mxu1 %v6063_v5  ;;  %v2490_v57 = vpack.c.bf16 %v2480_v43, %v2478_v45  ;;  %v2482_v59 = vld [vmem:[#allocation2 + $0x60] ss:$2 sm:$0xff]  ;;  %v4738_v24 = vld [vmem:[#allocation3 + $0x154] ss:$8 sps:$4 sm:$0xff]   ;;  %v4742_v48 = vld [vmem:[#allocation3 + $0x170] ss:$8 sps:$4 sm:$0xff]  }
 0x24e   :  { %v2425_v13 = vadd.f32 %v5936_v23, %v2402_v62  ;;  %2688 = vmatprep.mubr.bf16.mxu0 %v6246_v27  ;;  %3532 = vmatprep.mubr.bf16.mxu1 %v6246_v27  ;;  %v2491_v61 = vpack.c.bf16 %v2484_v42, %v2482_v59  ;;  %v4741_v16 = vld [vmem:[#allocation3 + $0x164] ss:$8 sps:$4 sm:$0xff]   ;;  %v4739_v31 = vld [vmem:[#allocation3 + $0x160] ss:$8 sps:$4 sm:$0xff]   ;;  %v4744_v54 = vld [vmem:[#allocation3 + $0x174] ss:$8 sps:$4 sm:$0xff]  }
 0x24f   :  { %v2424_v21 = vadd.f32 %v5936_v23, %v2401_v19  ;;  %2969 = vmatprep.subr.bf16.mxu0 %v4723_v46  ;;  %3558 = vmatpush1.bf16.msra.mxu1 %v4718_v53  ;;  %v2476_v23 = vld [vmem:[#allocation2 + $0x18] ss:$2 sm:$0xff]  ;;  %v3061_v26 = vld [vmem:[#allocation2 + $0x1b] ss:$2 sm:$0xff]  ;;  %v3065_v8 = vld [vmem:[#allocation2 + $0x4b] ss:$2 sm:$0xff] }
 0x250   :  { %v2441_v63 = vmax.f32 %v2425_v13, 0.0  ;;  %3616 = vmatprep.subr.bf16.mxu1 %v4723_v46  ;;  %v2489_v29 = vpack.c.bf16 %v2476_v23, %v2474_v14  ;;  %v4747_v17 = vld [vmem:[#allocation3 + $0x184] ss:$8 sps:$4 sm:$0xff]   ;;  %v4745_v28 = vld [vmem:[#allocation3 + $0x180] ss:$8 sps:$4 sm:$0xff]  }
 0x251   :  { %v2440_v44 = vmax.f32 %v2424_v21, 0.0  ;;  %v3059_v49 = vld [vmem:[#allocation2 + $0x3] ss:$2 sm:$0xff]  ;;  %v4750_v36 = vld [vmem:[#allocation3 + $0x194] ss:$8 sps:$4 sm:$0xff]  }
 0x252   :  { %2457 = vst [vmem:[#allocation2 + $0xb0] sm:$0x3f] %v2441_v63  ;;  %v2522_v32 = vld [vmem:[#allocation2 + $0x91] ss:$2 sm:$0xff]  ;;  %v2865_v15 = vld [vmem:[#allocation2 + $0x92] ss:$2 sm:$0xff]  ;;  %v6091_v53 = vpack.c.bf16 %v3061_v26, %v3059_v49 }
 0x253   :  { %2456 = vst [vmem:[#allocation2 + $0xa8] sm:$0xff] %v2440_v44  ;;  %v2486_v41 = vld [vmem:[#allocation2 + $0x90] ss:$2 sm:$0xff]  ;;  %v4753_v4 = vld [vmem:[#allocation3 + $0x1a4] ss:$8 sps:$4 sm:$0xff]  }
 0x254   :  { %v4748_v7 = vld [vmem:[#allocation3 + $0x190] ss:$8 sps:$4 sm:$0xff]   ;;  %v4751_v1 = vld [vmem:[#allocation3 + $0x1a0] ss:$8 sps:$4 sm:$0xff]   ;;  %v4759_v25 = vld [vmem:[#allocation3 + $0x1c4] ss:$8 sps:$4 sm:$0xff]  }
 0x255   :  { %v3063_v33 = vld [vmem:[#allocation2 + $0x33] ss:$2 sm:$0xff]  ;;  %v3067_v2 = vld [vmem:[#allocation2 + $0x63] ss:$2 sm:$0xff]  ;;  %v3267_v44 = vld [vmem:[#allocation2 + $0x1c] ss:$2 sm:$0xff] }
 0x256   :  { %v6097_v37 = vpack.c.bf16 %v3065_v8, %v3063_v33  ;;  %v4754_v11 = vld [vmem:[#allocation3 + $0x1b0] ss:$8 sps:$4 sm:$0xff]   ;;  %v4757_v60 = vld [vmem:[#allocation3 + $0x1c0] ss:$8 sps:$4 sm:$0xff]   ;;  %v4771_v63 = vld [vmem:[#allocation3 + $0x204] ss:$8 sps:$4 sm:$0xff]  }
 0x257   :  { %v3069_v52 = vld [vmem:[#allocation2 + $0x7b] ss:$2 sm:$0xff]  ;;  %v3271_v23 = vld [vmem:[#allocation2 + $0x4c] ss:$2 sm:$0xff]  ;;  %v3275_v43 = vld [vmem:[#allocation2 + $0x7c] ss:$2 sm:$0xff] }
 0x258   :  { %v6103_v10 = vpack.c.bf16 %v3069_v52, %v3067_v2  ;;  %v4760_v38 = vld [vmem:[#allocation3 + $0x1d0] ss:$8 sps:$4 sm:$0xff]   ;;  %v4763_v62 = vld [vmem:[#allocation3 + $0x1e0] ss:$8 sps:$4 sm:$0xff]  }
 0x259   :  { %v3071_v19 = vld [vmem:[#allocation2 + $0x93] ss:$2 sm:$0xff] }
 0x25a   :  { %v2524_v55 = vld [vmem:[#allocation2 + $0xa9] ss:$2 sm:$0xff]  ;;  %v2867_v35 = vld [vmem:[#allocation2 + $0xaa] ss:$2 sm:$0xff] }
 0x25b   :  { %v6071_v20 = vpack.c.bf16 %v2524_v55, %v2522_v32  ;;  %v6073_v47 = vpack.c.bf16 %v2867_v35, %v2865_v15  ;;  %v2488_v22 = vld [vmem:[#allocation2 + $0xa8] ss:$2 sm:$0xff]  ;;  %v3073_v46 = vld [vmem:[#allocation2 + $0xab] ss:$2 sm:$0xff] }
 0x25c   :  { %v2492_v9 = vpack.c.bf16 %v2488_v22, %v2486_v41  ;;  %v6109_v13 = vpack.c.bf16 %v3073_v46, %v3071_v19  ;;  %v4766_v21 = vld [vmem:[#allocation3 + $0x1f0] ss:$8 sps:$4 sm:$0xff]   ;;  %v4769_v32 = vld [vmem:[#allocation3 + $0x200] ss:$8 sps:$4 sm:$0xff]   ;;  %v4774_v35 = vld [vmem:[#allocation3 + $0x214] ss:$8 sps:$4 sm:$0xff]  }
 0x25d   :  { %2689 = vmatmul.mubr.bf16.gmra.mrb[108].mxu0 %v6071_v20  ;;  %3533 = vmatmul.mubr.bf16.gmra.mrb[108].mxu1 %v6073_v47  ;;  %v3265_v55 = vld [vmem:[#allocation2 + $0x4] ss:$2 sm:$0xff]  ;;  %v3795_v22 = vld [vmem:[#allocation2 + $0x5] ss:$2 sm:$0xff]  ;;  %v3807_v49 = vld [vmem:[#allocation2 + $0x95] ss:$2 sm:$0xff] }
 0x25e   :  { %2811 = vmatprep.mubr.bf16.mxu0 %v6246_v27  ;;  %3575 = vmatprep.mubr.bf16.mxu1 %v6246_v27  ;;  %v6115_v15 = vpack.c.bf16 %v3267_v44, %v3265_v55  ;;  %v4775_v14 = vld [vmem:[#allocation3 + $0x220] ss:$8 sps:$4 sm:$0xff]   ;;  %v3279_v42 = vld [vmem:[#allocation2 + $0xac] ss:$2 sm:$0xff] }
 0x25f   :  { %v4781_v45 = vld [vmem:[#allocation3 + $0x240] ss:$8 sps:$4 sm:$0xff]  }
 0x260   :  { %v4787_v59 = vld [vmem:[#allocation3 + $0x260] ss:$8 sps:$4 sm:$0xff]  }
 0x265   :  { %2812 = vmatmul.mubr.bf16.vlgmr.msra.gmra.mrb[96].mxu0 %v2489_v29  ;;  %3576 = vmatmul.mubr.bf16.vlgmr.msra.gmra.mrb[96].mxu1 %v5981_v58  ;;  %v4730_v58 = vld [vmem:[#allocation3 + $0x130] ss:$8 sps:$4 sm:$0xff]  }
 0x266   :  { %2970 = vmatpush1.bf16.msra.mxu0 %v4721_v50  ;;  %3617 = vmatpush1.bf16.msra.mxu1 %v4721_v50  ;;  %v3269_v50 = vld [vmem:[#allocation2 + $0x34] ss:$2 sm:$0xff] }
 0x267   :  { %2971 = vmatprep.subr.bf16.mxu0 %v4726_v6  ;;  %3618 = vmatprep.subr.bf16.mxu1 %v4726_v6  ;;  %v3281_v29 = vpack.c.bf16 %v3271_v23, %v3269_v50  ;;  %v4780_v6 = vld [vmem:[#allocation3 + $0x234] ss:$8 sps:$4 sm:$0xff]  }
 0x268   :  { %2821 = vmatprep.mubr.bf16.mxu0 %v6246_v27  ;;  %3585 = vmatprep.mubr.bf16.mxu1 %v6246_v27 }
 0x26a   :  { %2972 = vmatpush1.bf16.msra.mxu0 %v4724_v3  ;;  %3619 = vmatpush1.bf16.msra.mxu1 %v4724_v3  ;;  %v4778_v3 = vld [vmem:[#allocation3 + $0x230] ss:$8 sps:$4 sm:$0xff]  }
 0x26b   :  { %2973 = vmatprep.subr.bf16.mxu0 %v4729_v40  ;;  %3620 = vmatprep.subr.bf16.mxu1 %v4729_v40  ;;  %v4783_v40 = vld [vmem:[#allocation3 + $0x244] ss:$8 sps:$4 sm:$0xff]  }
 0x26d   :  { %2822 = vmatmul.mubr.bf16.gmra.mrb[100].mxu0 %v2490_v57  ;;  %3586 = vmatmul.mubr.bf16.gmra.mrb[100].mxu1 %v6021_v34  ;;  %v4736_v34 = vld [vmem:[#allocation3 + $0x150] ss:$8 sps:$4 sm:$0xff]  }
 0x26e   :  { %2974 = vmatpush1.bf16.msra.mxu0 %v4727_v39  ;;  %3621 = vmatpush1.bf16.msra.mxu1 %v4727_v39  ;;  %v3273_v39 = vld [vmem:[#allocation2 + $0x64] ss:$2 sm:$0xff] }
 0x26f   :  { %2975 = vmatprep.subr.bf16.mxu0 %v4732_v12  ;;  %3622 = vmatprep.subr.bf16.mxu1 %v4732_v12  ;;  %v3282_v57 = vpack.c.bf16 %v3275_v43, %v3273_v39  ;;  %v4786_v12 = vld [vmem:[#allocation3 + $0x254] ss:$8 sps:$4 sm:$0xff]  }
 0x270   :  { %2831 = vmatprep.mubr.bf16.mxu0 %v6246_v27  ;;  %3595 = vmatprep.mubr.bf16.mxu1 %v6246_v27 }
 0x272   :  { %2976 = vmatpush1.bf16.msra.mxu0 %v4730_v58  ;;  %3623 = vmatpush1.bf16.msra.mxu1 %v4730_v58  ;;  %v4784_v58 = vld [vmem:[#allocation3 + $0x250] ss:$8 sps:$4 sm:$0xff]  }
 0x273   :  { %2977 = vmatprep.subr.bf16.mxu0 %v4735_v18  ;;  %3624 = vmatprep.subr.bf16.mxu1 %v4735_v18  ;;  %v4789_v18 = vld [vmem:[#allocation3 + $0x264] ss:$8 sps:$4 sm:$0xff]  }
 0x275   :  { %2832 = vmatmul.mubr.bf16.gmra.mrb[104].mxu0 %v2491_v61  ;;  %3596 = vmatmul.mubr.bf16.gmra.mrb[104].mxu1 %v6061_v0  ;;  %v4765_v0 = vld [vmem:[#allocation3 + $0x1e4] ss:$8 sps:$4 sm:$0xff]  }
 0x276   :  { %2978 = vmatpush1.bf16.msra.mxu0 %v4733_v30  ;;  %3625 = vmatpush1.bf16.msra.mxu1 %v4733_v30  ;;  %v3277_v30 = vld [vmem:[#allocation2 + $0x94] ss:$2 sm:$0xff] }
 0x277   :  { %2979 = vmatprep.subr.bf16.mxu0 %v4738_v24  ;;  %3626 = vmatprep.subr.bf16.mxu1 %v4738_v24  ;;  %v3283_v61 = vpack.c.bf16 %v3279_v42, %v3277_v30  ;;  %v4792_v24 = vld [vmem:[#allocation3 + $0x274] ss:$8 sps:$4 sm:$0xff]  }
 0x278   :  { %2841 = vmatprep.mubr.bf16.mxu0 %v6246_v27  ;;  %3605 = vmatprep.mubr.bf16.mxu1 %v6246_v27 }
 0x27a   :  { %2980 = vmatpush1.bf16.msra.mxu0 %v4736_v34  ;;  %3627 = vmatpush1.bf16.msra.mxu1 %v4736_v34  ;;  %v4790_v34 = vld [vmem:[#allocation3 + $0x270] ss:$8 sps:$4 sm:$0xff]  }
 0x27b   :  { %2981 = vmatprep.subr.bf16.mxu0 %v4741_v16  ;;  %3628 = vmatprep.subr.bf16.mxu1 %v4741_v16  ;;  %v3797_v16 = vld [vmem:[#allocation2 + $0x1d] ss:$2 sm:$0xff] }
 0x27c   :  { %v3810_v41 = vpack.c.bf16 %v3797_v16, %v3795_v22 }
 0x27d   :  { %2842 = vmatmul.mubr.bf16.gmra.mrb[108].mxu0 %v2492_v9  ;;  %3606 = vmatmul.mubr.bf16.gmra.mrb[108].mxu1 %v6071_v20  ;;  %v4772_v20 = vld [vmem:[#allocation3 + $0x210] ss:$8 sps:$4 sm:$0xff]  }
 0x27e   :  { %2982 = vmatpush1.bf16.msra.mxu0 %v4739_v31  ;;  %3629 = vmatpush1.bf16.msra.mxu1 %v4739_v31  ;;  %v3801_v31 = vld [vmem:[#allocation2 + $0x4d] ss:$2 sm:$0xff] }
 0x27f   :  { %2983 = vmatprep.subr.bf16.mxu0 %v4744_v54  ;;  %3630 = vmatprep.subr.bf16.mxu1 %v4744_v54  ;;  %v3799_v9 = vld [vmem:[#allocation2 + $0x35] ss:$2 sm:$0xff] }
 0x280   :  { %3001 = vmatprep.mubr.bf16.mxu0 %v6246_v27  ;;  %3648 = vmatprep.mubr.bf16.mxu1 %v6246_v27  ;;  %v3811_v54 = vpack.c.bf16 %v3801_v31, %v3799_v9 }
 0x282   :  { %2984 = vmatpush1.bf16.msra.mxu0 %v4742_v48  ;;  %3631 = vmatpush1.bf16.msra.mxu1 %v4742_v48  ;;  %v3805_v48 = vld [vmem:[#allocation2 + $0x7d] ss:$2 sm:$0xff] }
 0x283   :  { %3175 = vmatprep.subr.bf16.mxu0 %v4747_v17  ;;  %3705 = vmatprep.subr.bf16.mxu1 %v4747_v17  ;;  %v3803_v17 = vld [vmem:[#allocation2 + $0x65] ss:$2 sm:$0xff] }
 0x284   :  { %v3812_v26 = vpack.c.bf16 %v3805_v48, %v3803_v17 }
 0x285   :  { %3002 = vmatmul.mubr.bf16.vlgmr.msra.gmra.mrb[96].mxu0 %v5995_v51  ;;  %3649 = vmatmul.mubr.bf16.vlgmr.msra.gmra.mrb[96].mxu1 %v6091_v53  ;;  %v4756_v51 = vld [vmem:[#allocation3 + $0x1b4] ss:$8 sps:$4 sm:$0xff]  }
 0x286   :  { %3176 = vmatpush1.bf16.msra.mxu0 %v4745_v28  ;;  %3706 = vmatpush1.bf16.msra.mxu1 %v4745_v28  ;;  %v3809_v28 = vld [vmem:[#allocation2 + $0xad] ss:$2 sm:$0xff] }
 0x287   :  { %3177 = vmatprep.subr.bf16.mxu0 %v4750_v36  ;;  %3707 = vmatprep.subr.bf16.mxu1 %v4750_v36 }
 0x288   :  { %3011 = vmatprep.mubr.bf16.mxu0 %v6246_v27  ;;  %3658 = vmatprep.mubr.bf16.mxu1 %v6246_v27 }
 0x28a   :  { %3178 = vmatpush1.bf16.msra.mxu0 %v4748_v7  ;;  %3708 = vmatpush1.bf16.msra.mxu1 %v4748_v7 }
 0x28b   :  { %3179 = vmatprep.subr.bf16.mxu0 %v4753_v4  ;;  %3709 = vmatprep.subr.bf16.mxu1 %v4753_v4 }
 0x28d   :  { %3012 = vmatmul.mubr.bf16.gmra.mrb[100].mxu0 %v6037_v56  ;;  %3659 = vmatmul.mubr.bf16.gmra.mrb[100].mxu1 %v6097_v37  ;;  %v4762_v56 = vld [vmem:[#allocation3 + $0x1d4] ss:$8 sps:$4 sm:$0xff]  }
 0x28e   :  { %3180 = vmatpush1.bf16.msra.mxu0 %v4751_v1  ;;  %3710 = vmatpush1.bf16.msra.mxu1 %v4751_v1 }
 0x28f   :  { %3181 = vmatprep.subr.bf16.mxu0 %v4756_v51  ;;  %3711 = vmatprep.subr.bf16.mxu1 %v4756_v51 }
 0x290   :  { %3021 = vmatprep.mubr.bf16.mxu0 %v6246_v27  ;;  %3668 = vmatprep.mubr.bf16.mxu1 %v6246_v27 }
 0x292   :  { %3182 = vmatpush1.bf16.msra.mxu0 %v4754_v11  ;;  %3712 = vmatpush1.bf16.msra.mxu1 %v4754_v11  ;;  %v6140_v11 = vld [vmem:[%s6166_s4] ss:$0 sm:$0xff] }
 0x293   :  { %3183 = vmatprep.subr.bf16.mxu0 %v4759_v25  ;;  %3713 = vmatprep.subr.bf16.mxu1 %v4759_v25 }
 0x295   :  { %3022 = vmatmul.mubr.bf16.gmra.mrb[104].mxu0 %v6063_v5  ;;  %3669 = vmatmul.mubr.bf16.gmra.mrb[104].mxu1 %v6103_v10  ;;  %v4768_v5 = vld [vmem:[#allocation3 + $0x1f4] ss:$8 sps:$4 sm:$0xff]  }
 0x296   :  { %3184 = vmatpush1.bf16.msra.mxu0 %v4757_v60  ;;  %3714 = vmatpush1.bf16.msra.mxu1 %v4757_v60 }
 0x297   :  { %3185 = vmatprep.subr.bf16.mxu0 %v4762_v56  ;;  %3715 = vmatprep.subr.bf16.mxu1 %v4762_v56 }
 0x298   :  { %3031 = vmatprep.mubr.bf16.mxu0 %v6246_v27  ;;  %3678 = vmatprep.mubr.bf16.mxu1 %v6246_v27 }
 0x29a   :  { %3186 = vmatpush1.bf16.msra.mxu0 %v4760_v38  ;;  %3716 = vmatpush1.bf16.msra.mxu1 %v4760_v38 }
 0x29b   :  { %3187 = vmatprep.subr.bf16.mxu0 %v4765_v0  ;;  %3717 = vmatprep.subr.bf16.mxu1 %v4765_v0 }
 0x29d   :  { %3032 = vmatmul.mubr.bf16.gmra.mrb[108].mxu0 %v6073_v47  ;;  %3679 = vmatmul.mubr.bf16.gmra.mrb[108].mxu1 %v6109_v13  ;;  %v4777_v47 = vld [vmem:[#allocation3 + $0x224] ss:$8 sps:$4 sm:$0xff]  }
 0x29e   :  { %3188 = vmatpush1.bf16.msra.mxu0 %v4763_v62  ;;  %3718 = vmatpush1.bf16.msra.mxu1 %v4763_v62 }
 0x29f   :  { %3189 = vmatprep.subr.bf16.mxu0 %v4768_v5  ;;  %3719 = vmatprep.subr.bf16.mxu1 %v4768_v5 }
 0x2a0   :  { %3207 = vmatprep.mubr.bf16.mxu0 %v6246_v27  ;;  %3737 = vmatprep.mubr.bf16.mxu1 %v6246_v27 }
 0x2a2   :  { %3190 = vmatpush1.bf16.msra.mxu0 %v4766_v21  ;;  %3720 = vmatpush1.bf16.msra.mxu1 %v4766_v21 }
 0x2a3   :  { %3381 = vmatprep.subr.bf16.mxu0 %v4771_v63  ;;  %3814 = vmatprep.subr.bf16.mxu1 %v4771_v63 }
 0x2a5   :  { %3208 = vmatmul.mubr.bf16.vlgmr.msra.gmra.mrb[96].mxu0 %v6091_v53  ;;  %3738 = vmatmul.mubr.bf16.vlgmr.msra.gmra.mrb[96].mxu1 %v6115_v15  ;;  %v3813_v53 = vpack.c.bf16 %v3809_v28, %v3807_v49 }
 0x2a6   :  { %3382 = vmatpush1.bf16.msra.mxu0 %v4769_v32  ;;  %3815 = vmatpush1.bf16.msra.mxu1 %v4769_v32 }
 0x2a7   :  { %3383 = vmatprep.subr.bf16.mxu0 %v4774_v35  ;;  %3816 = vmatprep.subr.bf16.mxu1 %v4774_v35 }
 0x2a8   :  { %3217 = vmatprep.mubr.bf16.mxu0 %v6246_v27  ;;  %3747 = vmatprep.mubr.bf16.mxu1 %v6246_v27 }
 0x2aa   :  { %3384 = vmatpush1.bf16.msra.mxu0 %v4772_v20  ;;  %3817 = vmatpush1.bf16.msra.mxu1 %v4772_v20 }
 0x2ab   :  { %3385 = vmatprep.subr.bf16.mxu0 %v4777_v47  ;;  %3818 = vmatprep.subr.bf16.mxu1 %v4777_v47 }
 0x2ad   :  { %3218 = vmatmul.mubr.bf16.gmra.mrb[100].mxu0 %v6097_v37  ;;  %3748 = vmatmul.mubr.bf16.gmra.mrb[100].mxu1 %v3281_v29 }
 0x2ae   :  { %3386 = vmatpush1.bf16.msra.mxu0 %v4775_v14  ;;  %3819 = vmatpush1.bf16.msra.mxu1 %v4775_v14 }
 0x2af   :  { %3387 = vmatprep.subr.bf16.mxu0 %v4780_v6  ;;  %3820 = vmatprep.subr.bf16.mxu1 %v4780_v6 }
 0x2b0   :  { %3227 = vmatprep.mubr.bf16.mxu0 %v6246_v27  ;;  %3757 = vmatprep.mubr.bf16.mxu1 %v6246_v27 }
 0x2b2   :  { %3388 = vmatpush1.bf16.msra.mxu0 %v4778_v3  ;;  %3821 = vmatpush1.bf16.msra.mxu1 %v4778_v3 }
 0x2b3   :  { %3389 = vmatprep.subr.bf16.mxu0 %v4783_v40  ;;  %3822 = vmatprep.subr.bf16.mxu1 %v4783_v40 }
 0x2b5   :  { %3228 = vmatmul.mubr.bf16.gmra.mrb[104].mxu0 %v6103_v10  ;;  %3758 = vmatmul.mubr.bf16.gmra.mrb[104].mxu1 %v3282_v57 }
 0x2b6   :  { %3390 = vmatpush1.bf16.msra.mxu0 %v4781_v45  ;;  %3823 = vmatpush1.bf16.msra.mxu1 %v4781_v45 }
 0x2b7   :  { %3391 = vmatprep.subr.bf16.mxu0 %v4786_v12  ;;  %3824 = vmatprep.subr.bf16.mxu1 %v4786_v12 }
 0x2b8   :  { %3237 = vmatprep.mubr.bf16.mxu0 %v6246_v27  ;;  %3767 = vmatprep.mubr.bf16.mxu1 %v6246_v27 }
 0x2ba   :  { %3392 = vmatpush1.bf16.msra.mxu0 %v4784_v58  ;;  %3825 = vmatpush1.bf16.msra.mxu1 %v4784_v58 }
 0x2bb   :  { %3393 = vmatprep.subr.bf16.mxu0 %v4789_v18  ;;  %3826 = vmatprep.subr.bf16.mxu1 %v4789_v18 }
 0x2bd   :  { %3238 = vmatmul.mubr.bf16.gmra.mrb[108].mxu0 %v6109_v13  ;;  %3768 = vmatmul.mubr.bf16.gmra.mrb[108].mxu1 %v3283_v61 }
 0x2be   :  { %3394 = vmatpush1.bf16.msra.mxu0 %v4787_v59  ;;  %3827 = vmatpush1.bf16.msra.mxu1 %v4787_v59 }
 0x2bf   :  { %3395 = vmatprep.subr.bf16.mxu0 %v4792_v24  ;;  %3828 = vmatprep.subr.bf16.mxu1 %v4792_v24 }
 0x2c0   :  { %3413 = vmatprep.mubr.bf16.mxu0 %v6246_v27  ;;  %3846 = vmatprep.mubr.bf16.mxu1 %v6246_v27 }
 0x2c2   :  { %3396 = vmatpush1.bf16.msra.mxu0 %v4790_v34  ;;  %3829 = vmatpush1.bf16.msra.mxu1 %v4790_v34 }
 0x2c5   :  { %3414 = vmatmul.mubr.bf16.vlgmr.msra.gmra.mrb[96].mxu0 %v6115_v15  ;;  %3847 = vmatmul.mubr.bf16.vlgmr.msra.gmra.mrb[96].mxu1 %v3810_v41 }
 0x2c6   :  { %3423 = vmatprep.mubr.bf16.mxu0 %v6246_v27  ;;  %3856 = vmatprep.mubr.bf16.mxu1 %v6246_v27 }
 0x2cd   :  { %3424 = vmatmul.mubr.bf16.gmra.mrb[100].mxu0 %v3281_v29  ;;  %3857 = vmatmul.mubr.bf16.gmra.mrb[100].mxu1 %v3811_v54 }
 0x2ce   :  { %3433 = vmatprep.mubr.bf16.mxu0 %v6246_v27  ;;  %3866 = vmatprep.mubr.bf16.mxu1 %v6246_v27 }
 0x2d5   :  { %3434 = vmatmul.mubr.bf16.gmra.mrb[104].mxu0 %v3282_v57  ;;  %3867 = vmatmul.mubr.bf16.gmra.mrb[104].mxu1 %v3812_v26 }
 0x2d6   :  { %3443 = vmatprep.mubr.bf16.mxu0 %v6246_v27  ;;  %3876 = vmatprep.mubr.bf16.mxu1 %v6246_v27 }
 0x2dd   :  { %3444 = vmatmul.mubr.bf16.gmra.mrb[108].mxu0 %v3283_v61  ;;  %3877 = vmatmul.mubr.bf16.gmra.mrb[108].mxu1 %v3813_v53 }
 0x398   :  { %v3415_v36 = vpop.f32.mrb[96].mxu0  ;;  %v3848_v7 = vpop.f32.mrb[96].mxu1 }
 0x399   :  { %v3903_v4 = vmax.f32 %v3415_v36, %v3848_v7  ;;  %v3417_v8 = vpop.f32.mrb[97].mxu0  ;;  %v3850_v1 = vpop.f32.mrb[97].mxu1 }
 0x39a   :  { %v3904_v33 = vmax.f32 %v3417_v8, %v3850_v1  ;;  %v3419_v37 = vpop.f32.mrb[98].mxu0  ;;  %v3852_v51 = vpop.f32.mrb[98].mxu1 }
 0x39b   :  { %v3905_v25 = vmax.f32 %v3419_v37, %v3852_v51  ;;  %v3421_v27 = vpop.f32.mrb[99].mxu0  ;;  %v3854_v52 = vpop.f32.mrb[99].mxu1 }
 0x39c   :  { %v3919_v60 = vmax.f32 %v3903_v4, %v3904_v33  ;;  %v3906_v2 = vmax.f32 %v3421_v27, %v3854_v52 }
 0x39e   :  { %v3934_v10 = vadd.f32 %v6140_v11, %v3919_v60  ;;  %v3920_v56 = vmax.f32 %v3905_v25, %v3906_v2 }
 0x3a0   :  { %v3935_v38 = vadd.f32 %v6140_v11, %v3920_v56  ;;  %v3425_v0 = vpop.f32.mrb[100].mxu0  ;;  %v3858_v46 = vpop.f32.mrb[100].mxu1  ;;  %v3942_v5 = vmax.f32 %v3934_v10, 0.0 }
 0x3a1   :  { %v3907_v62 = vmax.f32 %v3425_v0, %v3858_v46  ;;  %v3427_v19 = vpop.f32.mrb[101].mxu0  ;;  %v3860_v13 = vpop.f32.mrb[101].mxu1 }
 0x3a2   :  { %v3943_v21 = vmax.f32 %v3935_v38, 0.0  ;;  %v3908_v63 = vmax.f32 %v3427_v19, %v3860_v13  ;;  %v3429_v44 = vpop.f32.mrb[102].mxu0  ;;  %v3862_v32 = vpop.f32.mrb[102].mxu1 }
 0x3a3   :  { %v3909_v55 = vmax.f32 %v3429_v44, %v3862_v32  ;;  %v3431_v15 = vpop.f32.mrb[103].mxu0  ;;  %v3864_v35 = vpop.f32.mrb[103].mxu1 }
 0x3a4   :  { %v4256_v20 = vpack.c.bf16 %v3943_v21, %v3942_v5  ;;  %v3921_v47 = vmax.f32 %v3907_v62, %v3908_v63  ;;  %v3910_v23 = vmax.f32 %v3431_v15, %v3864_v35 }
 0x3a6   :  { %4257 = vst [vmem:[%s6167_s5] sm:$0xff] %v4256_v20   ;;  %v3936_v14 = vadd.f32 %v6140_v11, %v3921_v47  ;;  %v3922_v50 = vmax.f32 %v3909_v55, %v3910_v23 }
 0x3a8   :  { %v3937_v29 = vadd.f32 %v6140_v11, %v3922_v50  ;;  %v3435_v6 = vpop.f32.mrb[104].mxu0  ;;  %v3868_v3 = vpop.f32.mrb[104].mxu1  ;;  %v3944_v39 = vmax.f32 %v3936_v14, 0.0 }
 0x3a9   :  { %v3911_v40 = vmax.f32 %v3435_v6, %v3868_v3  ;;  %v3437_v43 = vpop.f32.mrb[105].mxu0  ;;  %v3870_v45 = vpop.f32.mrb[105].mxu1 }
 0x3aa   :  { %v3945_v57 = vmax.f32 %v3937_v29, 0.0  ;;  %v3912_v12 = vmax.f32 %v3437_v43, %v3870_v45  ;;  %v3439_v58 = vpop.f32.mrb[106].mxu0  ;;  %v3872_v18 = vpop.f32.mrb[106].mxu1 }
 0x3ab   :  { %v3913_v42 = vmax.f32 %v3439_v58, %v3872_v18  ;;  %v3441_v59 = vpop.f32.mrb[107].mxu0  ;;  %v3874_v30 = vpop.f32.mrb[107].mxu1 }
 0x3ac   :  { %v4261_v61 = vpack.c.bf16 %v3945_v57, %v3944_v39  ;;  %v3923_v24 = vmax.f32 %v3911_v40, %v3912_v12  ;;  %v3914_v34 = vmax.f32 %v3441_v59, %v3874_v30 }
 0x3ae   :  { %4273 = vst [vmem:[%s6167_s5 + $0x8] sm:$0xff] %v4261_v61   ;;  %v3938_v16 = vadd.f32 %v6140_v11, %v3923_v24  ;;  %v3924_v22 = vmax.f32 %v3913_v42, %v3914_v34 }
 0x3b0   :  { %v3939_v41 = vadd.f32 %v6140_v11, %v3924_v22  ;;  %v3445_v31 = vpop.f32.mrb[108].mxu0  ;;  %v3878_v9 = vpop.f32.mrb[108].mxu1  ;;  %v3946_v26 = vmax.f32 %v3938_v16, 0.0 }
 0x3b1   :  { %v3915_v54 = vmax.f32 %v3445_v31, %v3878_v9  ;;  %v3447_v48 = vpop.f32.mrb[109].mxu0  ;;  %v3880_v17 = vpop.f32.mrb[109].mxu1 }
 0x3b2   :  { %v3947_v28 = vmax.f32 %v3939_v41, 0.0  ;;  %v3916_v49 = vmax.f32 %v3447_v48, %v3880_v17  ;;  %v3449_v53 = vpop.f32.mrb[110].mxu0  ;;  %v3882_v36 = vpop.f32.mrb[110].mxu1 }
 0x3b3   :  { %v3917_v7 = vmax.f32 %v3449_v53, %v3882_v36  ;;  %v3451_v4 = vpop.f32.mrb[111].mxu0  ;;  %v3884_v8 = vpop.f32.mrb[111].mxu1 }
 0x3b4   :  { %v4266_v1 = vpack.c.bf16 %v3947_v28, %v3946_v26  ;;  %v3925_v33 = vmax.f32 %v3915_v54, %v3916_v49  ;;  %v3918_v37 = vmax.f32 %v3451_v4, %v3884_v8 }
 0x3b6   :  { %4274 = vst [vmem:[%s6167_s5 + $0x10] sm:$0xff] %v4266_v1   ;;  %v3940_v51 = vadd.f32 %v6140_v11, %v3925_v33  ;;  %v3926_v25 = vmax.f32 %v3917_v7, %v3918_v37 }
 0x3b8   :  { %v3941_v27 = vadd.f32 %v6140_v11, %v3926_v25  ;;  %v3948_v52 = vmax.f32 %v3940_v51, 0.0 }
 0x3ba   :  { %v3949_v60 = vmax.f32 %v3941_v27, 0.0 }
 0x3bc   :  { %v4271_v2 = vpack.c.bf16 %v3949_v60, %v3948_v52 }
 0x3be   :  { %4275 = vst [vmem:[%s6167_s5 + $0x18] sm:$0xff] %v4271_v2  }
 0x3bf   :  { %3994 = vsyncpa [#allocation4], 1 }

</bundles_post_ra>
